<compile_context>
chip_gen: v5e
topology: v5e:2x2
jax: 0.10.0
libtpu: 0.0.40
codegen_flags: <defaults>
</compile_context>

<pallas_src>
import functools

import jax
import jax.numpy as jnp
from jax.experimental import pallas as pl
from jax.experimental.pallas import tpu as pltpu

NEG_SLOPE = 0.01  # F.leaky_relu default negative slope


def _leaky(x):
    # max(x, 0.01*x) == leaky_relu(x) for slope in (0,1); 2 VPU ops instead of 3.
    return jnp.maximum(x, NEG_SLOPE * x)


# ---------------------------------------------------------------------------
# Fused CBHG forward kernel (single invocation, everything VMEM-resident)
# ---------------------------------------------------------------------------
def cbhg_fused_kernel(
    # inputs (time-major rows: row = t*B + b)
    x_ref,        # (T*B, Cin)
    wbank_ref,    # (K*Cin, Cb)     tap-major packed conv-bank weights
    wp1_ref,      # (KP*Cb, F1)
    wp2_ref,      # (KP*F1, F2)
    wpre_ref,     # (F2, HW)
    whw_ref,      # (L, HW, 2*HW)   packed [W_h | W_t] per highway layer
    wgi_ref,      # (HW, 6*RNN)     packed GRU input weights [fwd r|z|n , bwd r|z|n]
    wgh_ref,      # (2*RNN, 3*RNN)  stacked GRU hidden weights [whf ; whb]
    vec_ref,      # (13+L, VW)      packed small vectors (biases / BN affine)
    # output
    o_ref,        # (T*B, 2*RNN)    time-major; cols [fwd | bwd]
    # scratch (VMEM)
    padb_scr,     # ((T+K-1)*B, Cin)   'same'-padded input rows
    pad1_scr,     # ((T+KP-1)*B, Cb)   padded pooled bank rows
    pad2_scr,     # ((T+KP-1)*B, F1)   padded proj1 output rows
    *, B, T, Cin, K, KP, Cb, F1, F2, HW, L, RNN):
    f32 = jnp.float32
    R = RNN
    TB = T * B
    pad_l = (K - 1) // 2
    pad_r = K - 1 - pad_l          # == K // 2
    pp = (KP - 1) // 2             # KP = 3 -> 1 each side

    # ---- packed small-vector slab (one DMA) -----------------------------------
    vec = vec_ref[...]
    I_BBANK, I_BSC, I_BSH = 0, 1, 2
    I_BP1, I_SC1, I_SH1 = 3, 4, 5
    I_BP2, I_SC2, I_SH2 = 6, 7, 8
    I_BPRE = 9
    I_BHW = 10                     # rows 10 .. 10+L-1
    I_GBI = 10 + L
    I_GBHF = 11 + L
    I_GBHB = 12 + L

    def vrow(i, n):
        return vec[i:i + 1, 0:n]   # (1, n), broadcasts over rows

    # ---- conv bank: 'same' pad in VMEM, K accumulated dots ---------------------
    x = x_ref[...]                                           # (T*B, Cin)
    padb_scr[0:pad_l * B, :] = jnp.zeros((pad_l * B, Cin), f32)
    padb_scr[pad_l * B:(pad_l + T) * B, :] = x
    padb_scr[(pad_l + T) * B:, :] = jnp.zeros((pad_r * B, Cin), f32)

    wb = wbank_ref[...]
    acc = None
    for s in range(K):                                       # static tap loop
        xs = padb_scr[s * B:(s + T) * B, :]                  # contiguous row slice
        part = jnp.dot(xs, wb[s * Cin:(s + 1) * Cin, :],
                       preferred_element_type=f32)
        acc = part if acc is None else acc + part
    bank = _leaky(acc + vrow(I_BBANK, Cb))
    bank = bank * vrow(I_BSC, Cb) + vrow(I_BSH, Cb)          # BatchNorm (eval) affine

    # ---- maxpool(k=2, s=1, 'same') written straight into the padded proj1 input
    pad1_scr[0:pp * B, :] = jnp.zeros((pp * B, Cb), f32)
    pad1_scr[pp * B:(pp + T - 1) * B, :] = jnp.maximum(bank[0:(T - 1) * B, :],
                                                       bank[B:T * B, :])
    pad1_scr[(pp + T - 1) * B:(pp + T) * B, :] = bank[(T - 1) * B:T * B, :]
    pad1_scr[(pp + T) * B:, :] = jnp.zeros(((KP - 1 - pp) * B, Cb), f32)

    # ---- conv projection 1 (k=3) + leaky_relu + BN ------------------------------
    w1 = wp1_ref[...]
    acc1 = None
    for s in range(KP):
        xs = pad1_scr[s * B:(s + T) * B, :]
        part = jnp.dot(xs, w1[s * Cb:(s + 1) * Cb, :], preferred_element_type=f32)
        acc1 = part if acc1 is None else acc1 + part
    h1 = _leaky(acc1 + vrow(I_BP1, F1))
    h1 = h1 * vrow(I_SC1, F1) + vrow(I_SH1, F1)

    # ---- conv projection 2 (k=3, act 'none') + BN + residual --------------------
    pad2_scr[0:pp * B, :] = jnp.zeros((pp * B, F1), f32)
    pad2_scr[pp * B:(pp + T) * B, :] = h1
    pad2_scr[(pp + T) * B:, :] = jnp.zeros(((KP - 1 - pp) * B, F1), f32)
    w2 = wp2_ref[...]
    acc2 = None
    for s in range(KP):
        xs = pad2_scr[s * B:(s + T) * B, :]
        part = jnp.dot(xs, w2[s * F1:(s + 1) * F1, :], preferred_element_type=f32)
        acc2 = part if acc2 is None else acc2 + part
    h2 = acc2 + vrow(I_BP2, F2)
    h2 = h2 * vrow(I_SC2, F2) + vrow(I_SH2, F2)
    h2 = h2 + x                                              # residual with the input

    # ---- pre-highway linear + leaky, then L highway layers ----------------------
    hwv = _leaky(jnp.dot(h2, wpre_ref[...], preferred_element_type=f32)
                 + vrow(I_BPRE, HW))
    for l in range(L):                                       # packed [W_h | W_t]: 1 dot
        ht = jnp.dot(hwv, whw_ref[l], preferred_element_type=f32) + vrow(I_BHW + l, 2 * HW)
        hpath = _leaky(ht[:, 0:HW])
        gate = jax.nn.sigmoid(ht[:, HW:2 * HW])
        hwv = gate * hpath + (1.0 - gate) * hwv              # (T*B, HW)

    # ---- fused bidirectional GRU (gate order r, z, n) ---------------------------
    # Input projections hoisted: ONE (T*B, HW) x (HW, 6R) matmul, bias included.
    gi_all = jnp.dot(hwv, wgi_ref[...], preferred_element_type=f32) + vrow(I_GBI, 6 * R)

    wh_bd = wgh_ref[...]                                     # (2R, 3R) = [whf ; whb]
    bhf = vrow(I_GBHF, 3 * R)
    bhb = vrow(I_GBHB, 3 * R)
    bh_stack = jnp.concatenate([jnp.broadcast_to(bhf, (B, 3 * R)),
                                jnp.broadcast_to(bhb, (B, 3 * R))], axis=0)  # (2B, 3R)
    # direction mask: fwd rows keep state in cols [0,R), bwd rows in cols [R,2R)
    dir_mask = jnp.concatenate(
        [jnp.concatenate([jnp.ones((B, R), f32), jnp.zeros((B, R), f32)], axis=1),
         jnp.concatenate([jnp.zeros((B, R), f32), jnp.ones((B, R), f32)], axis=1)],
        axis=0)                                              # (2B, 2R)

    h = jnp.zeros((2 * B, R), f32)        # rows: [fwd b=0..B-1, bwd b=0..B-1]
    h_ext = jnp.zeros((2 * B, 2 * R), f32)
    for t in range(T):                    # statically unrolled; serial recurrence
        tb = T - 1 - t
        gi = jnp.concatenate([gi_all[t * B:(t + 1) * B, 0:3 * R],
                              gi_all[tb * B:(tb + 1) * B, 3 * R:6 * R]], axis=0)
        gh = jnp.dot(h_ext, wh_bd, preferred_element_type=f32) + bh_stack     # (2B, 3R)
        r = jax.nn.sigmoid(gi[:, 0:R] + gh[:, 0:R])
        z = jax.nn.sigmoid(gi[:, R:2 * R] + gh[:, R:2 * R])
        n = jnp.tanh(gi[:, 2 * R:3 * R] + r * gh[:, 2 * R:3 * R])
        h = (1.0 - z) * n + z * h
        h_ext = jnp.concatenate([h, h], axis=1) * dir_mask
        # two (B, RNN) stores per step (fwd at time t, bwd at time tb)
        o_ref[t * B:(t + 1) * B, 0:R] = h[0:B, :]
        o_ref[tb * B:(tb + 1) * B, R:2 * R] = h[B:2 * B, :]


# ---------------------------------------------------------------------------
# Wrapper: one pallas_call, all operands as whole-array VMEM blocks
# ---------------------------------------------------------------------------
def cbhg_forward(x, ops, cfg):
    B, T, Cin = x.shape
    K, F = cfg["K"], cfg["F"]
    Cb = K * F
    F1, F2 = cfg["proj_filters"]
    HW, L, RNN = cfg["highway"], cfg["highway_lyr"], cfg["rnn"]
    KP = 3  # conv projection kernel size

    kern = functools.partial(
        cbhg_fused_kernel,
        B=B, T=T, Cin=Cin, K=K, KP=KP, Cb=Cb, F1=F1, F2=F2, HW=HW, L=L, RNN=RNN)

    # time-major rows (row = t*B + b): layout plumbing only, done outside the kernel
    x_tm = jnp.transpose(x, (1, 0, 2)).reshape(T * B, Cin)

    out_tm = pl.pallas_call(
        kern,
        out_shape=jax.ShapeDtypeStruct((T * B, 2 * RNN), jnp.float32),
        scratch_shapes=[
            pltpu.VMEM(((T + K - 1) * B, Cin), jnp.float32),   # padded input (bank)
            pltpu.VMEM(((T + KP - 1) * B, Cb), jnp.float32),   # padded pooled bank
            pltpu.VMEM(((T + KP - 1) * B, F1), jnp.float32),   # padded proj1 output
        ],
    )(x_tm, ops["w_bank"], ops["w_proj1"], ops["w_proj2"], ops["w_pre"],
      ops["w_hw"], ops["w_gru_i"], ops["w_gru_h"], ops["vec"])

    return jnp.transpose(out_tm.reshape(T, B, 2 * RNN), (1, 0, 2))


# ---------------------------------------------------------------------------
# Parameter construction (deterministic, synthetic) + host-side packing
# ---------------------------------------------------------------------------
def _bn_affine(key, c):
    k1, k2, k3, k4 = jax.random.split(key, 4)
    gamma = jax.random.uniform(k1, (c,), minval=0.8, maxval=1.2)
    beta = jax.random.normal(k2, (c,)) * 0.1
    mean = jax.random.normal(k3, (c,)) * 0.1
    var = jax.random.uniform(k4, (c,), minval=0.5, maxval=1.5)
    scale = gamma / jnp.sqrt(var + 1e-5)
    shift = beta - mean * scale
    return (scale.reshape(1, c).astype(jnp.float32),
            shift.reshape(1, c).astype(jnp.float32))


def _gru_params(key, hin, h):
    # packed gate weights/biases, gate order [r | z | n] (PyTorch GRU equations)
    kwi, kwh, kbi, kbh = jax.random.split(key, 4)
    f = lambda k, s: (jax.random.normal(k, s) * 0.1).astype(jnp.float32)
    return dict(wi=f(kwi, (hin, 3 * h)), wh=f(kwh, (h, 3 * h)),
                bi=f(kbi, (1, 3 * h)), bh=f(kbh, (1, 3 * h)))


def init_params(key, cfg):
    K, F, Cin = cfg["K"], cfg["F"], cfg["in_size"]
    Cb = K * F
    HW, L, RNN = cfg["highway"], cfg["highway_lyr"], cfg["rnn"]
    F1, F2 = cfg["proj_filters"]
    p = {}

    # --- conv bank: kernel sizes 1..K packed into K aligned taps, flattened ----
    pad_l = (K - 1) // 2
    w_bank = jnp.zeros((K, Cin, Cb), jnp.float32)
    biases = []
    for k in range(1, K + 1):
        key, k1, k2 = jax.random.split(key, 3)
        wk = (jax.random.normal(k1, (k, Cin, F)) * 0.1).astype(jnp.float32)
        bk = (jax.random.normal(k2, (F,)) * 0.1).astype(jnp.float32)
        off = pad_l - (k - 1) // 2
        for j in range(k):
            w_bank = w_bank.at[off + j, :, (k - 1) * F:k * F].set(wk[j])
        biases.append(bk)
    p["w_bank"] = w_bank.reshape(K * Cin, Cb)          # tap-major (K*Cin, Cb)
    p["b_bank"] = jnp.concatenate(biases).reshape(1, Cb)
    key, kb = jax.random.split(key)
    p["bank_bn_scale"], p["bank_bn_shift"] = _bn_affine(kb, Cb)

    # --- conv projections (k=3), flattened tap-major (3*Cin, Cout) --------------
    key, k1, k2, k3, k4, k5, k6 = jax.random.split(key, 7)
    p["w_proj1"] = (jax.random.normal(k1, (3, Cb, F1)) * 0.1).astype(jnp.float32).reshape(3 * Cb, F1)
    p["b_proj1"] = (jax.random.normal(k2, (1, F1)) * 0.1).astype(jnp.float32)
    p["proj1_bn_scale"], p["proj1_bn_shift"] = _bn_affine(k3, F1)
    p["w_proj2"] = (jax.random.normal(k4, (3, F1, F2)) * 0.1).astype(jnp.float32).reshape(3 * F1, F2)
    p["b_proj2"] = (jax.random.normal(k5, (1, F2)) * 0.1).astype(jnp.float32)
    p["proj2_bn_scale"], p["proj2_bn_shift"] = _bn_affine(k6, F2)

    # --- pre-highway + highway (h-path and gate weights packed on the out dim) --
    key, k1, k2, k3, k4, k5, k6 = jax.random.split(key, 7)
    p["wp"] = (jax.random.normal(k1, (F2, HW)) * 0.1).astype(jnp.float32)
    p["bp"] = (jax.random.normal(k2, (1, HW)) * 0.1).astype(jnp.float32)
    wh = (jax.random.normal(k3, (L, HW, HW)) * 0.1).astype(jnp.float32)
    bh = (jax.random.normal(k4, (L, 1, HW)) * 0.1).astype(jnp.float32)
    wt = (jax.random.normal(k5, (L, HW, HW)) * 0.1).astype(jnp.float32)
    bt = (jax.random.normal(k6, (L, 1, HW)) * 0.1 - 1.0).astype(jnp.float32)  # gate bias < 0
    p["whw"] = jnp.concatenate([wh, wt], axis=2)        # (L, HW, 2*HW)
    p["bhw"] = jnp.concatenate([bh, bt], axis=2)        # (L, 1, 2*HW)

    # --- bidirectional GRU ------------------------------------------------------
    key, kf, kb2 = jax.random.split(key, 3)
    p["gru_fwd"] = _gru_params(kf, HW, RNN)
    p["gru_bwd"] = _gru_params(kb2, HW, RNN)
    return p


def pack_params(p, cfg):
    """Host-side packing: 9 kernel operands instead of 25 tiny DMAs."""
    K, F = cfg["K"], cfg["F"]
    Cb = K * F
    HW, L, RNN = cfg["highway"], cfg["highway_lyr"], cfg["rnn"]
    VW = max(Cb, 2 * HW, 6 * RNN)

    def row(v):
        v = jnp.asarray(v, jnp.float32).reshape(1, -1)
        return jnp.pad(v, ((0, 0), (0, VW - v.shape[1])))

    rows = [
        row(p["b_bank"]), row(p["bank_bn_scale"]), row(p["bank_bn_shift"]),
        row(p["b_proj1"]), row(p["proj1_bn_scale"]), row(p["proj1_bn_shift"]),
        row(p["b_proj2"]), row(p["proj2_bn_scale"]), row(p["proj2_bn_shift"]),
        row(p["bp"]),
    ]
    rows += [row(p["bhw"][l]) for l in range(L)]
    rows.append(row(jnp.concatenate([p["gru_fwd"]["bi"], p["gru_bwd"]["bi"]], axis=1)))
    rows.append(row(p["gru_fwd"]["bh"]))
    rows.append(row(p["gru_bwd"]["bh"]))
    vec = jnp.concatenate(rows, axis=0)                               # (13+L, VW)

    w_gru_i = jnp.concatenate([p["gru_fwd"]["wi"], p["gru_bwd"]["wi"]], axis=1)  # (HW, 6R)
    w_gru_h = jnp.concatenate([p["gru_fwd"]["wh"], p["gru_bwd"]["wh"]], axis=0)  # (2R, 3R)

    return dict(w_bank=p["w_bank"], w_proj1=p["w_proj1"], w_proj2=p["w_proj2"],
                w_pre=p["wp"], w_hw=p["whw"], w_gru_i=w_gru_i, w_gru_h=w_gru_h,
                vec=vec)


if __name__ == "__main__":
    cfg = dict(B=2, T=16, in_size=16, K=4, F=16,
               proj_filters=[16, 16], highway=16, highway_lyr=4, rnn=16)
    assert cfg["proj_filters"][-1] == cfg["in_size"]  # mirrors the module's residual assert

    key = jax.random.PRNGKey(0)
    key, kx = jax.random.split(key)
    x = jax.random.normal(kx, (cfg["B"], cfg["T"], cfg["in_size"]), jnp.float32)
    params = init_params(key, cfg)
    ops = pack_params(params, cfg)

    fwd = jax.jit(lambda xx: cbhg_forward(xx, ops, cfg))
    out = jax.block_until_ready(fwd(x))

    assert out.shape == (cfg["B"], cfg["T"], 2 * cfg["rnn"]), out.shape
    assert bool(jnp.all(jnp.isfinite(out)))
    print("KERNEL_OK")
</pallas_src>

<mosaic_0001>
module attributes {stable_mosaic.version = 11 : i64} {
  func.func @cbhg_fused_kernel(%arg0: memref<32x16xf32, #tpu.memory_space<vmem>>, %arg1: memref<64x64xf32, #tpu.memory_space<vmem>>, %arg2: memref<192x16xf32, #tpu.memory_space<vmem>>, %arg3: memref<48x16xf32, #tpu.memory_space<vmem>>, %arg4: memref<16x16xf32, #tpu.memory_space<vmem>>, %arg5: memref<4x16x32xf32, #tpu.memory_space<vmem>>, %arg6: memref<16x96xf32, #tpu.memory_space<vmem>>, %arg7: memref<32x48xf32, #tpu.memory_space<vmem>>, %arg8: memref<17x96xf32, #tpu.memory_space<vmem>>, %arg9: memref<32x32xf32, #tpu.memory_space<vmem>>, %arg10: memref<38x16xf32, #tpu.memory_space<vmem>>, %arg11: memref<36x64xf32, #tpu.memory_space<vmem>>, %arg12: memref<36x16xf32, #tpu.memory_space<vmem>>) attributes {dimension_semantics = [], scalar_prefetch = 0 : i64, scratch_operands = 3 : i64, tpu.core_type = #tpu.core_type<tc>} {
    %c0 = arith.constant 0 : index
    %c0_0 = arith.constant 0 : index
    %0 = vector.load %arg8[%c0, %c0_0] : memref<17x96xf32, #tpu.memory_space<vmem>>, vector<17x96xf32>
    %c0_1 = arith.constant 0 : index
    %c0_2 = arith.constant 0 : index
    %1 = vector.load %arg0[%c0_1, %c0_2] : memref<32x16xf32, #tpu.memory_space<vmem>>, vector<32x16xf32>
    %cst = arith.constant 0.000000e+00 : f32
    %2 = vector.broadcast %cst : f32 to vector<2x16xf32>
    %c0_3 = arith.constant 0 : index
    %c0_4 = arith.constant 0 : index
    %3 = vector.load %arg10[%c0_3, %c0_4] : memref<38x16xf32, #tpu.memory_space<vmem>>, vector<2x16xf32>
    tpu.vector_store %arg10[%c0_3, %c0_4], %2 {strides = array<i32>} : memref<38x16xf32, #tpu.memory_space<vmem>>, vector<2x16xf32>,
    %c2 = arith.constant 2 : index
    %c0_5 = arith.constant 0 : index
    %4 = vector.load %arg10[%c2, %c0_5] : memref<38x16xf32, #tpu.memory_space<vmem>>, vector<32x16xf32>
    tpu.vector_store %arg10[%c2, %c0_5], %1 {strides = array<i32>} : memref<38x16xf32, #tpu.memory_space<vmem>>, vector<32x16xf32>,
    %cst_6 = arith.constant 0.000000e+00 : f32
    %5 = vector.broadcast %cst_6 : f32 to vector<4x16xf32>
    %c34 = arith.constant 34 : index
    %c0_7 = arith.constant 0 : index
    %6 = vector.load %arg10[%c34, %c0_7] : memref<38x16xf32, #tpu.memory_space<vmem>>, vector<4x16xf32>
    tpu.vector_store %arg10[%c34, %c0_7], %5 {strides = array<i32>} : memref<38x16xf32, #tpu.memory_space<vmem>>, vector<4x16xf32>,
    %c0_8 = arith.constant 0 : index
    %c0_9 = arith.constant 0 : index
    %7 = vector.load %arg1[%c0_8, %c0_9] : memref<64x64xf32, #tpu.memory_space<vmem>>, vector<64x64xf32>
    %c0_10 = arith.constant 0 : index
    %c0_11 = arith.constant 0 : index
    %8 = vector.load %arg10[%c0_10, %c0_11] : memref<38x16xf32, #tpu.memory_space<vmem>>, vector<32x16xf32>
    %9 = vector.extract_strided_slice %7 {offsets = [0, 0], sizes = [16, 64], strides = [1, 1]} : vector<64x64xf32> to vector<16x64xf32>
    %cst_12 = arith.constant dense<0.000000e+00> : vector<32x64xf32>
    %10 = tpu.matmul %8, %9, %cst_12 {dimension_numbers = #tpu.dot_dimension_numbers<[1], [0], [0], [1], [0, 0, 1, 1], [], []>} : vector<32x16xf32>, vector<16x64xf32>, vector<32x64xf32> -> vector<32x64xf32>
    %c2_13 = arith.constant 2 : index
    %c0_14 = arith.constant 0 : index
    %11 = vector.load %arg10[%c2_13, %c0_14] : memref<38x16xf32, #tpu.memory_space<vmem>>, vector<32x16xf32>
    %12 = vector.extract_strided_slice %7 {offsets = [16, 0], sizes = [16, 64], strides = [1, 1]} : vector<64x64xf32> to vector<16x64xf32>
    %cst_15 = arith.constant dense<0.000000e+00> : vector<32x64xf32>
    %13 = tpu.matmul %11, %12, %cst_15 {dimension_numbers = #tpu.dot_dimension_numbers<[1], [0], [0], [1], [0, 0, 1, 1], [], []>} : vector<32x16xf32>, vector<16x64xf32>, vector<32x64xf32> -> vector<32x64xf32>
    %14 = arith.addf %10, %13 : vector<32x64xf32>
    %c4 = arith.constant 4 : index
    %c0_16 = arith.constant 0 : index
    %15 = vector.load %arg10[%c4, %c0_16] : memref<38x16xf32, #tpu.memory_space<vmem>>, vector<32x16xf32>
    %16 = vector.extract_strided_slice %7 {offsets = [32, 0], sizes = [16, 64], strides = [1, 1]} : vector<64x64xf32> to vector<16x64xf32>
    %cst_17 = arith.constant dense<0.000000e+00> : vector<32x64xf32>
    %17 = tpu.matmul %15, %16, %cst_17 {dimension_numbers = #tpu.dot_dimension_numbers<[1], [0], [0], [1], [0, 0, 1, 1], [], []>} : vector<32x16xf32>, vector<16x64xf32>, vector<32x64xf32> -> vector<32x64xf32>
    %18 = arith.addf %14, %17 : vector<32x64xf32>
    %c6 = arith.constant 6 : index
    %c0_18 = arith.constant 0 : index
    %19 = vector.load %arg10[%c6, %c0_18] : memref<38x16xf32, #tpu.memory_space<vmem>>, vector<32x16xf32>
    %20 = vector.extract_strided_slice %7 {offsets = [48, 0], sizes = [16, 64], strides = [1, 1]} : vector<64x64xf32> to vector<16x64xf32>
    %cst_19 = arith.constant dense<0.000000e+00> : vector<32x64xf32>
    %21 = tpu.matmul %19, %20, %cst_19 {dimension_numbers = #tpu.dot_dimension_numbers<[1], [0], [0], [1], [0, 0, 1, 1], [], []>} : vector<32x16xf32>, vector<16x64xf32>, vector<32x64xf32> -> vector<32x64xf32>
    %22 = arith.addf %18, %21 : vector<32x64xf32>
    %23 = vector.extract_strided_slice %0 {offsets = [0, 0], sizes = [1, 64], strides = [1, 1]} : vector<17x96xf32> to vector<1x64xf32>
    %24 = vector.broadcast %23 : vector<1x64xf32> to vector<32x64xf32>
    %25 = arith.addf %22, %24 : vector<32x64xf32>
    %cst_20 = arith.constant 0.00999999977 : f32
    %26 = vector.broadcast %cst_20 : f32 to vector<32x64xf32>
    %27 = arith.mulf %26, %25 : vector<32x64xf32>
    %28 = arith.maximumf %25, %27 : vector<32x64xf32>
    %29 = vector.extract_strided_slice %0 {offsets = [1, 0], sizes = [1, 64], strides = [1, 1]} : vector<17x96xf32> to vector<1x64xf32>
    %30 = vector.broadcast %29 : vector<1x64xf32> to vector<32x64xf32>
    %31 = arith.mulf %28, %30 : vector<32x64xf32>
    %32 = vector.extract_strided_slice %0 {offsets = [2, 0], sizes = [1, 64], strides = [1, 1]} : vector<17x96xf32> to vector<1x64xf32>
    %33 = vector.broadcast %32 : vector<1x64xf32> to vector<32x64xf32>
    %34 = arith.addf %31, %33 : vector<32x64xf32>
    %cst_21 = arith.constant 0.000000e+00 : f32
    %35 = vector.broadcast %cst_21 : f32 to vector<2x64xf32>
    %c0_22 = arith.constant 0 : index
    %c0_23 = arith.constant 0 : index
    %36 = vector.load %arg11[%c0_22, %c0_23] : memref<36x64xf32, #tpu.memory_space<vmem>>, vector<2x64xf32>
    tpu.vector_store %arg11[%c0_22, %c0_23], %35 {strides = array<i32>} : memref<36x64xf32, #tpu.memory_space<vmem>>, vector<2x64xf32>,
    %37 = vector.extract_strided_slice %34 {offsets = [0, 0], sizes = [30, 64], strides = [1, 1]} : vector<32x64xf32> to vector<30x64xf32>
    %38 = vector.extract_strided_slice %34 {offsets = [2, 0], sizes = [30, 64], strides = [1, 1]} : vector<32x64xf32> to vector<30x64xf32>
    %39 = arith.maximumf %37, %38 : vector<30x64xf32>
    %c2_24 = arith.constant 2 : index
    %c0_25 = arith.constant 0 : index
    %40 = vector.load %arg11[%c2_24, %c0_25] : memref<36x64xf32, #tpu.memory_space<vmem>>, vector<30x64xf32>
    tpu.vector_store %arg11[%c2_24, %c0_25], %39 {strides = array<i32>} : memref<36x64xf32, #tpu.memory_space<vmem>>, vector<30x64xf32>,
    %41 = vector.extract_strided_slice %34 {offsets = [30, 0], sizes = [2, 64], strides = [1, 1]} : vector<32x64xf32> to vector<2x64xf32>
    %c32 = arith.constant 32 : index
    %c0_26 = arith.constant 0 : index
    %42 = vector.load %arg11[%c32, %c0_26] : memref<36x64xf32, #tpu.memory_space<vmem>>, vector<2x64xf32>
    tpu.vector_store %arg11[%c32, %c0_26], %41 {strides = array<i32>} : memref<36x64xf32, #tpu.memory_space<vmem>>, vector<2x64xf32>,
    %cst_27 = arith.constant 0.000000e+00 : f32
    %43 = vector.broadcast %cst_27 : f32 to vector<2x64xf32>
    %c34_28 = arith.constant 34 : index
    %c0_29 = arith.constant 0 : index
    %44 = vector.load %arg11[%c34_28, %c0_29] : memref<36x64xf32, #tpu.memory_space<vmem>>, vector<2x64xf32>
    tpu.vector_store %arg11[%c34_28, %c0_29], %43 {strides = array<i32>} : memref<36x64xf32, #tpu.memory_space<vmem>>, vector<2x64xf32>,
    %c0_30 = arith.constant 0 : index
    %c0_31 = arith.constant 0 : index
    %45 = vector.load %arg2[%c0_30, %c0_31] : memref<192x16xf32, #tpu.memory_space<vmem>>, vector<192x16xf32>
    %c0_32 = arith.constant 0 : index
    %c0_33 = arith.constant 0 : index
    %46 = vector.load %arg11[%c0_32, %c0_33] : memref<36x64xf32, #tpu.memory_space<vmem>>, vector<32x64xf32>
    %47 = vector.extract_strided_slice %45 {offsets = [0, 0], sizes = [64, 16], strides = [1, 1]} : vector<192x16xf32> to vector<64x16xf32>
    %cst_34 = arith.constant dense<0.000000e+00> : vector<32x16xf32>
    %48 = tpu.matmul %46, %47, %cst_34 {dimension_numbers = #tpu.dot_dimension_numbers<[1], [0], [0], [1], [0, 0, 1, 1], [], []>} : vector<32x64xf32>, vector<64x16xf32>, vector<32x16xf32> -> vector<32x16xf32>
    %c2_35 = arith.constant 2 : index
    %c0_36 = arith.constant 0 : index
    %49 = vector.load %arg11[%c2_35, %c0_36] : memref<36x64xf32, #tpu.memory_space<vmem>>, vector<32x64xf32>
    %50 = vector.extract_strided_slice %45 {offsets = [64, 0], sizes = [64, 16], strides = [1, 1]} : vector<192x16xf32> to vector<64x16xf32>
    %cst_37 = arith.constant dense<0.000000e+00> : vector<32x16xf32>
    %51 = tpu.matmul %49, %50, %cst_37 {dimension_numbers = #tpu.dot_dimension_numbers<[1], [0], [0], [1], [0, 0, 1, 1], [], []>} : vector<32x64xf32>, vector<64x16xf32>, vector<32x16xf32> -> vector<32x16xf32>
    %52 = arith.addf %48, %51 : vector<32x16xf32>
    %c4_38 = arith.constant 4 : index
    %c0_39 = arith.constant 0 : index
    %53 = vector.load %arg11[%c4_38, %c0_39] : memref<36x64xf32, #tpu.memory_space<vmem>>, vector<32x64xf32>
    %54 = vector.extract_strided_slice %45 {offsets = [128, 0], sizes = [64, 16], strides = [1, 1]} : vector<192x16xf32> to vector<64x16xf32>
    %cst_40 = arith.constant dense<0.000000e+00> : vector<32x16xf32>
    %55 = tpu.matmul %53, %54, %cst_40 {dimension_numbers = #tpu.dot_dimension_numbers<[1], [0], [0], [1], [0, 0, 1, 1], [], []>} : vector<32x64xf32>, vector<64x16xf32>, vector<32x16xf32> -> vector<32x16xf32>
    %56 = arith.addf %52, %55 : vector<32x16xf32>
    %57 = vector.extract_strided_slice %0 {offsets = [3, 0], sizes = [1, 16], strides = [1, 1]} : vector<17x96xf32> to vector<1x16xf32>
    %58 = vector.broadcast %57 : vector<1x16xf32> to vector<32x16xf32>
    %59 = arith.addf %56, %58 : vector<32x16xf32>
    %cst_41 = arith.constant 0.00999999977 : f32
    %60 = vector.broadcast %cst_41 : f32 to vector<32x16xf32>
    %61 = arith.mulf %60, %59 : vector<32x16xf32>
    %62 = arith.maximumf %59, %61 : vector<32x16xf32>
    %63 = vector.extract_strided_slice %0 {offsets = [4, 0], sizes = [1, 16], strides = [1, 1]} : vector<17x96xf32> to vector<1x16xf32>
    %64 = vector.broadcast %63 : vector<1x16xf32> to vector<32x16xf32>
    %65 = arith.mulf %62, %64 : vector<32x16xf32>
    %66 = vector.extract_strided_slice %0 {offsets = [5, 0], sizes = [1, 16], strides = [1, 1]} : vector<17x96xf32> to vector<1x16xf32>
    %67 = vector.broadcast %66 : vector<1x16xf32> to vector<32x16xf32>
    %68 = arith.addf %65, %67 : vector<32x16xf32>
    %cst_42 = arith.constant 0.000000e+00 : f32
    %69 = vector.broadcast %cst_42 : f32 to vector<2x16xf32>
    %c0_43 = arith.constant 0 : index
    %c0_44 = arith.constant 0 : index
    %70 = vector.load %arg12[%c0_43, %c0_44] : memref<36x16xf32, #tpu.memory_space<vmem>>, vector<2x16xf32>
    tpu.vector_store %arg12[%c0_43, %c0_44], %69 {strides = array<i32>} : memref<36x16xf32, #tpu.memory_space<vmem>>, vector<2x16xf32>,
    %c2_45 = arith.constant 2 : index
    %c0_46 = arith.constant 0 : index
    %71 = vector.load %arg12[%c2_45, %c0_46] : memref<36x16xf32, #tpu.memory_space<vmem>>, vector<32x16xf32>
    tpu.vector_store %arg12[%c2_45, %c0_46], %68 {strides = array<i32>} : memref<36x16xf32, #tpu.memory_space<vmem>>, vector<32x16xf32>,
    %cst_47 = arith.constant 0.000000e+00 : f32
    %72 = vector.broadcast %cst_47 : f32 to vector<2x16xf32>
    %c34_48 = arith.constant 34 : index
    %c0_49 = arith.constant 0 : index
    %73 = vector.load %arg12[%c34_48, %c0_49] : memref<36x16xf32, #tpu.memory_space<vmem>>, vector<2x16xf32>
    tpu.vector_store %arg12[%c34_48, %c0_49], %72 {strides = array<i32>} : memref<36x16xf32, #tpu.memory_space<vmem>>, vector<2x16xf32>,
    %c0_50 = arith.constant 0 : index
    %c0_51 = arith.constant 0 : index
    %74 = vector.load %arg3[%c0_50, %c0_51] : memref<48x16xf32, #tpu.memory_space<vmem>>, vector<48x16xf32>
    %c0_52 = arith.constant 0 : index
    %c0_53 = arith.constant 0 : index
    %75 = vector.load %arg12[%c0_52, %c0_53] : memref<36x16xf32, #tpu.memory_space<vmem>>, vector<32x16xf32>
    %76 = vector.extract_strided_slice %74 {offsets = [0, 0], sizes = [16, 16], strides = [1, 1]} : vector<48x16xf32> to vector<16x16xf32>
    %cst_54 = arith.constant dense<0.000000e+00> : vector<32x16xf32>
    %77 = tpu.matmul %75, %76, %cst_54 {dimension_numbers = #tpu.dot_dimension_numbers<[1], [0], [0], [1], [0, 0, 1, 1], [], []>} : vector<32x16xf32>, vector<16x16xf32>, vector<32x16xf32> -> vector<32x16xf32>
    %c2_55 = arith.constant 2 : index
    %c0_56 = arith.constant 0 : index
    %78 = vector.load %arg12[%c2_55, %c0_56] : memref<36x16xf32, #tpu.memory_space<vmem>>, vector<32x16xf32>
    %79 = vector.extract_strided_slice %74 {offsets = [16, 0], sizes = [16, 16], strides = [1, 1]} : vector<48x16xf32> to vector<16x16xf32>
    %cst_57 = arith.constant dense<0.000000e+00> : vector<32x16xf32>
    %80 = tpu.matmul %78, %79, %cst_57 {dimension_numbers = #tpu.dot_dimension_numbers<[1], [0], [0], [1], [0, 0, 1, 1], [], []>} : vector<32x16xf32>, vector<16x16xf32>, vector<32x16xf32> -> vector<32x16xf32>
    %81 = arith.addf %77, %80 : vector<32x16xf32>
    %c4_58 = arith.constant 4 : index
    %c0_59 = arith.constant 0 : index
    %82 = vector.load %arg12[%c4_58, %c0_59] : memref<36x16xf32, #tpu.memory_space<vmem>>, vector<32x16xf32>
    %83 = vector.extract_strided_slice %74 {offsets = [32, 0], sizes = [16, 16], strides = [1, 1]} : vector<48x16xf32> to vector<16x16xf32>
    %cst_60 = arith.constant dense<0.000000e+00> : vector<32x16xf32>
    %84 = tpu.matmul %82, %83, %cst_60 {dimension_numbers = #tpu.dot_dimension_numbers<[1], [0], [0], [1], [0, 0, 1, 1], [], []>} : vector<32x16xf32>, vector<16x16xf32>, vector<32x16xf32> -> vector<32x16xf32>
    %85 = arith.addf %81, %84 : vector<32x16xf32>
    %86 = vector.extract_strided_slice %0 {offsets = [6, 0], sizes = [1, 16], strides = [1, 1]} : vector<17x96xf32> to vector<1x16xf32>
    %87 = vector.broadcast %86 : vector<1x16xf32> to vector<32x16xf32>
    %88 = arith.addf %85, %87 : vector<32x16xf32>
    %89 = vector.extract_strided_slice %0 {offsets = [7, 0], sizes = [1, 16], strides = [1, 1]} : vector<17x96xf32> to vector<1x16xf32>
    %90 = vector.broadcast %89 : vector<1x16xf32> to vector<32x16xf32>
    %91 = arith.mulf %88, %90 : vector<32x16xf32>
    %92 = vector.extract_strided_slice %0 {offsets = [8, 0], sizes = [1, 16], strides = [1, 1]} : vector<17x96xf32> to vector<1x16xf32>
    %93 = vector.broadcast %92 : vector<1x16xf32> to vector<32x16xf32>
    %94 = arith.addf %91, %93 : vector<32x16xf32>
    %95 = arith.addf %94, %1 : vector<32x16xf32>
    %c0_61 = arith.constant 0 : index
    %c0_62 = arith.constant 0 : index
    %96 = vector.load %arg4[%c0_61, %c0_62] : memref<16x16xf32, #tpu.memory_space<vmem>>, vector<16x16xf32>
    %cst_63 = arith.constant dense<0.000000e+00> : vector<32x16xf32>
    %97 = tpu.matmul %95, %96, %cst_63 {dimension_numbers = #tpu.dot_dimension_numbers<[1], [0], [0], [1], [0, 0, 1, 1], [], []>} : vector<32x16xf32>, vector<16x16xf32>, vector<32x16xf32> -> vector<32x16xf32>
    %98 = vector.extract_strided_slice %0 {offsets = [9, 0], sizes = [1, 16], strides = [1, 1]} : vector<17x96xf32> to vector<1x16xf32>
    %99 = vector.broadcast %98 : vector<1x16xf32> to vector<32x16xf32>
    %100 = arith.addf %97, %99 : vector<32x16xf32>
    %cst_64 = arith.constant 0.00999999977 : f32
    %101 = vector.broadcast %cst_64 : f32 to vector<32x16xf32>
    %102 = arith.mulf %101, %100 : vector<32x16xf32>
    %103 = arith.maximumf %100, %102 : vector<32x16xf32>
    %c0_65 = arith.constant 0 : index
    %c0_66 = arith.constant 0 : index
    %c0_67 = arith.constant 0 : index
    %104 = vector.load %arg5[%c0_65, %c0_66, %c0_67] : memref<4x16x32xf32, #tpu.memory_space<vmem>>, vector<1x16x32xf32>
    %105 = vector.shape_cast %104 : vector<1x16x32xf32> to vector<16x32xf32>
    %cst_68 = arith.constant dense<0.000000e+00> : vector<32x32xf32>
    %106 = tpu.matmul %103, %105, %cst_68 {dimension_numbers = #tpu.dot_dimension_numbers<[1], [0], [0], [1], [0, 0, 1, 1], [], []>} : vector<32x16xf32>, vector<16x32xf32>, vector<32x32xf32> -> vector<32x32xf32>
    %107 = vector.extract_strided_slice %0 {offsets = [10, 0], sizes = [1, 32], strides = [1, 1]} : vector<17x96xf32> to vector<1x32xf32>
    %108 = vector.broadcast %107 : vector<1x32xf32> to vector<32x32xf32>
    %109 = arith.addf %106, %108 : vector<32x32xf32>
    %110 = vector.extract_strided_slice %109 {offsets = [0, 0], sizes = [32, 16], strides = [1, 1]} : vector<32x32xf32> to vector<32x16xf32>
    %cst_69 = arith.constant 0.00999999977 : f32
    %111 = vector.broadcast %cst_69 : f32 to vector<32x16xf32>
    %112 = arith.mulf %111, %110 : vector<32x16xf32>
    %113 = arith.maximumf %110, %112 : vector<32x16xf32>
    %114 = vector.extract_strided_slice %109 {offsets = [0, 16], sizes = [32, 16], strides = [1, 1]} : vector<32x32xf32> to vector<32x16xf32>
    %115 = arith.negf %114 : vector<32x16xf32>
    %116 = math.exp %115 : vector<32x16xf32>
    %cst_70 = arith.constant 1.000000e+00 : f32
    %117 = vector.broadcast %cst_70 : f32 to vector<32x16xf32>
    %118 = arith.addf %117, %116 : vector<32x16xf32>
    %119 = arith.divf %117, %118 : vector<32x16xf32>
    %120 = arith.mulf %119, %113 : vector<32x16xf32>
    %cst_71 = arith.constant 1.000000e+00 : f32
    %121 = vector.broadcast %cst_71 : f32 to vector<32x16xf32>
    %122 = arith.subf %121, %119 : vector<32x16xf32>
    %123 = arith.mulf %122, %103 : vector<32x16xf32>
    %124 = arith.addf %120, %123 : vector<32x16xf32>
    %c1 = arith.constant 1 : index
    %c0_72 = arith.constant 0 : index
    %c0_73 = arith.constant 0 : index
    %125 = vector.load %arg5[%c1, %c0_72, %c0_73] : memref<4x16x32xf32, #tpu.memory_space<vmem>>, vector<1x16x32xf32>
    %126 = vector.shape_cast %125 : vector<1x16x32xf32> to vector<16x32xf32>
    %cst_74 = arith.constant dense<0.000000e+00> : vector<32x32xf32>
    %127 = tpu.matmul %124, %126, %cst_74 {dimension_numbers = #tpu.dot_dimension_numbers<[1], [0], [0], [1], [0, 0, 1, 1], [], []>} : vector<32x16xf32>, vector<16x32xf32>, vector<32x32xf32> -> vector<32x32xf32>
    %128 = vector.extract_strided_slice %0 {offsets = [11, 0], sizes = [1, 32], strides = [1, 1]} : vector<17x96xf32> to vector<1x32xf32>
    %129 = vector.broadcast %128 : vector<1x32xf32> to vector<32x32xf32>
    %130 = arith.addf %127, %129 : vector<32x32xf32>
    %131 = vector.extract_strided_slice %130 {offsets = [0, 0], sizes = [32, 16], strides = [1, 1]} : vector<32x32xf32> to vector<32x16xf32>
    %cst_75 = arith.constant 0.00999999977 : f32
    %132 = vector.broadcast %cst_75 : f32 to vector<32x16xf32>
    %133 = arith.mulf %132, %131 : vector<32x16xf32>
    %134 = arith.maximumf %131, %133 : vector<32x16xf32>
    %135 = vector.extract_strided_slice %130 {offsets = [0, 16], sizes = [32, 16], strides = [1, 1]} : vector<32x32xf32> to vector<32x16xf32>
    %136 = arith.negf %135 : vector<32x16xf32>
    %137 = math.exp %136 : vector<32x16xf32>
    %cst_76 = arith.constant 1.000000e+00 : f32
    %138 = vector.broadcast %cst_76 : f32 to vector<32x16xf32>
    %139 = arith.addf %138, %137 : vector<32x16xf32>
    %140 = arith.divf %138, %139 : vector<32x16xf32>
    %141 = arith.mulf %140, %134 : vector<32x16xf32>
    %cst_77 = arith.constant 1.000000e+00 : f32
    %142 = vector.broadcast %cst_77 : f32 to vector<32x16xf32>
    %143 = arith.subf %142, %140 : vector<32x16xf32>
    %144 = arith.mulf %143, %124 : vector<32x16xf32>
    %145 = arith.addf %141, %144 : vector<32x16xf32>
    %c2_78 = arith.constant 2 : index
    %c0_79 = arith.constant 0 : index
    %c0_80 = arith.constant 0 : index
    %146 = vector.load %arg5[%c2_78, %c0_79, %c0_80] : memref<4x16x32xf32, #tpu.memory_space<vmem>>, vector<1x16x32xf32>
    %147 = vector.shape_cast %146 : vector<1x16x32xf32> to vector<16x32xf32>
    %cst_81 = arith.constant dense<0.000000e+00> : vector<32x32xf32>
    %148 = tpu.matmul %145, %147, %cst_81 {dimension_numbers = #tpu.dot_dimension_numbers<[1], [0], [0], [1], [0, 0, 1, 1], [], []>} : vector<32x16xf32>, vector<16x32xf32>, vector<32x32xf32> -> vector<32x32xf32>
    %149 = vector.extract_strided_slice %0 {offsets = [12, 0], sizes = [1, 32], strides = [1, 1]} : vector<17x96xf32> to vector<1x32xf32>
    %150 = vector.broadcast %149 : vector<1x32xf32> to vector<32x32xf32>
    %151 = arith.addf %148, %150 : vector<32x32xf32>
    %152 = vector.extract_strided_slice %151 {offsets = [0, 0], sizes = [32, 16], strides = [1, 1]} : vector<32x32xf32> to vector<32x16xf32>
    %cst_82 = arith.constant 0.00999999977 : f32
    %153 = vector.broadcast %cst_82 : f32 to vector<32x16xf32>
    %154 = arith.mulf %153, %152 : vector<32x16xf32>
    %155 = arith.maximumf %152, %154 : vector<32x16xf32>
    %156 = vector.extract_strided_slice %151 {offsets = [0, 16], sizes = [32, 16], strides = [1, 1]} : vector<32x32xf32> to vector<32x16xf32>
    %157 = arith.negf %156 : vector<32x16xf32>
    %158 = math.exp %157 : vector<32x16xf32>
    %cst_83 = arith.constant 1.000000e+00 : f32
    %159 = vector.broadcast %cst_83 : f32 to vector<32x16xf32>
    %160 = arith.addf %159, %158 : vector<32x16xf32>
    %161 = arith.divf %159, %160 : vector<32x16xf32>
    %162 = arith.mulf %161, %155 : vector<32x16xf32>
    %cst_84 = arith.constant 1.000000e+00 : f32
    %163 = vector.broadcast %cst_84 : f32 to vector<32x16xf32>
    %164 = arith.subf %163, %161 : vector<32x16xf32>
    %165 = arith.mulf %164, %145 : vector<32x16xf32>
    %166 = arith.addf %162, %165 : vector<32x16xf32>
    %c3 = arith.constant 3 : index
    %c0_85 = arith.constant 0 : index
    %c0_86 = arith.constant 0 : index
    %167 = vector.load %arg5[%c3, %c0_85, %c0_86] : memref<4x16x32xf32, #tpu.memory_space<vmem>>, vector<1x16x32xf32>
    %168 = vector.shape_cast %167 : vector<1x16x32xf32> to vector<16x32xf32>
    %cst_87 = arith.constant dense<0.000000e+00> : vector<32x32xf32>
    %169 = tpu.matmul %166, %168, %cst_87 {dimension_numbers = #tpu.dot_dimension_numbers<[1], [0], [0], [1], [0, 0, 1, 1], [], []>} : vector<32x16xf32>, vector<16x32xf32>, vector<32x32xf32> -> vector<32x32xf32>
    %170 = vector.extract_strided_slice %0 {offsets = [13, 0], sizes = [1, 32], strides = [1, 1]} : vector<17x96xf32> to vector<1x32xf32>
    %171 = vector.broadcast %170 : vector<1x32xf32> to vector<32x32xf32>
    %172 = arith.addf %169, %171 : vector<32x32xf32>
    %173 = vector.extract_strided_slice %172 {offsets = [0, 0], sizes = [32, 16], strides = [1, 1]} : vector<32x32xf32> to vector<32x16xf32>
    %cst_88 = arith.constant 0.00999999977 : f32
    %174 = vector.broadcast %cst_88 : f32 to vector<32x16xf32>
    %175 = arith.mulf %174, %173 : vector<32x16xf32>
    %176 = arith.maximumf %173, %175 : vector<32x16xf32>
    %177 = vector.extract_strided_slice %172 {offsets = [0, 16], sizes = [32, 16], strides = [1, 1]} : vector<32x32xf32> to vector<32x16xf32>
    %178 = arith.negf %177 : vector<32x16xf32>
    %179 = math.exp %178 : vector<32x16xf32>
    %cst_89 = arith.constant 1.000000e+00 : f32
    %180 = vector.broadcast %cst_89 : f32 to vector<32x16xf32>
    %181 = arith.addf %180, %179 : vector<32x16xf32>
    %182 = arith.divf %180, %181 : vector<32x16xf32>
    %183 = arith.mulf %182, %176 : vector<32x16xf32>
    %cst_90 = arith.constant 1.000000e+00 : f32
    %184 = vector.broadcast %cst_90 : f32 to vector<32x16xf32>
    %185 = arith.subf %184, %182 : vector<32x16xf32>
    %186 = arith.mulf %185, %166 : vector<32x16xf32>
    %187 = arith.addf %183, %186 : vector<32x16xf32>
    %c0_91 = arith.constant 0 : index
    %c0_92 = arith.constant 0 : index
    %188 = vector.load %arg6[%c0_91, %c0_92] : memref<16x96xf32, #tpu.memory_space<vmem>>, vector<16x96xf32>
    %cst_93 = arith.constant dense<0.000000e+00> : vector<32x96xf32>
    %189 = tpu.matmul %187, %188, %cst_93 {dimension_numbers = #tpu.dot_dimension_numbers<[1], [0], [0], [1], [0, 0, 1, 1], [], []>} : vector<32x16xf32>, vector<16x96xf32>, vector<32x96xf32> -> vector<32x96xf32>
    %190 = vector.extract_strided_slice %0 {offsets = [14, 0], sizes = [1, 96], strides = [1, 1]} : vector<17x96xf32> to vector<1x96xf32>
    %191 = vector.broadcast %190 : vector<1x96xf32> to vector<32x96xf32>
    %192 = arith.addf %189, %191 : vector<32x96xf32>
    %c0_94 = arith.constant 0 : index
    %c0_95 = arith.constant 0 : index
    %193 = vector.load %arg7[%c0_94, %c0_95] : memref<32x48xf32, #tpu.memory_space<vmem>>, vector<32x48xf32>
    %194 = vector.extract_strided_slice %0 {offsets = [15, 0], sizes = [1, 48], strides = [1, 1]} : vector<17x96xf32> to vector<1x48xf32>
    %195 = vector.extract_strided_slice %0 {offsets = [16, 0], sizes = [1, 48], strides = [1, 1]} : vector<17x96xf32> to vector<1x48xf32>
    %196 = vector.shape_cast %194 : vector<1x48xf32> to vector<1x48xf32>
    %197 = vector.broadcast %196 : vector<1x48xf32> to vector<2x48xf32>
    %198 = vector.shape_cast %195 : vector<1x48xf32> to vector<1x48xf32>
    %199 = vector.broadcast %198 : vector<1x48xf32> to vector<2x48xf32>
    %200 = tpu.concatenate %197, %199 in 0 : vector<2x48xf32>, vector<2x48xf32> -> vector<4x48xf32>
    %cst_96 = arith.constant 1.000000e+00 : f32
    %201 = vector.broadcast %cst_96 : f32 to vector<2x16xf32>
    %cst_97 = arith.constant 0.000000e+00 : f32
    %202 = vector.broadcast %cst_97 : f32 to vector<2x16xf32>
    %203 = tpu.concatenate %201, %202 in 1 : vector<2x16xf32>, vector<2x16xf32> -> vector<2x32xf32>
    %cst_98 = arith.constant 0.000000e+00 : f32
    %204 = vector.broadcast %cst_98 : f32 to vector<2x16xf32>
    %cst_99 = arith.constant 1.000000e+00 : f32
    %205 = vector.broadcast %cst_99 : f32 to vector<2x16xf32>
    %206 = tpu.concatenate %204, %205 in 1 : vector<2x16xf32>, vector<2x16xf32> -> vector<2x32xf32>
    %207 = tpu.concatenate %203, %206 in 0 : vector<2x32xf32>, vector<2x32xf32> -> vector<4x32xf32>
    %cst_100 = arith.constant 0.000000e+00 : f32
    %208 = vector.broadcast %cst_100 : f32 to vector<4x16xf32>
    %cst_101 = arith.constant 0.000000e+00 : f32
    %209 = vector.broadcast %cst_101 : f32 to vector<4x32xf32>
    %210 = vector.extract_strided_slice %192 {offsets = [0, 0], sizes = [2, 48], strides = [1, 1]} : vector<32x96xf32> to vector<2x48xf32>
    %211 = vector.extract_strided_slice %192 {offsets = [30, 48], sizes = [2, 48], strides = [1, 1]} : vector<32x96xf32> to vector<2x48xf32>
    %212 = tpu.concatenate %210, %211 in 0 : vector<2x48xf32>, vector<2x48xf32> -> vector<4x48xf32>
    %cst_102 = arith.constant dense<0.000000e+00> : vector<4x48xf32>
    %213 = tpu.matmul %209, %193, %cst_102 {dimension_numbers = #tpu.dot_dimension_numbers<[1], [0], [0], [1], [0, 0, 1, 1], [], []>} : vector<4x32xf32>, vector<32x48xf32>, vector<4x48xf32> -> vector<4x48xf32>
    %214 = arith.addf %213, %200 : vector<4x48xf32>
    %215 = vector.extract_strided_slice %212 {offsets = [0, 0], sizes = [4, 16], strides = [1, 1]} : vector<4x48xf32> to vector<4x16xf32>
    %216 = vector.extract_strided_slice %214 {offsets = [0, 0], sizes = [4, 16], strides = [1, 1]} : vector<4x48xf32> to vector<4x16xf32>
    %217 = arith.addf %215, %216 : vector<4x16xf32>
    %218 = arith.negf %217 : vector<4x16xf32>
    %219 = math.exp %218 : vector<4x16xf32>
    %cst_103 = arith.constant 1.000000e+00 : f32
    %220 = vector.broadcast %cst_103 : f32 to vector<4x16xf32>
    %221 = arith.addf %220, %219 : vector<4x16xf32>
    %222 = arith.divf %220, %221 : vector<4x16xf32>
    %223 = vector.extract_strided_slice %212 {offsets = [0, 16], sizes = [4, 16], strides = [1, 1]} : vector<4x48xf32> to vector<4x16xf32>
    %224 = vector.extract_strided_slice %214 {offsets = [0, 16], sizes = [4, 16], strides = [1, 1]} : vector<4x48xf32> to vector<4x16xf32>
    %225 = arith.addf %223, %224 : vector<4x16xf32>
    %226 = arith.negf %225 : vector<4x16xf32>
    %227 = math.exp %226 : vector<4x16xf32>
    %cst_104 = arith.constant 1.000000e+00 : f32
    %228 = vector.broadcast %cst_104 : f32 to vector<4x16xf32>
    %229 = arith.addf %228, %227 : vector<4x16xf32>
    %230 = arith.divf %228, %229 : vector<4x16xf32>
    %231 = vector.extract_strided_slice %212 {offsets = [0, 32], sizes = [4, 16], strides = [1, 1]} : vector<4x48xf32> to vector<4x16xf32>
    %232 = vector.extract_strided_slice %214 {offsets = [0, 32], sizes = [4, 16], strides = [1, 1]} : vector<4x48xf32> to vector<4x16xf32>
    %233 = arith.mulf %222, %232 : vector<4x16xf32>
    %234 = arith.addf %231, %233 : vector<4x16xf32>
    %235 = math.tanh %234 : vector<4x16xf32>
    %cst_105 = arith.constant 1.000000e+00 : f32
    %236 = vector.broadcast %cst_105 : f32 to vector<4x16xf32>
    %237 = arith.subf %236, %230 : vector<4x16xf32>
    %238 = arith.mulf %237, %235 : vector<4x16xf32>
    %239 = arith.mulf %230, %208 : vector<4x16xf32>
    %240 = arith.addf %238, %239 : vector<4x16xf32>
    %241 = tpu.concatenate %240, %240 in 1 : vector<4x16xf32>, vector<4x16xf32> -> vector<4x32xf32>
    %242 = arith.mulf %241, %207 : vector<4x32xf32>
    %243 = vector.extract_strided_slice %240 {offsets = [0, 0], sizes = [2, 16], strides = [1, 1]} : vector<4x16xf32> to vector<2x16xf32>
    %c0_106 = arith.constant 0 : index
    %c0_107 = arith.constant 0 : index
    %244 = vector.load %arg9[%c0_106, %c0_107] : memref<32x32xf32, #tpu.memory_space<vmem>>, vector<2x16xf32>
    tpu.vector_store %arg9[%c0_106, %c0_107], %243 {strides = array<i32>} : memref<32x32xf32, #tpu.memory_space<vmem>>, vector<2x16xf32>,
    %245 = vector.extract_strided_slice %240 {offsets = [2, 0], sizes = [2, 16], strides = [1, 1]} : vector<4x16xf32> to vector<2x16xf32>
    %c30 = arith.constant 30 : index
    %c16 = arith.constant 16 : index
    %246 = vector.load %arg9[%c30, %c16] : memref<32x32xf32, #tpu.memory_space<vmem>>, vector<2x16xf32>
    tpu.vector_store %arg9[%c30, %c16], %245 {strides = array<i32>} : memref<32x32xf32, #tpu.memory_space<vmem>>, vector<2x16xf32>,
    %247 = vector.extract_strided_slice %192 {offsets = [2, 0], sizes = [2, 48], strides = [1, 1]} : vector<32x96xf32> to vector<2x48xf32>
    %248 = vector.extract_strided_slice %192 {offsets = [28, 48], sizes = [2, 48], strides = [1, 1]} : vector<32x96xf32> to vector<2x48xf32>
    %249 = tpu.concatenate %247, %248 in 0 : vector<2x48xf32>, vector<2x48xf32> -> vector<4x48xf32>
    %cst_108 = arith.constant dense<0.000000e+00> : vector<4x48xf32>
    %250 = tpu.matmul %242, %193, %cst_108 {dimension_numbers = #tpu.dot_dimension_numbers<[1], [0], [0], [1], [0, 0, 1, 1], [], []>} : vector<4x32xf32>, vector<32x48xf32>, vector<4x48xf32> -> vector<4x48xf32>
    %251 = arith.addf %250, %200 : vector<4x48xf32>
    %252 = vector.extract_strided_slice %249 {offsets = [0, 0], sizes = [4, 16], strides = [1, 1]} : vector<4x48xf32> to vector<4x16xf32>
    %253 = vector.extract_strided_slice %251 {offsets = [0, 0], sizes = [4, 16], strides = [1, 1]} : vector<4x48xf32> to vector<4x16xf32>
    %254 = arith.addf %252, %253 : vector<4x16xf32>
    %255 = arith.negf %254 : vector<4x16xf32>
    %256 = math.exp %255 : vector<4x16xf32>
    %cst_109 = arith.constant 1.000000e+00 : f32
    %257 = vector.broadcast %cst_109 : f32 to vector<4x16xf32>
    %258 = arith.addf %257, %256 : vector<4x16xf32>
    %259 = arith.divf %257, %258 : vector<4x16xf32>
    %260 = vector.extract_strided_slice %249 {offsets = [0, 16], sizes = [4, 16], strides = [1, 1]} : vector<4x48xf32> to vector<4x16xf32>
    %261 = vector.extract_strided_slice %251 {offsets = [0, 16], sizes = [4, 16], strides = [1, 1]} : vector<4x48xf32> to vector<4x16xf32>
    %262 = arith.addf %260, %261 : vector<4x16xf32>
    %263 = arith.negf %262 : vector<4x16xf32>
    %264 = math.exp %263 : vector<4x16xf32>
    %cst_110 = arith.constant 1.000000e+00 : f32
    %265 = vector.broadcast %cst_110 : f32 to vector<4x16xf32>
    %266 = arith.addf %265, %264 : vector<4x16xf32>
    %267 = arith.divf %265, %266 : vector<4x16xf32>
    %268 = vector.extract_strided_slice %249 {offsets = [0, 32], sizes = [4, 16], strides = [1, 1]} : vector<4x48xf32> to vector<4x16xf32>
    %269 = vector.extract_strided_slice %251 {offsets = [0, 32], sizes = [4, 16], strides = [1, 1]} : vector<4x48xf32> to vector<4x16xf32>
    %270 = arith.mulf %259, %269 : vector<4x16xf32>
    %271 = arith.addf %268, %270 : vector<4x16xf32>
    %272 = math.tanh %271 : vector<4x16xf32>
    %cst_111 = arith.constant 1.000000e+00 : f32
    %273 = vector.broadcast %cst_111 : f32 to vector<4x16xf32>
    %274 = arith.subf %273, %267 : vector<4x16xf32>
    %275 = arith.mulf %274, %272 : vector<4x16xf32>
    %276 = arith.mulf %267, %240 : vector<4x16xf32>
    %277 = arith.addf %275, %276 : vector<4x16xf32>
    %278 = tpu.concatenate %277, %277 in 1 : vector<4x16xf32>, vector<4x16xf32> -> vector<4x32xf32>
    %279 = arith.mulf %278, %207 : vector<4x32xf32>
    %280 = vector.extract_strided_slice %277 {offsets = [0, 0], sizes = [2, 16], strides = [1, 1]} : vector<4x16xf32> to vector<2x16xf32>
    %c2_112 = arith.constant 2 : index
    %c0_113 = arith.constant 0 : index
    %281 = vector.load %arg9[%c2_112, %c0_113] : memref<32x32xf32, #tpu.memory_space<vmem>>, vector<2x16xf32>
    tpu.vector_store %arg9[%c2_112, %c0_113], %280 {strides = array<i32>} : memref<32x32xf32, #tpu.memory_space<vmem>>, vector<2x16xf32>,
    %282 = vector.extract_strided_slice %277 {offsets = [2, 0], sizes = [2, 16], strides = [1, 1]} : vector<4x16xf32> to vector<2x16xf32>
    %c28 = arith.constant 28 : index
    %c16_114 = arith.constant 16 : index
    %283 = vector.load %arg9[%c28, %c16_114] : memref<32x32xf32, #tpu.memory_space<vmem>>, vector<2x16xf32>
    tpu.vector_store %arg9[%c28, %c16_114], %282 {strides = array<i32>} : memref<32x32xf32, #tpu.memory_space<vmem>>, vector<2x16xf32>,
    %284 = vector.extract_strided_slice %192 {offsets = [4, 0], sizes = [2, 48], strides = [1, 1]} : vector<32x96xf32> to vector<2x48xf32>
    %285 = vector.extract_strided_slice %192 {offsets = [26, 48], sizes = [2, 48], strides = [1, 1]} : vector<32x96xf32> to vector<2x48xf32>
    %286 = tpu.concatenate %284, %285 in 0 : vector<2x48xf32>, vector<2x48xf32> -> vector<4x48xf32>
    %cst_115 = arith.constant dense<0.000000e+00> : vector<4x48xf32>
    %287 = tpu.matmul %279, %193, %cst_115 {dimension_numbers = #tpu.dot_dimension_numbers<[1], [0], [0], [1], [0, 0, 1, 1], [], []>} : vector<4x32xf32>, vector<32x48xf32>, vector<4x48xf32> -> vector<4x48xf32>
    %288 = arith.addf %287, %200 : vector<4x48xf32>
    %289 = vector.extract_strided_slice %286 {offsets = [0, 0], sizes = [4, 16], strides = [1, 1]} : vector<4x48xf32> to vector<4x16xf32>
    %290 = vector.extract_strided_slice %288 {offsets = [0, 0], sizes = [4, 16], strides = [1, 1]} : vector<4x48xf32> to vector<4x16xf32>
    %291 = arith.addf %289, %290 : vector<4x16xf32>
    %292 = arith.negf %291 : vector<4x16xf32>
    %293 = math.exp %292 : vector<4x16xf32>
    %cst_116 = arith.constant 1.000000e+00 : f32
    %294 = vector.broadcast %cst_116 : f32 to vector<4x16xf32>
    %295 = arith.addf %294, %293 : vector<4x16xf32>
    %296 = arith.divf %294, %295 : vector<4x16xf32>
    %297 = vector.extract_strided_slice %286 {offsets = [0, 16], sizes = [4, 16], strides = [1, 1]} : vector<4x48xf32> to vector<4x16xf32>
    %298 = vector.extract_strided_slice %288 {offsets = [0, 16], sizes = [4, 16], strides = [1, 1]} : vector<4x48xf32> to vector<4x16xf32>
    %299 = arith.addf %297, %298 : vector<4x16xf32>
    %300 = arith.negf %299 : vector<4x16xf32>
    %301 = math.exp %300 : vector<4x16xf32>
    %cst_117 = arith.constant 1.000000e+00 : f32
    %302 = vector.broadcast %cst_117 : f32 to vector<4x16xf32>
    %303 = arith.addf %302, %301 : vector<4x16xf32>
    %304 = arith.divf %302, %303 : vector<4x16xf32>
    %305 = vector.extract_strided_slice %286 {offsets = [0, 32], sizes = [4, 16], strides = [1, 1]} : vector<4x48xf32> to vector<4x16xf32>
    %306 = vector.extract_strided_slice %288 {offsets = [0, 32], sizes = [4, 16], strides = [1, 1]} : vector<4x48xf32> to vector<4x16xf32>
    %307 = arith.mulf %296, %306 : vector<4x16xf32>
    %308 = arith.addf %305, %307 : vector<4x16xf32>
    %309 = math.tanh %308 : vector<4x16xf32>
    %cst_118 = arith.constant 1.000000e+00 : f32
    %310 = vector.broadcast %cst_118 : f32 to vector<4x16xf32>
    %311 = arith.subf %310, %304 : vector<4x16xf32>
    %312 = arith.mulf %311, %309 : vector<4x16xf32>
    %313 = arith.mulf %304, %277 : vector<4x16xf32>
    %314 = arith.addf %312, %313 : vector<4x16xf32>
    %315 = tpu.concatenate %314, %314 in 1 : vector<4x16xf32>, vector<4x16xf32> -> vector<4x32xf32>
    %316 = arith.mulf %315, %207 : vector<4x32xf32>
    %317 = vector.extract_strided_slice %314 {offsets = [0, 0], sizes = [2, 16], strides = [1, 1]} : vector<4x16xf32> to vector<2x16xf32>
    %c4_119 = arith.constant 4 : index
    %c0_120 = arith.constant 0 : index
    %318 = vector.load %arg9[%c4_119, %c0_120] : memref<32x32xf32, #tpu.memory_space<vmem>>, vector<2x16xf32>
    tpu.vector_store %arg9[%c4_119, %c0_120], %317 {strides = array<i32>} : memref<32x32xf32, #tpu.memory_space<vmem>>, vector<2x16xf32>,
    %319 = vector.extract_strided_slice %314 {offsets = [2, 0], sizes = [2, 16], strides = [1, 1]} : vector<4x16xf32> to vector<2x16xf32>
    %c26 = arith.constant 26 : index
    %c16_121 = arith.constant 16 : index
    %320 = vector.load %arg9[%c26, %c16_121] : memref<32x32xf32, #tpu.memory_space<vmem>>, vector<2x16xf32>
    tpu.vector_store %arg9[%c26, %c16_121], %319 {strides = array<i32>} : memref<32x32xf32, #tpu.memory_space<vmem>>, vector<2x16xf32>,
    %321 = vector.extract_strided_slice %192 {offsets = [6, 0], sizes = [2, 48], strides = [1, 1]} : vector<32x96xf32> to vector<2x48xf32>
    %322 = vector.extract_strided_slice %192 {offsets = [24, 48], sizes = [2, 48], strides = [1, 1]} : vector<32x96xf32> to vector<2x48xf32>
    %323 = tpu.concatenate %321, %322 in 0 : vector<2x48xf32>, vector<2x48xf32> -> vector<4x48xf32>
    %cst_122 = arith.constant dense<0.000000e+00> : vector<4x48xf32>
    %324 = tpu.matmul %316, %193, %cst_122 {dimension_numbers = #tpu.dot_dimension_numbers<[1], [0], [0], [1], [0, 0, 1, 1], [], []>} : vector<4x32xf32>, vector<32x48xf32>, vector<4x48xf32> -> vector<4x48xf32>
    %325 = arith.addf %324, %200 : vector<4x48xf32>
    %326 = vector.extract_strided_slice %323 {offsets = [0, 0], sizes = [4, 16], strides = [1, 1]} : vector<4x48xf32> to vector<4x16xf32>
    %327 = vector.extract_strided_slice %325 {offsets = [0, 0], sizes = [4, 16], strides = [1, 1]} : vector<4x48xf32> to vector<4x16xf32>
    %328 = arith.addf %326, %327 : vector<4x16xf32>
    %329 = arith.negf %328 : vector<4x16xf32>
    %330 = math.exp %329 : vector<4x16xf32>
    %cst_123 = arith.constant 1.000000e+00 : f32
    %331 = vector.broadcast %cst_123 : f32 to vector<4x16xf32>
    %332 = arith.addf %331, %330 : vector<4x16xf32>
    %333 = arith.divf %331, %332 : vector<4x16xf32>
    %334 = vector.extract_strided_slice %323 {offsets = [0, 16], sizes = [4, 16], strides = [1, 1]} : vector<4x48xf32> to vector<4x16xf32>
    %335 = vector.extract_strided_slice %325 {offsets = [0, 16], sizes = [4, 16], strides = [1, 1]} : vector<4x48xf32> to vector<4x16xf32>
    %336 = arith.addf %334, %335 : vector<4x16xf32>
    %337 = arith.negf %336 : vector<4x16xf32>
    %338 = math.exp %337 : vector<4x16xf32>
    %cst_124 = arith.constant 1.000000e+00 : f32
    %339 = vector.broadcast %cst_124 : f32 to vector<4x16xf32>
    %340 = arith.addf %339, %338 : vector<4x16xf32>
    %341 = arith.divf %339, %340 : vector<4x16xf32>
    %342 = vector.extract_strided_slice %323 {offsets = [0, 32], sizes = [4, 16], strides = [1, 1]} : vector<4x48xf32> to vector<4x16xf32>
    %343 = vector.extract_strided_slice %325 {offsets = [0, 32], sizes = [4, 16], strides = [1, 1]} : vector<4x48xf32> to vector<4x16xf32>
    %344 = arith.mulf %333, %343 : vector<4x16xf32>
    %345 = arith.addf %342, %344 : vector<4x16xf32>
    %346 = math.tanh %345 : vector<4x16xf32>
    %cst_125 = arith.constant 1.000000e+00 : f32
    %347 = vector.broadcast %cst_125 : f32 to vector<4x16xf32>
    %348 = arith.subf %347, %341 : vector<4x16xf32>
    %349 = arith.mulf %348, %346 : vector<4x16xf32>
    %350 = arith.mulf %341, %314 : vector<4x16xf32>
    %351 = arith.addf %349, %350 : vector<4x16xf32>
    %352 = tpu.concatenate %351, %351 in 1 : vector<4x16xf32>, vector<4x16xf32> -> vector<4x32xf32>
    %353 = arith.mulf %352, %207 : vector<4x32xf32>
    %354 = vector.extract_strided_slice %351 {offsets = [0, 0], sizes = [2, 16], strides = [1, 1]} : vector<4x16xf32> to vector<2x16xf32>
    %c6_126 = arith.constant 6 : index
    %c0_127 = arith.constant 0 : index
    %355 = vector.load %arg9[%c6_126, %c0_127] : memref<32x32xf32, #tpu.memory_space<vmem>>, vector<2x16xf32>
    tpu.vector_store %arg9[%c6_126, %c0_127], %354 {strides = array<i32>} : memref<32x32xf32, #tpu.memory_space<vmem>>, vector<2x16xf32>,
    %356 = vector.extract_strided_slice %351 {offsets = [2, 0], sizes = [2, 16], strides = [1, 1]} : vector<4x16xf32> to vector<2x16xf32>
    %c24 = arith.constant 24 : index
    %c16_128 = arith.constant 16 : index
    %357 = vector.load %arg9[%c24, %c16_128] : memref<32x32xf32, #tpu.memory_space<vmem>>, vector<2x16xf32>
    tpu.vector_store %arg9[%c24, %c16_128], %356 {strides = array<i32>} : memref<32x32xf32, #tpu.memory_space<vmem>>, vector<2x16xf32>,
    %358 = vector.extract_strided_slice %192 {offsets = [8, 0], sizes = [2, 48], strides = [1, 1]} : vector<32x96xf32> to vector<2x48xf32>
    %359 = vector.extract_strided_slice %192 {offsets = [22, 48], sizes = [2, 48], strides = [1, 1]} : vector<32x96xf32> to vector<2x48xf32>
    %360 = tpu.concatenate %358, %359 in 0 : vector<2x48xf32>, vector<2x48xf32> -> vector<4x48xf32>
    %cst_129 = arith.constant dense<0.000000e+00> : vector<4x48xf32>
    %361 = tpu.matmul %353, %193, %cst_129 {dimension_numbers = #tpu.dot_dimension_numbers<[1], [0], [0], [1], [0, 0, 1, 1], [], []>} : vector<4x32xf32>, vector<32x48xf32>, vector<4x48xf32> -> vector<4x48xf32>
    %362 = arith.addf %361, %200 : vector<4x48xf32>
    %363 = vector.extract_strided_slice %360 {offsets = [0, 0], sizes = [4, 16], strides = [1, 1]} : vector<4x48xf32> to vector<4x16xf32>
    %364 = vector.extract_strided_slice %362 {offsets = [0, 0], sizes = [4, 16], strides = [1, 1]} : vector<4x48xf32> to vector<4x16xf32>
    %365 = arith.addf %363, %364 : vector<4x16xf32>
    %366 = arith.negf %365 : vector<4x16xf32>
    %367 = math.exp %366 : vector<4x16xf32>
    %cst_130 = arith.constant 1.000000e+00 : f32
    %368 = vector.broadcast %cst_130 : f32 to vector<4x16xf32>
    %369 = arith.addf %368, %367 : vector<4x16xf32>
    %370 = arith.divf %368, %369 : vector<4x16xf32>
    %371 = vector.extract_strided_slice %360 {offsets = [0, 16], sizes = [4, 16], strides = [1, 1]} : vector<4x48xf32> to vector<4x16xf32>
    %372 = vector.extract_strided_slice %362 {offsets = [0, 16], sizes = [4, 16], strides = [1, 1]} : vector<4x48xf32> to vector<4x16xf32>
    %373 = arith.addf %371, %372 : vector<4x16xf32>
    %374 = arith.negf %373 : vector<4x16xf32>
    %375 = math.exp %374 : vector<4x16xf32>
    %cst_131 = arith.constant 1.000000e+00 : f32
    %376 = vector.broadcast %cst_131 : f32 to vector<4x16xf32>
    %377 = arith.addf %376, %375 : vector<4x16xf32>
    %378 = arith.divf %376, %377 : vector<4x16xf32>
    %379 = vector.extract_strided_slice %360 {offsets = [0, 32], sizes = [4, 16], strides = [1, 1]} : vector<4x48xf32> to vector<4x16xf32>
    %380 = vector.extract_strided_slice %362 {offsets = [0, 32], sizes = [4, 16], strides = [1, 1]} : vector<4x48xf32> to vector<4x16xf32>
    %381 = arith.mulf %370, %380 : vector<4x16xf32>
    %382 = arith.addf %379, %381 : vector<4x16xf32>
    %383 = math.tanh %382 : vector<4x16xf32>
    %cst_132 = arith.constant 1.000000e+00 : f32
    %384 = vector.broadcast %cst_132 : f32 to vector<4x16xf32>
    %385 = arith.subf %384, %378 : vector<4x16xf32>
    %386 = arith.mulf %385, %383 : vector<4x16xf32>
    %387 = arith.mulf %378, %351 : vector<4x16xf32>
    %388 = arith.addf %386, %387 : vector<4x16xf32>
    %389 = tpu.concatenate %388, %388 in 1 : vector<4x16xf32>, vector<4x16xf32> -> vector<4x32xf32>
    %390 = arith.mulf %389, %207 : vector<4x32xf32>
    %391 = vector.extract_strided_slice %388 {offsets = [0, 0], sizes = [2, 16], strides = [1, 1]} : vector<4x16xf32> to vector<2x16xf32>
    %c8 = arith.constant 8 : index
    %c0_133 = arith.constant 0 : index
    %392 = vector.load %arg9[%c8, %c0_133] : memref<32x32xf32, #tpu.memory_space<vmem>>, vector<2x16xf32>
    tpu.vector_store %arg9[%c8, %c0_133], %391 {strides = array<i32>} : memref<32x32xf32, #tpu.memory_space<vmem>>, vector<2x16xf32>,
    %393 = vector.extract_strided_slice %388 {offsets = [2, 0], sizes = [2, 16], strides = [1, 1]} : vector<4x16xf32> to vector<2x16xf32>
    %c22 = arith.constant 22 : index
    %c16_134 = arith.constant 16 : index
    %394 = vector.load %arg9[%c22, %c16_134] : memref<32x32xf32, #tpu.memory_space<vmem>>, vector<2x16xf32>
    tpu.vector_store %arg9[%c22, %c16_134], %393 {strides = array<i32>} : memref<32x32xf32, #tpu.memory_space<vmem>>, vector<2x16xf32>,
    %395 = vector.extract_strided_slice %192 {offsets = [10, 0], sizes = [2, 48], strides = [1, 1]} : vector<32x96xf32> to vector<2x48xf32>
    %396 = vector.extract_strided_slice %192 {offsets = [20, 48], sizes = [2, 48], strides = [1, 1]} : vector<32x96xf32> to vector<2x48xf32>
    %397 = tpu.concatenate %395, %396 in 0 : vector<2x48xf32>, vector<2x48xf32> -> vector<4x48xf32>
    %cst_135 = arith.constant dense<0.000000e+00> : vector<4x48xf32>
    %398 = tpu.matmul %390, %193, %cst_135 {dimension_numbers = #tpu.dot_dimension_numbers<[1], [0], [0], [1], [0, 0, 1, 1], [], []>} : vector<4x32xf32>, vector<32x48xf32>, vector<4x48xf32> -> vector<4x48xf32>
    %399 = arith.addf %398, %200 : vector<4x48xf32>
    %400 = vector.extract_strided_slice %397 {offsets = [0, 0], sizes = [4, 16], strides = [1, 1]} : vector<4x48xf32> to vector<4x16xf32>
    %401 = vector.extract_strided_slice %399 {offsets = [0, 0], sizes = [4, 16], strides = [1, 1]} : vector<4x48xf32> to vector<4x16xf32>
    %402 = arith.addf %400, %401 : vector<4x16xf32>
    %403 = arith.negf %402 : vector<4x16xf32>
    %404 = math.exp %403 : vector<4x16xf32>
    %cst_136 = arith.constant 1.000000e+00 : f32
    %405 = vector.broadcast %cst_136 : f32 to vector<4x16xf32>
    %406 = arith.addf %405, %404 : vector<4x16xf32>
    %407 = arith.divf %405, %406 : vector<4x16xf32>
    %408 = vector.extract_strided_slice %397 {offsets = [0, 16], sizes = [4, 16], strides = [1, 1]} : vector<4x48xf32> to vector<4x16xf32>
    %409 = vector.extract_strided_slice %399 {offsets = [0, 16], sizes = [4, 16], strides = [1, 1]} : vector<4x48xf32> to vector<4x16xf32>
    %410 = arith.addf %408, %409 : vector<4x16xf32>
    %411 = arith.negf %410 : vector<4x16xf32>
    %412 = math.exp %411 : vector<4x16xf32>
    %cst_137 = arith.constant 1.000000e+00 : f32
    %413 = vector.broadcast %cst_137 : f32 to vector<4x16xf32>
    %414 = arith.addf %413, %412 : vector<4x16xf32>
    %415 = arith.divf %413, %414 : vector<4x16xf32>
    %416 = vector.extract_strided_slice %397 {offsets = [0, 32], sizes = [4, 16], strides = [1, 1]} : vector<4x48xf32> to vector<4x16xf32>
    %417 = vector.extract_strided_slice %399 {offsets = [0, 32], sizes = [4, 16], strides = [1, 1]} : vector<4x48xf32> to vector<4x16xf32>
    %418 = arith.mulf %407, %417 : vector<4x16xf32>
    %419 = arith.addf %416, %418 : vector<4x16xf32>
    %420 = math.tanh %419 : vector<4x16xf32>
    %cst_138 = arith.constant 1.000000e+00 : f32
    %421 = vector.broadcast %cst_138 : f32 to vector<4x16xf32>
    %422 = arith.subf %421, %415 : vector<4x16xf32>
    %423 = arith.mulf %422, %420 : vector<4x16xf32>
    %424 = arith.mulf %415, %388 : vector<4x16xf32>
    %425 = arith.addf %423, %424 : vector<4x16xf32>
    %426 = tpu.concatenate %425, %425 in 1 : vector<4x16xf32>, vector<4x16xf32> -> vector<4x32xf32>
    %427 = arith.mulf %426, %207 : vector<4x32xf32>
    %428 = vector.extract_strided_slice %425 {offsets = [0, 0], sizes = [2, 16], strides = [1, 1]} : vector<4x16xf32> to vector<2x16xf32>
    %c10 = arith.constant 10 : index
    %c0_139 = arith.constant 0 : index
    %429 = vector.load %arg9[%c10, %c0_139] : memref<32x32xf32, #tpu.memory_space<vmem>>, vector<2x16xf32>
    tpu.vector_store %arg9[%c10, %c0_139], %428 {strides = array<i32>} : memref<32x32xf32, #tpu.memory_space<vmem>>, vector<2x16xf32>,
    %430 = vector.extract_strided_slice %425 {offsets = [2, 0], sizes = [2, 16], strides = [1, 1]} : vector<4x16xf32> to vector<2x16xf32>
    %c20 = arith.constant 20 : index
    %c16_140 = arith.constant 16 : index
    %431 = vector.load %arg9[%c20, %c16_140] : memref<32x32xf32, #tpu.memory_space<vmem>>, vector<2x16xf32>
    tpu.vector_store %arg9[%c20, %c16_140], %430 {strides = array<i32>} : memref<32x32xf32, #tpu.memory_space<vmem>>, vector<2x16xf32>,
    %432 = vector.extract_strided_slice %192 {offsets = [12, 0], sizes = [2, 48], strides = [1, 1]} : vector<32x96xf32> to vector<2x48xf32>
    %433 = vector.extract_strided_slice %192 {offsets = [18, 48], sizes = [2, 48], strides = [1, 1]} : vector<32x96xf32> to vector<2x48xf32>
    %434 = tpu.concatenate %432, %433 in 0 : vector<2x48xf32>, vector<2x48xf32> -> vector<4x48xf32>
    %cst_141 = arith.constant dense<0.000000e+00> : vector<4x48xf32>
    %435 = tpu.matmul %427, %193, %cst_141 {dimension_numbers = #tpu.dot_dimension_numbers<[1], [0], [0], [1], [0, 0, 1, 1], [], []>} : vector<4x32xf32>, vector<32x48xf32>, vector<4x48xf32> -> vector<4x48xf32>
    %436 = arith.addf %435, %200 : vector<4x48xf32>
    %437 = vector.extract_strided_slice %434 {offsets = [0, 0], sizes = [4, 16], strides = [1, 1]} : vector<4x48xf32> to vector<4x16xf32>
    %438 = vector.extract_strided_slice %436 {offsets = [0, 0], sizes = [4, 16], strides = [1, 1]} : vector<4x48xf32> to vector<4x16xf32>
    %439 = arith.addf %437, %438 : vector<4x16xf32>
    %440 = arith.negf %439 : vector<4x16xf32>
    %441 = math.exp %440 : vector<4x16xf32>
    %cst_142 = arith.constant 1.000000e+00 : f32
    %442 = vector.broadcast %cst_142 : f32 to vector<4x16xf32>
    %443 = arith.addf %442, %441 : vector<4x16xf32>
    %444 = arith.divf %442, %443 : vector<4x16xf32>
    %445 = vector.extract_strided_slice %434 {offsets = [0, 16], sizes = [4, 16], strides = [1, 1]} : vector<4x48xf32> to vector<4x16xf32>
    %446 = vector.extract_strided_slice %436 {offsets = [0, 16], sizes = [4, 16], strides = [1, 1]} : vector<4x48xf32> to vector<4x16xf32>
    %447 = arith.addf %445, %446 : vector<4x16xf32>
    %448 = arith.negf %447 : vector<4x16xf32>
    %449 = math.exp %448 : vector<4x16xf32>
    %cst_143 = arith.constant 1.000000e+00 : f32
    %450 = vector.broadcast %cst_143 : f32 to vector<4x16xf32>
    %451 = arith.addf %450, %449 : vector<4x16xf32>
    %452 = arith.divf %450, %451 : vector<4x16xf32>
    %453 = vector.extract_strided_slice %434 {offsets = [0, 32], sizes = [4, 16], strides = [1, 1]} : vector<4x48xf32> to vector<4x16xf32>
    %454 = vector.extract_strided_slice %436 {offsets = [0, 32], sizes = [4, 16], strides = [1, 1]} : vector<4x48xf32> to vector<4x16xf32>
    %455 = arith.mulf %444, %454 : vector<4x16xf32>
    %456 = arith.addf %453, %455 : vector<4x16xf32>
    %457 = math.tanh %456 : vector<4x16xf32>
    %cst_144 = arith.constant 1.000000e+00 : f32
    %458 = vector.broadcast %cst_144 : f32 to vector<4x16xf32>
    %459 = arith.subf %458, %452 : vector<4x16xf32>
    %460 = arith.mulf %459, %457 : vector<4x16xf32>
    %461 = arith.mulf %452, %425 : vector<4x16xf32>
    %462 = arith.addf %460, %461 : vector<4x16xf32>
    %463 = tpu.concatenate %462, %462 in 1 : vector<4x16xf32>, vector<4x16xf32> -> vector<4x32xf32>
    %464 = arith.mulf %463, %207 : vector<4x32xf32>
    %465 = vector.extract_strided_slice %462 {offsets = [0, 0], sizes = [2, 16], strides = [1, 1]} : vector<4x16xf32> to vector<2x16xf32>
    %c12 = arith.constant 12 : index
    %c0_145 = arith.constant 0 : index
    %466 = vector.load %arg9[%c12, %c0_145] : memref<32x32xf32, #tpu.memory_space<vmem>>, vector<2x16xf32>
    tpu.vector_store %arg9[%c12, %c0_145], %465 {strides = array<i32>} : memref<32x32xf32, #tpu.memory_space<vmem>>, vector<2x16xf32>,
    %467 = vector.extract_strided_slice %462 {offsets = [2, 0], sizes = [2, 16], strides = [1, 1]} : vector<4x16xf32> to vector<2x16xf32>
    %c18 = arith.constant 18 : index
    %c16_146 = arith.constant 16 : index
    %468 = vector.load %arg9[%c18, %c16_146] : memref<32x32xf32, #tpu.memory_space<vmem>>, vector<2x16xf32>
    tpu.vector_store %arg9[%c18, %c16_146], %467 {strides = array<i32>} : memref<32x32xf32, #tpu.memory_space<vmem>>, vector<2x16xf32>,
    %469 = vector.extract_strided_slice %192 {offsets = [14, 0], sizes = [2, 48], strides = [1, 1]} : vector<32x96xf32> to vector<2x48xf32>
    %470 = vector.extract_strided_slice %192 {offsets = [16, 48], sizes = [2, 48], strides = [1, 1]} : vector<32x96xf32> to vector<2x48xf32>
    %471 = tpu.concatenate %469, %470 in 0 : vector<2x48xf32>, vector<2x48xf32> -> vector<4x48xf32>
    %cst_147 = arith.constant dense<0.000000e+00> : vector<4x48xf32>
    %472 = tpu.matmul %464, %193, %cst_147 {dimension_numbers = #tpu.dot_dimension_numbers<[1], [0], [0], [1], [0, 0, 1, 1], [], []>} : vector<4x32xf32>, vector<32x48xf32>, vector<4x48xf32> -> vector<4x48xf32>
    %473 = arith.addf %472, %200 : vector<4x48xf32>
    %474 = vector.extract_strided_slice %471 {offsets = [0, 0], sizes = [4, 16], strides = [1, 1]} : vector<4x48xf32> to vector<4x16xf32>
    %475 = vector.extract_strided_slice %473 {offsets = [0, 0], sizes = [4, 16], strides = [1, 1]} : vector<4x48xf32> to vector<4x16xf32>
    %476 = arith.addf %474, %475 : vector<4x16xf32>
    %477 = arith.negf %476 : vector<4x16xf32>
    %478 = math.exp %477 : vector<4x16xf32>
    %cst_148 = arith.constant 1.000000e+00 : f32
    %479 = vector.broadcast %cst_148 : f32 to vector<4x16xf32>
    %480 = arith.addf %479, %478 : vector<4x16xf32>
    %481 = arith.divf %479, %480 : vector<4x16xf32>
    %482 = vector.extract_strided_slice %471 {offsets = [0, 16], sizes = [4, 16], strides = [1, 1]} : vector<4x48xf32> to vector<4x16xf32>
    %483 = vector.extract_strided_slice %473 {offsets = [0, 16], sizes = [4, 16], strides = [1, 1]} : vector<4x48xf32> to vector<4x16xf32>
    %484 = arith.addf %482, %483 : vector<4x16xf32>
    %485 = arith.negf %484 : vector<4x16xf32>
    %486 = math.exp %485 : vector<4x16xf32>
    %cst_149 = arith.constant 1.000000e+00 : f32
    %487 = vector.broadcast %cst_149 : f32 to vector<4x16xf32>
    %488 = arith.addf %487, %486 : vector<4x16xf32>
    %489 = arith.divf %487, %488 : vector<4x16xf32>
    %490 = vector.extract_strided_slice %471 {offsets = [0, 32], sizes = [4, 16], strides = [1, 1]} : vector<4x48xf32> to vector<4x16xf32>
    %491 = vector.extract_strided_slice %473 {offsets = [0, 32], sizes = [4, 16], strides = [1, 1]} : vector<4x48xf32> to vector<4x16xf32>
    %492 = arith.mulf %481, %491 : vector<4x16xf32>
    %493 = arith.addf %490, %492 : vector<4x16xf32>
    %494 = math.tanh %493 : vector<4x16xf32>
    %cst_150 = arith.constant 1.000000e+00 : f32
    %495 = vector.broadcast %cst_150 : f32 to vector<4x16xf32>
    %496 = arith.subf %495, %489 : vector<4x16xf32>
    %497 = arith.mulf %496, %494 : vector<4x16xf32>
    %498 = arith.mulf %489, %462 : vector<4x16xf32>
    %499 = arith.addf %497, %498 : vector<4x16xf32>
    %500 = tpu.concatenate %499, %499 in 1 : vector<4x16xf32>, vector<4x16xf32> -> vector<4x32xf32>
    %501 = arith.mulf %500, %207 : vector<4x32xf32>
    %502 = vector.extract_strided_slice %499 {offsets = [0, 0], sizes = [2, 16], strides = [1, 1]} : vector<4x16xf32> to vector<2x16xf32>
    %c14 = arith.constant 14 : index
    %c0_151 = arith.constant 0 : index
    %503 = vector.load %arg9[%c14, %c0_151] : memref<32x32xf32, #tpu.memory_space<vmem>>, vector<2x16xf32>
    tpu.vector_store %arg9[%c14, %c0_151], %502 {strides = array<i32>} : memref<32x32xf32, #tpu.memory_space<vmem>>, vector<2x16xf32>,
    %504 = vector.extract_strided_slice %499 {offsets = [2, 0], sizes = [2, 16], strides = [1, 1]} : vector<4x16xf32> to vector<2x16xf32>
    %c16_152 = arith.constant 16 : index
    %c16_153 = arith.constant 16 : index
    %505 = vector.load %arg9[%c16_152, %c16_153] : memref<32x32xf32, #tpu.memory_space<vmem>>, vector<2x16xf32>
    tpu.vector_store %arg9[%c16_152, %c16_153], %504 {strides = array<i32>} : memref<32x32xf32, #tpu.memory_space<vmem>>, vector<2x16xf32>,
    %506 = vector.extract_strided_slice %192 {offsets = [16, 0], sizes = [2, 48], strides = [1, 1]} : vector<32x96xf32> to vector<2x48xf32>
    %507 = vector.extract_strided_slice %192 {offsets = [14, 48], sizes = [2, 48], strides = [1, 1]} : vector<32x96xf32> to vector<2x48xf32>
    %508 = tpu.concatenate %506, %507 in 0 : vector<2x48xf32>, vector<2x48xf32> -> vector<4x48xf32>
    %cst_154 = arith.constant dense<0.000000e+00> : vector<4x48xf32>
    %509 = tpu.matmul %501, %193, %cst_154 {dimension_numbers = #tpu.dot_dimension_numbers<[1], [0], [0], [1], [0, 0, 1, 1], [], []>} : vector<4x32xf32>, vector<32x48xf32>, vector<4x48xf32> -> vector<4x48xf32>
    %510 = arith.addf %509, %200 : vector<4x48xf32>
    %511 = vector.extract_strided_slice %508 {offsets = [0, 0], sizes = [4, 16], strides = [1, 1]} : vector<4x48xf32> to vector<4x16xf32>
    %512 = vector.extract_strided_slice %510 {offsets = [0, 0], sizes = [4, 16], strides = [1, 1]} : vector<4x48xf32> to vector<4x16xf32>
    %513 = arith.addf %511, %512 : vector<4x16xf32>
    %514 = arith.negf %513 : vector<4x16xf32>
    %515 = math.exp %514 : vector<4x16xf32>
    %cst_155 = arith.constant 1.000000e+00 : f32
    %516 = vector.broadcast %cst_155 : f32 to vector<4x16xf32>
    %517 = arith.addf %516, %515 : vector<4x16xf32>
    %518 = arith.divf %516, %517 : vector<4x16xf32>
    %519 = vector.extract_strided_slice %508 {offsets = [0, 16], sizes = [4, 16], strides = [1, 1]} : vector<4x48xf32> to vector<4x16xf32>
    %520 = vector.extract_strided_slice %510 {offsets = [0, 16], sizes = [4, 16], strides = [1, 1]} : vector<4x48xf32> to vector<4x16xf32>
    %521 = arith.addf %519, %520 : vector<4x16xf32>
    %522 = arith.negf %521 : vector<4x16xf32>
    %523 = math.exp %522 : vector<4x16xf32>
    %cst_156 = arith.constant 1.000000e+00 : f32
    %524 = vector.broadcast %cst_156 : f32 to vector<4x16xf32>
    %525 = arith.addf %524, %523 : vector<4x16xf32>
    %526 = arith.divf %524, %525 : vector<4x16xf32>
    %527 = vector.extract_strided_slice %508 {offsets = [0, 32], sizes = [4, 16], strides = [1, 1]} : vector<4x48xf32> to vector<4x16xf32>
    %528 = vector.extract_strided_slice %510 {offsets = [0, 32], sizes = [4, 16], strides = [1, 1]} : vector<4x48xf32> to vector<4x16xf32>
    %529 = arith.mulf %518, %528 : vector<4x16xf32>
    %530 = arith.addf %527, %529 : vector<4x16xf32>
    %531 = math.tanh %530 : vector<4x16xf32>
    %cst_157 = arith.constant 1.000000e+00 : f32
    %532 = vector.broadcast %cst_157 : f32 to vector<4x16xf32>
    %533 = arith.subf %532, %526 : vector<4x16xf32>
    %534 = arith.mulf %533, %531 : vector<4x16xf32>
    %535 = arith.mulf %526, %499 : vector<4x16xf32>
    %536 = arith.addf %534, %535 : vector<4x16xf32>
    %537 = tpu.concatenate %536, %536 in 1 : vector<4x16xf32>, vector<4x16xf32> -> vector<4x32xf32>
    %538 = arith.mulf %537, %207 : vector<4x32xf32>
    %539 = vector.extract_strided_slice %536 {offsets = [0, 0], sizes = [2, 16], strides = [1, 1]} : vector<4x16xf32> to vector<2x16xf32>
    %c16_158 = arith.constant 16 : index
    %c0_159 = arith.constant 0 : index
    %540 = vector.load %arg9[%c16_158, %c0_159] : memref<32x32xf32, #tpu.memory_space<vmem>>, vector<2x16xf32>
    tpu.vector_store %arg9[%c16_158, %c0_159], %539 {strides = array<i32>} : memref<32x32xf32, #tpu.memory_space<vmem>>, vector<2x16xf32>,
    %541 = vector.extract_strided_slice %536 {offsets = [2, 0], sizes = [2, 16], strides = [1, 1]} : vector<4x16xf32> to vector<2x16xf32>
    %c14_160 = arith.constant 14 : index
    %c16_161 = arith.constant 16 : index
    %542 = vector.load %arg9[%c14_160, %c16_161] : memref<32x32xf32, #tpu.memory_space<vmem>>, vector<2x16xf32>
    tpu.vector_store %arg9[%c14_160, %c16_161], %541 {strides = array<i32>} : memref<32x32xf32, #tpu.memory_space<vmem>>, vector<2x16xf32>,
    %543 = vector.extract_strided_slice %192 {offsets = [18, 0], sizes = [2, 48], strides = [1, 1]} : vector<32x96xf32> to vector<2x48xf32>
    %544 = vector.extract_strided_slice %192 {offsets = [12, 48], sizes = [2, 48], strides = [1, 1]} : vector<32x96xf32> to vector<2x48xf32>
    %545 = tpu.concatenate %543, %544 in 0 : vector<2x48xf32>, vector<2x48xf32> -> vector<4x48xf32>
    %cst_162 = arith.constant dense<0.000000e+00> : vector<4x48xf32>
    %546 = tpu.matmul %538, %193, %cst_162 {dimension_numbers = #tpu.dot_dimension_numbers<[1], [0], [0], [1], [0, 0, 1, 1], [], []>} : vector<4x32xf32>, vector<32x48xf32>, vector<4x48xf32> -> vector<4x48xf32>
    %547 = arith.addf %546, %200 : vector<4x48xf32>
    %548 = vector.extract_strided_slice %545 {offsets = [0, 0], sizes = [4, 16], strides = [1, 1]} : vector<4x48xf32> to vector<4x16xf32>
    %549 = vector.extract_strided_slice %547 {offsets = [0, 0], sizes = [4, 16], strides = [1, 1]} : vector<4x48xf32> to vector<4x16xf32>
    %550 = arith.addf %548, %549 : vector<4x16xf32>
    %551 = arith.negf %550 : vector<4x16xf32>
    %552 = math.exp %551 : vector<4x16xf32>
    %cst_163 = arith.constant 1.000000e+00 : f32
    %553 = vector.broadcast %cst_163 : f32 to vector<4x16xf32>
    %554 = arith.addf %553, %552 : vector<4x16xf32>
    %555 = arith.divf %553, %554 : vector<4x16xf32>
    %556 = vector.extract_strided_slice %545 {offsets = [0, 16], sizes = [4, 16], strides = [1, 1]} : vector<4x48xf32> to vector<4x16xf32>
    %557 = vector.extract_strided_slice %547 {offsets = [0, 16], sizes = [4, 16], strides = [1, 1]} : vector<4x48xf32> to vector<4x16xf32>
    %558 = arith.addf %556, %557 : vector<4x16xf32>
    %559 = arith.negf %558 : vector<4x16xf32>
    %560 = math.exp %559 : vector<4x16xf32>
    %cst_164 = arith.constant 1.000000e+00 : f32
    %561 = vector.broadcast %cst_164 : f32 to vector<4x16xf32>
    %562 = arith.addf %561, %560 : vector<4x16xf32>
    %563 = arith.divf %561, %562 : vector<4x16xf32>
    %564 = vector.extract_strided_slice %545 {offsets = [0, 32], sizes = [4, 16], strides = [1, 1]} : vector<4x48xf32> to vector<4x16xf32>
    %565 = vector.extract_strided_slice %547 {offsets = [0, 32], sizes = [4, 16], strides = [1, 1]} : vector<4x48xf32> to vector<4x16xf32>
    %566 = arith.mulf %555, %565 : vector<4x16xf32>
    %567 = arith.addf %564, %566 : vector<4x16xf32>
    %568 = math.tanh %567 : vector<4x16xf32>
    %cst_165 = arith.constant 1.000000e+00 : f32
    %569 = vector.broadcast %cst_165 : f32 to vector<4x16xf32>
    %570 = arith.subf %569, %563 : vector<4x16xf32>
    %571 = arith.mulf %570, %568 : vector<4x16xf32>
    %572 = arith.mulf %563, %536 : vector<4x16xf32>
    %573 = arith.addf %571, %572 : vector<4x16xf32>
    %574 = tpu.concatenate %573, %573 in 1 : vector<4x16xf32>, vector<4x16xf32> -> vector<4x32xf32>
    %575 = arith.mulf %574, %207 : vector<4x32xf32>
    %576 = vector.extract_strided_slice %573 {offsets = [0, 0], sizes = [2, 16], strides = [1, 1]} : vector<4x16xf32> to vector<2x16xf32>
    %c18_166 = arith.constant 18 : index
    %c0_167 = arith.constant 0 : index
    %577 = vector.load %arg9[%c18_166, %c0_167] : memref<32x32xf32, #tpu.memory_space<vmem>>, vector<2x16xf32>
    tpu.vector_store %arg9[%c18_166, %c0_167], %576 {strides = array<i32>} : memref<32x32xf32, #tpu.memory_space<vmem>>, vector<2x16xf32>,
    %578 = vector.extract_strided_slice %573 {offsets = [2, 0], sizes = [2, 16], strides = [1, 1]} : vector<4x16xf32> to vector<2x16xf32>
    %c12_168 = arith.constant 12 : index
    %c16_169 = arith.constant 16 : index
    %579 = vector.load %arg9[%c12_168, %c16_169] : memref<32x32xf32, #tpu.memory_space<vmem>>, vector<2x16xf32>
    tpu.vector_store %arg9[%c12_168, %c16_169], %578 {strides = array<i32>} : memref<32x32xf32, #tpu.memory_space<vmem>>, vector<2x16xf32>,
    %580 = vector.extract_strided_slice %192 {offsets = [20, 0], sizes = [2, 48], strides = [1, 1]} : vector<32x96xf32> to vector<2x48xf32>
    %581 = vector.extract_strided_slice %192 {offsets = [10, 48], sizes = [2, 48], strides = [1, 1]} : vector<32x96xf32> to vector<2x48xf32>
    %582 = tpu.concatenate %580, %581 in 0 : vector<2x48xf32>, vector<2x48xf32> -> vector<4x48xf32>
    %cst_170 = arith.constant dense<0.000000e+00> : vector<4x48xf32>
    %583 = tpu.matmul %575, %193, %cst_170 {dimension_numbers = #tpu.dot_dimension_numbers<[1], [0], [0], [1], [0, 0, 1, 1], [], []>} : vector<4x32xf32>, vector<32x48xf32>, vector<4x48xf32> -> vector<4x48xf32>
    %584 = arith.addf %583, %200 : vector<4x48xf32>
    %585 = vector.extract_strided_slice %582 {offsets = [0, 0], sizes = [4, 16], strides = [1, 1]} : vector<4x48xf32> to vector<4x16xf32>
    %586 = vector.extract_strided_slice %584 {offsets = [0, 0], sizes = [4, 16], strides = [1, 1]} : vector<4x48xf32> to vector<4x16xf32>
    %587 = arith.addf %585, %586 : vector<4x16xf32>
    %588 = arith.negf %587 : vector<4x16xf32>
    %589 = math.exp %588 : vector<4x16xf32>
    %cst_171 = arith.constant 1.000000e+00 : f32
    %590 = vector.broadcast %cst_171 : f32 to vector<4x16xf32>
    %591 = arith.addf %590, %589 : vector<4x16xf32>
    %592 = arith.divf %590, %591 : vector<4x16xf32>
    %593 = vector.extract_strided_slice %582 {offsets = [0, 16], sizes = [4, 16], strides = [1, 1]} : vector<4x48xf32> to vector<4x16xf32>
    %594 = vector.extract_strided_slice %584 {offsets = [0, 16], sizes = [4, 16], strides = [1, 1]} : vector<4x48xf32> to vector<4x16xf32>
    %595 = arith.addf %593, %594 : vector<4x16xf32>
    %596 = arith.negf %595 : vector<4x16xf32>
    %597 = math.exp %596 : vector<4x16xf32>
    %cst_172 = arith.constant 1.000000e+00 : f32
    %598 = vector.broadcast %cst_172 : f32 to vector<4x16xf32>
    %599 = arith.addf %598, %597 : vector<4x16xf32>
    %600 = arith.divf %598, %599 : vector<4x16xf32>
    %601 = vector.extract_strided_slice %582 {offsets = [0, 32], sizes = [4, 16], strides = [1, 1]} : vector<4x48xf32> to vector<4x16xf32>
    %602 = vector.extract_strided_slice %584 {offsets = [0, 32], sizes = [4, 16], strides = [1, 1]} : vector<4x48xf32> to vector<4x16xf32>
    %603 = arith.mulf %592, %602 : vector<4x16xf32>
    %604 = arith.addf %601, %603 : vector<4x16xf32>
    %605 = math.tanh %604 : vector<4x16xf32>
    %cst_173 = arith.constant 1.000000e+00 : f32
    %606 = vector.broadcast %cst_173 : f32 to vector<4x16xf32>
    %607 = arith.subf %606, %600 : vector<4x16xf32>
    %608 = arith.mulf %607, %605 : vector<4x16xf32>
    %609 = arith.mulf %600, %573 : vector<4x16xf32>
    %610 = arith.addf %608, %609 : vector<4x16xf32>
    %611 = tpu.concatenate %610, %610 in 1 : vector<4x16xf32>, vector<4x16xf32> -> vector<4x32xf32>
    %612 = arith.mulf %611, %207 : vector<4x32xf32>
    %613 = vector.extract_strided_slice %610 {offsets = [0, 0], sizes = [2, 16], strides = [1, 1]} : vector<4x16xf32> to vector<2x16xf32>
    %c20_174 = arith.constant 20 : index
    %c0_175 = arith.constant 0 : index
    %614 = vector.load %arg9[%c20_174, %c0_175] : memref<32x32xf32, #tpu.memory_space<vmem>>, vector<2x16xf32>
    tpu.vector_store %arg9[%c20_174, %c0_175], %613 {strides = array<i32>} : memref<32x32xf32, #tpu.memory_space<vmem>>, vector<2x16xf32>,
    %615 = vector.extract_strided_slice %610 {offsets = [2, 0], sizes = [2, 16], strides = [1, 1]} : vector<4x16xf32> to vector<2x16xf32>
    %c10_176 = arith.constant 10 : index
    %c16_177 = arith.constant 16 : index
    %616 = vector.load %arg9[%c10_176, %c16_177] : memref<32x32xf32, #tpu.memory_space<vmem>>, vector<2x16xf32>
    tpu.vector_store %arg9[%c10_176, %c16_177], %615 {strides = array<i32>} : memref<32x32xf32, #tpu.memory_space<vmem>>, vector<2x16xf32>,
    %617 = vector.extract_strided_slice %192 {offsets = [22, 0], sizes = [2, 48], strides = [1, 1]} : vector<32x96xf32> to vector<2x48xf32>
    %618 = vector.extract_strided_slice %192 {offsets = [8, 48], sizes = [2, 48], strides = [1, 1]} : vector<32x96xf32> to vector<2x48xf32>
    %619 = tpu.concatenate %617, %618 in 0 : vector<2x48xf32>, vector<2x48xf32> -> vector<4x48xf32>
    %cst_178 = arith.constant dense<0.000000e+00> : vector<4x48xf32>
    %620 = tpu.matmul %612, %193, %cst_178 {dimension_numbers = #tpu.dot_dimension_numbers<[1], [0], [0], [1], [0, 0, 1, 1], [], []>} : vector<4x32xf32>, vector<32x48xf32>, vector<4x48xf32> -> vector<4x48xf32>
    %621 = arith.addf %620, %200 : vector<4x48xf32>
    %622 = vector.extract_strided_slice %619 {offsets = [0, 0], sizes = [4, 16], strides = [1, 1]} : vector<4x48xf32> to vector<4x16xf32>
    %623 = vector.extract_strided_slice %621 {offsets = [0, 0], sizes = [4, 16], strides = [1, 1]} : vector<4x48xf32> to vector<4x16xf32>
    %624 = arith.addf %622, %623 : vector<4x16xf32>
    %625 = arith.negf %624 : vector<4x16xf32>
    %626 = math.exp %625 : vector<4x16xf32>
    %cst_179 = arith.constant 1.000000e+00 : f32
    %627 = vector.broadcast %cst_179 : f32 to vector<4x16xf32>
    %628 = arith.addf %627, %626 : vector<4x16xf32>
    %629 = arith.divf %627, %628 : vector<4x16xf32>
    %630 = vector.extract_strided_slice %619 {offsets = [0, 16], sizes = [4, 16], strides = [1, 1]} : vector<4x48xf32> to vector<4x16xf32>
    %631 = vector.extract_strided_slice %621 {offsets = [0, 16], sizes = [4, 16], strides = [1, 1]} : vector<4x48xf32> to vector<4x16xf32>
    %632 = arith.addf %630, %631 : vector<4x16xf32>
    %633 = arith.negf %632 : vector<4x16xf32>
    %634 = math.exp %633 : vector<4x16xf32>
    %cst_180 = arith.constant 1.000000e+00 : f32
    %635 = vector.broadcast %cst_180 : f32 to vector<4x16xf32>
    %636 = arith.addf %635, %634 : vector<4x16xf32>
    %637 = arith.divf %635, %636 : vector<4x16xf32>
    %638 = vector.extract_strided_slice %619 {offsets = [0, 32], sizes = [4, 16], strides = [1, 1]} : vector<4x48xf32> to vector<4x16xf32>
    %639 = vector.extract_strided_slice %621 {offsets = [0, 32], sizes = [4, 16], strides = [1, 1]} : vector<4x48xf32> to vector<4x16xf32>
    %640 = arith.mulf %629, %639 : vector<4x16xf32>
    %641 = arith.addf %638, %640 : vector<4x16xf32>
    %642 = math.tanh %641 : vector<4x16xf32>
    %cst_181 = arith.constant 1.000000e+00 : f32
    %643 = vector.broadcast %cst_181 : f32 to vector<4x16xf32>
    %644 = arith.subf %643, %637 : vector<4x16xf32>
    %645 = arith.mulf %644, %642 : vector<4x16xf32>
    %646 = arith.mulf %637, %610 : vector<4x16xf32>
    %647 = arith.addf %645, %646 : vector<4x16xf32>
    %648 = tpu.concatenate %647, %647 in 1 : vector<4x16xf32>, vector<4x16xf32> -> vector<4x32xf32>
    %649 = arith.mulf %648, %207 : vector<4x32xf32>
    %650 = vector.extract_strided_slice %647 {offsets = [0, 0], sizes = [2, 16], strides = [1, 1]} : vector<4x16xf32> to vector<2x16xf32>
    %c22_182 = arith.constant 22 : index
    %c0_183 = arith.constant 0 : index
    %651 = vector.load %arg9[%c22_182, %c0_183] : memref<32x32xf32, #tpu.memory_space<vmem>>, vector<2x16xf32>
    tpu.vector_store %arg9[%c22_182, %c0_183], %650 {strides = array<i32>} : memref<32x32xf32, #tpu.memory_space<vmem>>, vector<2x16xf32>,
    %652 = vector.extract_strided_slice %647 {offsets = [2, 0], sizes = [2, 16], strides = [1, 1]} : vector<4x16xf32> to vector<2x16xf32>
    %c8_184 = arith.constant 8 : index
    %c16_185 = arith.constant 16 : index
    %653 = vector.load %arg9[%c8_184, %c16_185] : memref<32x32xf32, #tpu.memory_space<vmem>>, vector<2x16xf32>
    tpu.vector_store %arg9[%c8_184, %c16_185], %652 {strides = array<i32>} : memref<32x32xf32, #tpu.memory_space<vmem>>, vector<2x16xf32>,
    %654 = vector.extract_strided_slice %192 {offsets = [24, 0], sizes = [2, 48], strides = [1, 1]} : vector<32x96xf32> to vector<2x48xf32>
    %655 = vector.extract_strided_slice %192 {offsets = [6, 48], sizes = [2, 48], strides = [1, 1]} : vector<32x96xf32> to vector<2x48xf32>
    %656 = tpu.concatenate %654, %655 in 0 : vector<2x48xf32>, vector<2x48xf32> -> vector<4x48xf32>
    %cst_186 = arith.constant dense<0.000000e+00> : vector<4x48xf32>
    %657 = tpu.matmul %649, %193, %cst_186 {dimension_numbers = #tpu.dot_dimension_numbers<[1], [0], [0], [1], [0, 0, 1, 1], [], []>} : vector<4x32xf32>, vector<32x48xf32>, vector<4x48xf32> -> vector<4x48xf32>
    %658 = arith.addf %657, %200 : vector<4x48xf32>
    %659 = vector.extract_strided_slice %656 {offsets = [0, 0], sizes = [4, 16], strides = [1, 1]} : vector<4x48xf32> to vector<4x16xf32>
    %660 = vector.extract_strided_slice %658 {offsets = [0, 0], sizes = [4, 16], strides = [1, 1]} : vector<4x48xf32> to vector<4x16xf32>
    %661 = arith.addf %659, %660 : vector<4x16xf32>
    %662 = arith.negf %661 : vector<4x16xf32>
    %663 = math.exp %662 : vector<4x16xf32>
    %cst_187 = arith.constant 1.000000e+00 : f32
    %664 = vector.broadcast %cst_187 : f32 to vector<4x16xf32>
    %665 = arith.addf %664, %663 : vector<4x16xf32>
    %666 = arith.divf %664, %665 : vector<4x16xf32>
    %667 = vector.extract_strided_slice %656 {offsets = [0, 16], sizes = [4, 16], strides = [1, 1]} : vector<4x48xf32> to vector<4x16xf32>
    %668 = vector.extract_strided_slice %658 {offsets = [0, 16], sizes = [4, 16], strides = [1, 1]} : vector<4x48xf32> to vector<4x16xf32>
    %669 = arith.addf %667, %668 : vector<4x16xf32>
    %670 = arith.negf %669 : vector<4x16xf32>
    %671 = math.exp %670 : vector<4x16xf32>
    %cst_188 = arith.constant 1.000000e+00 : f32
    %672 = vector.broadcast %cst_188 : f32 to vector<4x16xf32>
    %673 = arith.addf %672, %671 : vector<4x16xf32>
    %674 = arith.divf %672, %673 : vector<4x16xf32>
    %675 = vector.extract_strided_slice %656 {offsets = [0, 32], sizes = [4, 16], strides = [1, 1]} : vector<4x48xf32> to vector<4x16xf32>
    %676 = vector.extract_strided_slice %658 {offsets = [0, 32], sizes = [4, 16], strides = [1, 1]} : vector<4x48xf32> to vector<4x16xf32>
    %677 = arith.mulf %666, %676 : vector<4x16xf32>
    %678 = arith.addf %675, %677 : vector<4x16xf32>
    %679 = math.tanh %678 : vector<4x16xf32>
    %cst_189 = arith.constant 1.000000e+00 : f32
    %680 = vector.broadcast %cst_189 : f32 to vector<4x16xf32>
    %681 = arith.subf %680, %674 : vector<4x16xf32>
    %682 = arith.mulf %681, %679 : vector<4x16xf32>
    %683 = arith.mulf %674, %647 : vector<4x16xf32>
    %684 = arith.addf %682, %683 : vector<4x16xf32>
    %685 = tpu.concatenate %684, %684 in 1 : vector<4x16xf32>, vector<4x16xf32> -> vector<4x32xf32>
    %686 = arith.mulf %685, %207 : vector<4x32xf32>
    %687 = vector.extract_strided_slice %684 {offsets = [0, 0], sizes = [2, 16], strides = [1, 1]} : vector<4x16xf32> to vector<2x16xf32>
    %c24_190 = arith.constant 24 : index
    %c0_191 = arith.constant 0 : index
    %688 = vector.load %arg9[%c24_190, %c0_191] : memref<32x32xf32, #tpu.memory_space<vmem>>, vector<2x16xf32>
    tpu.vector_store %arg9[%c24_190, %c0_191], %687 {strides = array<i32>} : memref<32x32xf32, #tpu.memory_space<vmem>>, vector<2x16xf32>,
    %689 = vector.extract_strided_slice %684 {offsets = [2, 0], sizes = [2, 16], strides = [1, 1]} : vector<4x16xf32> to vector<2x16xf32>
    %c6_192 = arith.constant 6 : index
    %c16_193 = arith.constant 16 : index
    %690 = vector.load %arg9[%c6_192, %c16_193] : memref<32x32xf32, #tpu.memory_space<vmem>>, vector<2x16xf32>
    tpu.vector_store %arg9[%c6_192, %c16_193], %689 {strides = array<i32>} : memref<32x32xf32, #tpu.memory_space<vmem>>, vector<2x16xf32>,
    %691 = vector.extract_strided_slice %192 {offsets = [26, 0], sizes = [2, 48], strides = [1, 1]} : vector<32x96xf32> to vector<2x48xf32>
    %692 = vector.extract_strided_slice %192 {offsets = [4, 48], sizes = [2, 48], strides = [1, 1]} : vector<32x96xf32> to vector<2x48xf32>
    %693 = tpu.concatenate %691, %692 in 0 : vector<2x48xf32>, vector<2x48xf32> -> vector<4x48xf32>
    %cst_194 = arith.constant dense<0.000000e+00> : vector<4x48xf32>
    %694 = tpu.matmul %686, %193, %cst_194 {dimension_numbers = #tpu.dot_dimension_numbers<[1], [0], [0], [1], [0, 0, 1, 1], [], []>} : vector<4x32xf32>, vector<32x48xf32>, vector<4x48xf32> -> vector<4x48xf32>
    %695 = arith.addf %694, %200 : vector<4x48xf32>
    %696 = vector.extract_strided_slice %693 {offsets = [0, 0], sizes = [4, 16], strides = [1, 1]} : vector<4x48xf32> to vector<4x16xf32>
    %697 = vector.extract_strided_slice %695 {offsets = [0, 0], sizes = [4, 16], strides = [1, 1]} : vector<4x48xf32> to vector<4x16xf32>
    %698 = arith.addf %696, %697 : vector<4x16xf32>
    %699 = arith.negf %698 : vector<4x16xf32>
    %700 = math.exp %699 : vector<4x16xf32>
    %cst_195 = arith.constant 1.000000e+00 : f32
    %701 = vector.broadcast %cst_195 : f32 to vector<4x16xf32>
    %702 = arith.addf %701, %700 : vector<4x16xf32>
    %703 = arith.divf %701, %702 : vector<4x16xf32>
    %704 = vector.extract_strided_slice %693 {offsets = [0, 16], sizes = [4, 16], strides = [1, 1]} : vector<4x48xf32> to vector<4x16xf32>
    %705 = vector.extract_strided_slice %695 {offsets = [0, 16], sizes = [4, 16], strides = [1, 1]} : vector<4x48xf32> to vector<4x16xf32>
    %706 = arith.addf %704, %705 : vector<4x16xf32>
    %707 = arith.negf %706 : vector<4x16xf32>
    %708 = math.exp %707 : vector<4x16xf32>
    %cst_196 = arith.constant 1.000000e+00 : f32
    %709 = vector.broadcast %cst_196 : f32 to vector<4x16xf32>
    %710 = arith.addf %709, %708 : vector<4x16xf32>
    %711 = arith.divf %709, %710 : vector<4x16xf32>
    %712 = vector.extract_strided_slice %693 {offsets = [0, 32], sizes = [4, 16], strides = [1, 1]} : vector<4x48xf32> to vector<4x16xf32>
    %713 = vector.extract_strided_slice %695 {offsets = [0, 32], sizes = [4, 16], strides = [1, 1]} : vector<4x48xf32> to vector<4x16xf32>
    %714 = arith.mulf %703, %713 : vector<4x16xf32>
    %715 = arith.addf %712, %714 : vector<4x16xf32>
    %716 = math.tanh %715 : vector<4x16xf32>
    %cst_197 = arith.constant 1.000000e+00 : f32
    %717 = vector.broadcast %cst_197 : f32 to vector<4x16xf32>
    %718 = arith.subf %717, %711 : vector<4x16xf32>
    %719 = arith.mulf %718, %716 : vector<4x16xf32>
    %720 = arith.mulf %711, %684 : vector<4x16xf32>
    %721 = arith.addf %719, %720 : vector<4x16xf32>
    %722 = tpu.concatenate %721, %721 in 1 : vector<4x16xf32>, vector<4x16xf32> -> vector<4x32xf32>
    %723 = arith.mulf %722, %207 : vector<4x32xf32>
    %724 = vector.extract_strided_slice %721 {offsets = [0, 0], sizes = [2, 16], strides = [1, 1]} : vector<4x16xf32> to vector<2x16xf32>
    %c26_198 = arith.constant 26 : index
    %c0_199 = arith.constant 0 : index
    %725 = vector.load %arg9[%c26_198, %c0_199] : memref<32x32xf32, #tpu.memory_space<vmem>>, vector<2x16xf32>
    tpu.vector_store %arg9[%c26_198, %c0_199], %724 {strides = array<i32>} : memref<32x32xf32, #tpu.memory_space<vmem>>, vector<2x16xf32>,
    %726 = vector.extract_strided_slice %721 {offsets = [2, 0], sizes = [2, 16], strides = [1, 1]} : vector<4x16xf32> to vector<2x16xf32>
    %c4_200 = arith.constant 4 : index
    %c16_201 = arith.constant 16 : index
    %727 = vector.load %arg9[%c4_200, %c16_201] : memref<32x32xf32, #tpu.memory_space<vmem>>, vector<2x16xf32>
    tpu.vector_store %arg9[%c4_200, %c16_201], %726 {strides = array<i32>} : memref<32x32xf32, #tpu.memory_space<vmem>>, vector<2x16xf32>,
    %728 = vector.extract_strided_slice %192 {offsets = [28, 0], sizes = [2, 48], strides = [1, 1]} : vector<32x96xf32> to vector<2x48xf32>
    %729 = vector.extract_strided_slice %192 {offsets = [2, 48], sizes = [2, 48], strides = [1, 1]} : vector<32x96xf32> to vector<2x48xf32>
    %730 = tpu.concatenate %728, %729 in 0 : vector<2x48xf32>, vector<2x48xf32> -> vector<4x48xf32>
    %cst_202 = arith.constant dense<0.000000e+00> : vector<4x48xf32>
    %731 = tpu.matmul %723, %193, %cst_202 {dimension_numbers = #tpu.dot_dimension_numbers<[1], [0], [0], [1], [0, 0, 1, 1], [], []>} : vector<4x32xf32>, vector<32x48xf32>, vector<4x48xf32> -> vector<4x48xf32>
    %732 = arith.addf %731, %200 : vector<4x48xf32>
    %733 = vector.extract_strided_slice %730 {offsets = [0, 0], sizes = [4, 16], strides = [1, 1]} : vector<4x48xf32> to vector<4x16xf32>
    %734 = vector.extract_strided_slice %732 {offsets = [0, 0], sizes = [4, 16], strides = [1, 1]} : vector<4x48xf32> to vector<4x16xf32>
    %735 = arith.addf %733, %734 : vector<4x16xf32>
    %736 = arith.negf %735 : vector<4x16xf32>
    %737 = math.exp %736 : vector<4x16xf32>
    %cst_203 = arith.constant 1.000000e+00 : f32
    %738 = vector.broadcast %cst_203 : f32 to vector<4x16xf32>
    %739 = arith.addf %738, %737 : vector<4x16xf32>
    %740 = arith.divf %738, %739 : vector<4x16xf32>
    %741 = vector.extract_strided_slice %730 {offsets = [0, 16], sizes = [4, 16], strides = [1, 1]} : vector<4x48xf32> to vector<4x16xf32>
    %742 = vector.extract_strided_slice %732 {offsets = [0, 16], sizes = [4, 16], strides = [1, 1]} : vector<4x48xf32> to vector<4x16xf32>
    %743 = arith.addf %741, %742 : vector<4x16xf32>
    %744 = arith.negf %743 : vector<4x16xf32>
    %745 = math.exp %744 : vector<4x16xf32>
    %cst_204 = arith.constant 1.000000e+00 : f32
    %746 = vector.broadcast %cst_204 : f32 to vector<4x16xf32>
    %747 = arith.addf %746, %745 : vector<4x16xf32>
    %748 = arith.divf %746, %747 : vector<4x16xf32>
    %749 = vector.extract_strided_slice %730 {offsets = [0, 32], sizes = [4, 16], strides = [1, 1]} : vector<4x48xf32> to vector<4x16xf32>
    %750 = vector.extract_strided_slice %732 {offsets = [0, 32], sizes = [4, 16], strides = [1, 1]} : vector<4x48xf32> to vector<4x16xf32>
    %751 = arith.mulf %740, %750 : vector<4x16xf32>
    %752 = arith.addf %749, %751 : vector<4x16xf32>
    %753 = math.tanh %752 : vector<4x16xf32>
    %cst_205 = arith.constant 1.000000e+00 : f32
    %754 = vector.broadcast %cst_205 : f32 to vector<4x16xf32>
    %755 = arith.subf %754, %748 : vector<4x16xf32>
    %756 = arith.mulf %755, %753 : vector<4x16xf32>
    %757 = arith.mulf %748, %721 : vector<4x16xf32>
    %758 = arith.addf %756, %757 : vector<4x16xf32>
    %759 = tpu.concatenate %758, %758 in 1 : vector<4x16xf32>, vector<4x16xf32> -> vector<4x32xf32>
    %760 = arith.mulf %759, %207 : vector<4x32xf32>
    %761 = vector.extract_strided_slice %758 {offsets = [0, 0], sizes = [2, 16], strides = [1, 1]} : vector<4x16xf32> to vector<2x16xf32>
    %c28_206 = arith.constant 28 : index
    %c0_207 = arith.constant 0 : index
    %762 = vector.load %arg9[%c28_206, %c0_207] : memref<32x32xf32, #tpu.memory_space<vmem>>, vector<2x16xf32>
    tpu.vector_store %arg9[%c28_206, %c0_207], %761 {strides = array<i32>} : memref<32x32xf32, #tpu.memory_space<vmem>>, vector<2x16xf32>,
    %763 = vector.extract_strided_slice %758 {offsets = [2, 0], sizes = [2, 16], strides = [1, 1]} : vector<4x16xf32> to vector<2x16xf32>
    %c2_208 = arith.constant 2 : index
    %c16_209 = arith.constant 16 : index
    %764 = vector.load %arg9[%c2_208, %c16_209] : memref<32x32xf32, #tpu.memory_space<vmem>>, vector<2x16xf32>
    tpu.vector_store %arg9[%c2_208, %c16_209], %763 {strides = array<i32>} : memref<32x32xf32, #tpu.memory_space<vmem>>, vector<2x16xf32>,
    %765 = vector.extract_strided_slice %192 {offsets = [30, 0], sizes = [2, 48], strides = [1, 1]} : vector<32x96xf32> to vector<2x48xf32>
    %766 = vector.extract_strided_slice %192 {offsets = [0, 48], sizes = [2, 48], strides = [1, 1]} : vector<32x96xf32> to vector<2x48xf32>
    %767 = tpu.concatenate %765, %766 in 0 : vector<2x48xf32>, vector<2x48xf32> -> vector<4x48xf32>
    %cst_210 = arith.constant dense<0.000000e+00> : vector<4x48xf32>
    %768 = tpu.matmul %760, %193, %cst_210 {dimension_numbers = #tpu.dot_dimension_numbers<[1], [0], [0], [1], [0, 0, 1, 1], [], []>} : vector<4x32xf32>, vector<32x48xf32>, vector<4x48xf32> -> vector<4x48xf32>
    %769 = arith.addf %768, %200 : vector<4x48xf32>
    %770 = vector.extract_strided_slice %767 {offsets = [0, 0], sizes = [4, 16], strides = [1, 1]} : vector<4x48xf32> to vector<4x16xf32>
    %771 = vector.extract_strided_slice %769 {offsets = [0, 0], sizes = [4, 16], strides = [1, 1]} : vector<4x48xf32> to vector<4x16xf32>
    %772 = arith.addf %770, %771 : vector<4x16xf32>
    %773 = arith.negf %772 : vector<4x16xf32>
    %774 = math.exp %773 : vector<4x16xf32>
    %cst_211 = arith.constant 1.000000e+00 : f32
    %775 = vector.broadcast %cst_211 : f32 to vector<4x16xf32>
    %776 = arith.addf %775, %774 : vector<4x16xf32>
    %777 = arith.divf %775, %776 : vector<4x16xf32>
    %778 = vector.extract_strided_slice %767 {offsets = [0, 16], sizes = [4, 16], strides = [1, 1]} : vector<4x48xf32> to vector<4x16xf32>
    %779 = vector.extract_strided_slice %769 {offsets = [0, 16], sizes = [4, 16], strides = [1, 1]} : vector<4x48xf32> to vector<4x16xf32>
    %780 = arith.addf %778, %779 : vector<4x16xf32>
    %781 = arith.negf %780 : vector<4x16xf32>
    %782 = math.exp %781 : vector<4x16xf32>
    %cst_212 = arith.constant 1.000000e+00 : f32
    %783 = vector.broadcast %cst_212 : f32 to vector<4x16xf32>
    %784 = arith.addf %783, %782 : vector<4x16xf32>
    %785 = arith.divf %783, %784 : vector<4x16xf32>
    %786 = vector.extract_strided_slice %767 {offsets = [0, 32], sizes = [4, 16], strides = [1, 1]} : vector<4x48xf32> to vector<4x16xf32>
    %787 = vector.extract_strided_slice %769 {offsets = [0, 32], sizes = [4, 16], strides = [1, 1]} : vector<4x48xf32> to vector<4x16xf32>
    %788 = arith.mulf %777, %787 : vector<4x16xf32>
    %789 = arith.addf %786, %788 : vector<4x16xf32>
    %790 = math.tanh %789 : vector<4x16xf32>
    %cst_213 = arith.constant 1.000000e+00 : f32
    %791 = vector.broadcast %cst_213 : f32 to vector<4x16xf32>
    %792 = arith.subf %791, %785 : vector<4x16xf32>
    %793 = arith.mulf %792, %790 : vector<4x16xf32>
    %794 = arith.mulf %785, %758 : vector<4x16xf32>
    %795 = arith.addf %793, %794 : vector<4x16xf32>
    %796 = vector.extract_strided_slice %795 {offsets = [0, 0], sizes = [2, 16], strides = [1, 1]} : vector<4x16xf32> to vector<2x16xf32>
    %c30_214 = arith.constant 30 : index
    %c0_215 = arith.constant 0 : index
    %797 = vector.load %arg9[%c30_214, %c0_215] : memref<32x32xf32, #tpu.memory_space<vmem>>, vector<2x16xf32>
    tpu.vector_store %arg9[%c30_214, %c0_215], %796 {strides = array<i32>} : memref<32x32xf32, #tpu.memory_space<vmem>>, vector<2x16xf32>,
    %798 = vector.extract_strided_slice %795 {offsets = [2, 0], sizes = [2, 16], strides = [1, 1]} : vector<4x16xf32> to vector<2x16xf32>
    %c0_216 = arith.constant 0 : index
    %c16_217 = arith.constant 16 : index
    %799 = vector.load %arg9[%c0_216, %c16_217] : memref<32x32xf32, #tpu.memory_space<vmem>>, vector<2x16xf32>
    tpu.vector_store %arg9[%c0_216, %c16_217], %798 {strides = array<i32>} : memref<32x32xf32, #tpu.memory_space<vmem>>, vector<2x16xf32>,
    return
  }
}

</mosaic_0001>

<bundles_post_ra>
// kernel: _lambda_.1
= control target key start
LH: loop header
LB: loop body
LE: loop exit
PB: predicated region body
PF: predicated region fallthrough
CT: control target
= control target key end

     0   :  { %14 = vsyncpa [#allocation6], 0  ;;  %s4075_s0 = inlined_call_operand.vmem [shape: f32[32,16], index: 0, kind: input, shape index: {}]   ;;  %s4076_s1 = inlined_call_operand.hbm [shape: f32[64,64], index: 1, kind: input, shape index: {}]   ;;  %s4077_s2 = inlined_call_operand.hbm [shape: f32[192,16], index: 2, kind: input, shape index: {}]   ;;  %s4078_s3 = inlined_call_operand.hbm [shape: f32[48,16], index: 3, kind: input, shape index: {}]   ;;  %s4079_s4 = inlined_call_operand.hbm [shape: f32[16,16], index: 4, kind: input, shape index: {}]   ;;  %s4080_s5 = inlined_call_operand.vmem [shape: f32[4,16,32], index: 5, kind: input, shape index: {}]   ;;  %s4081_s6 = inlined_call_operand.hbm [shape: f32[16,96], index: 6, kind: input, shape index: {}]   ;;  %s4082_s7 = inlined_call_operand.hbm [shape: f32[32,48], index: 7, kind: input, shape index: {}]   ;;  %s4083_s8 = inlined_call_operand.hbm [shape: f32[17,96], index: 8, kind: input, shape index: {}]   ;;  %s4084_s9 = inlined_call_operand.vmem [shape: f32[32,32], index: 9, kind: output, shape index: {}]  }
   0x1   :  { %15 = vsyncpa [#allocation8], 0 }
   0x2   :  { %16 = vsyncpa [#allocation11], 0 }
   0x3   :  { %17 = vsyncpa [#allocation14], 0  ;;  %s37_s11 = sshll.u32 %s4077_s2, 4  ;;  %s3251_s12 = smov [#allocation7]   ;;  %s38_s11 = int_to_ptr.hbm [resolvable:$true] %s37_s11 }
   0x4   :  { %s39_s13 = sshll.u32 %s3251_s12, 4  ;;  %s63_s16 = sshll.u32 %s4079_s4, 4  ;;  %s40_s13 = int_to_ptr.vmem [resolvable:$true] %s39_s13  ;;  %s64_s16 = int_to_ptr.hbm [resolvable:$true] %s63_s16 }
   0x5   :  { %s3252_s17 = smov 128   ;;  %s3253_s18 = smov 8  }
   0x6   :  { %45 = dma.hbm_to_vmem [thread:$0]  %s38_s11, 3072, %s40_s13, [#allocation8], %s3252_s17, %s3252_s17, %s3253_s18  }
   0x7   :  { %s3254_s19 = smov [#allocation10]   ;;  %s91_s2 = sshll.u32 %s4082_s7, 4  ;;  %s92_s2 = int_to_ptr.hbm [resolvable:$true] %s91_s2 }
   0x8   :  { %s65_s20 = sshll.u32 %s3254_s19, 4  ;;  %s24_s24 = sshll.u32 %s4076_s1, 4  ;;  %s66_s20 = int_to_ptr.vmem [resolvable:$true] %s65_s20  ;;  %s25_s24 = int_to_ptr.hbm [resolvable:$true] %s24_s24 }
   0x9   :  { %71 = dma.hbm_to_vmem [thread:$0]  %s64_s16, 256, %s66_s20, [#allocation11], %s3252_s17, %s3252_s17, %s3253_s18  }
   0xa   :  { %s3255_s25 = smov [#allocation13]   ;;  %s3256_s27 = smov [#allocation5]  }
   0xb   :  { %s93_s26 = sshll.u32 %s3255_s25, 4  ;;  %s26_s7 = sshll.u32 %s3256_s27, 4  ;;  %s94_s26 = int_to_ptr.vmem [resolvable:$true] %s93_s26  ;;  %s27_s7 = int_to_ptr.vmem [resolvable:$true] %s26_s7 }
   0xc   :  { %99 = dma.hbm_to_vmem [thread:$0]  %s92_s2, 512, %s94_s26, [#allocation14], %s3252_s17, %s3252_s17, %s3253_s18  }
   0xd   :  { %s50_s30 = sshll.u32 %s4078_s3, 4  ;;  %s78_s11 = sshll.u32 %s4081_s6, 4  ;;  %s51_s30 = int_to_ptr.hbm [resolvable:$true] %s50_s30  ;;  %s79_s11 = int_to_ptr.hbm [resolvable:$true] %s78_s11 }
   0xe   :  { %32 = dma.hbm_to_vmem [thread:$0]  %s25_s24, 1024, %s27_s7, [#allocation6], %s3252_s17, %s3252_s17, %s3253_s18  }
   0xf   :  { %s3257_s12 = smov [#allocation9]   ;;  %s3258_s14 = smov [#allocation12]  }
  0x10   :  { %s52_s13 = sshll.u32 %s3257_s12, 4  ;;  %s80_s3 = sshll.u32 %s3258_s14, 4  ;;  %s53_s13 = int_to_ptr.vmem [resolvable:$true] %s52_s13  ;;  %s81_s3 = int_to_ptr.vmem [resolvable:$true] %s80_s3 }
  0x11   :  { %58 = dma.hbm_to_vmem [thread:$0]  %s51_s30, 768, %s53_s13, [#allocation8], %s3252_s17, %s3252_s17, %s3253_s18  }
  0x12   :  { %s104_s19 = sshll.u32 %s4083_s8, 4  ;;  %s3259_s6 = smov [#allocation15]   ;;  %s105_s19 = int_to_ptr.hbm [resolvable:$true] %s104_s19 }
  0x13   :  { %86 = dma.hbm_to_vmem [thread:$0]  %s79_s11, 256, %s81_s3, [#allocation11], %s3252_s17, %s3252_s17, %s3253_s18  }
  0x14   :  { %s106_s20 = sshll.u32 %s3259_s6, 4  ;;  %s107_s20 = int_to_ptr.vmem [resolvable:$true] %s106_s20 }
  0x15   :  { %112 = dma.hbm_to_vmem [thread:$0]  %s105_s19, 384, %s107_s20, [#allocation14], %s3252_s17, %s3252_s17, %s3253_s18  }
  0x16   :  { %3243 = dma.done.wait [#allocation6], 1024  }
  0x17   :  { %3244 = vsyncadd [#allocation6], 4294966272 }
  0x18   :  { %3245 = dma.done.wait [#allocation8], 3840  }
  0x19   :  { %3246 = vsyncadd [#allocation8], 4294963456 }
  0x1a   :  { %3247 = dma.done.wait [#allocation11], 512  }
  0x1b   :  { %3248 = vsyncadd [#allocation11], 4294966784 }
  0x1c   :  { %3249 = dma.done.wait [#allocation14], 896  }
  0x1d   :  { %3250 = vsyncadd [#allocation14], 4294966400  ;;  %vm148_vm0 = vcmask 123904   ;;  %v3260_v0 = vmov 0.0   ;;  %vm155_vm1 = vcmask 125952   ;;  %vm150_vm2 = vcmask 130048  }
  0x1e   :  { %149 = vst.msk [vmem:[#allocation2] sm:$0x3] %vm148_vm0, %v3260_v0  ;;  %v162_v1 = vld [vmem:[#allocation5 + $0x28] sm:$0xff]  ;;  %v161_v2 = vld [vmem:[#allocation5 + $0x20] sm:$0xff]  ;;  %v164_v3 = vld [vmem:[#allocation5 + $0x38] sm:$0xff]  ;;  %vm376_vm3 = vcmask 517120  }
  0x1f   :  { %593 = vst.msk [vmem:[#allocation4] sm:$0x3] %vm148_vm0, %v3260_v0  ;;  %285 = vmatpush.msra.mxu2 %v162_v1  ;;  %334 = vmatpush.msra.mxu3 %v164_v3  ;;  %v3369_v4 = vld [vmem:[%s4075_s0] sm:$0xff]  ;;  %v3374_v5 = vld [vmem:[%s4075_s0 + $0x8] sm:$0xff]  ;;  %v160_v6 = vld [vmem:[#allocation5 + $0x18] sm:$0xff]  ;;  %vm382_vm4 = vcmask 1045504  }
  0x20   :  { %598 = vst.msk [vmem:[#allocation4 + $0x22] sm:$0x3] %vm148_vm0, %v3260_v0  ;;  %199 = vmatpush.msra.mxu0 %v160_v6  ;;  %v158_v7 = vld [vmem:[#allocation5 + $0x8] sm:$0xff]  ;;  %v163_v8 = vld [vmem:[#allocation5 + $0x30] sm:$0xff]  ;;  %v157_v10 = vld [vmem:[#allocation5] sm:$0xff]  ;;  %vm398_vm5 = vcmask 523264  }
  0x21   :  { %156 = vst.msk [vmem:[#allocation2 + $0x22] sm:$0xf] %vm155_vm1, %v3260_v0  ;;  %v159_v9 = vld [vmem:[#allocation5 + $0x10] sm:$0xff]  ;;  %286 = vmatpush.msra.mxu2 %v161_v2  ;;  %240 = vmatpush.msra.mxu1 %v158_v7  ;;  %v3383_v11 = vld [vmem:[%s4075_s0 + $0x10] sm:$0xff]  ;;  %v3388_v12 = vld [vmem:[%s4075_s0 + $0x18] sm:$0xff]  ;;  %vm404_vm6 = vcmask 523270  }
  0x22   :  { %151 = vst.msk [vmem:[#allocation2 + $0x2] sm:$0xff] %vm150_vm2, %v3369_v4  ;;  %335 = vmatpush.msra.mxu3 %v163_v8  ;;  %200 = vmatpush.msra.mxu0 %v159_v9  ;;  %v422_v29 = vld [vmem:[#allocation7 + $0x78] sm:$0xff]  ;;  %v421_v31 = vld [vmem:[#allocation7 + $0x70] sm:$0xff]  ;;  %v420_v33 = vld [vmem:[#allocation7 + $0x68] sm:$0xff]  ;;  %vm402_vm7 = vcmask 521216   ;;  %s3261_s27 = smov 16  }
  0x23   :  { %152 = vst.msk [vmem:[#allocation2 + $0xa] sm:$0xff] %vm150_vm2, %v3374_v5  ;;  %241 = vmatpush.msra.mxu1 %v157_v10  ;;  %v414_v30 = vld [vmem:[#allocation7 + $0x38] sm:$0xff]  ;;  %v413_v32 = vld [vmem:[#allocation7 + $0x30] sm:$0xff]  ;;  %v412_v34 = vld [vmem:[#allocation7 + $0x28] sm:$0xff]  ;;  %s3262_s1 = smov 112   ;;  %s3264_s19 = smov 80  }
  0x24   :  { %153 = vst.msk [vmem:[#allocation2 + $0x12] sm:$0xff] %vm150_vm2, %v3383_v11  ;;  %459 = vmatpush.msrb.mxu0 %v422_v29  ;;  %v419_v37 = vld [vmem:[#allocation7 + $0x60] sm:$0xff]  ;;  %v430_v39 = vld [vmem:[#allocation7 + $0xb8] sm:$0xff]  ;;  %v429_v40 = vld [vmem:[#allocation7 + $0xb0] sm:$0xff]  ;;  %s3265_s6 = smov 32  }
  0x25   :  { %154 = vst.msk [vmem:[#allocation2 + $0x1a] sm:$0xff] %vm150_vm2, %v3388_v12  ;;  %500 = vmatpush.msrb.mxu1 %v414_v30  ;;  %v411_v38 = vld [vmem:[#allocation7 + $0x20] sm:$0xff]  ;;  %v418_v41 = vld [vmem:[#allocation7 + $0x58] sm:$0xff]  ;;  %545 = vmatpush.msrb.mxu2 %v430_v39  ;;  %v3412_v44 = vld [vmem:[#allocation15] sm:$0xff] }
  0x26   :  { %460 = vmatpush.msrb.mxu0 %v421_v31  ;;  %377 = vst.msk [vmem:[#allocation3] sm:$0x3] %vm376_vm3, %v3260_v0  ;;  %v410_v43 = vld [vmem:[#allocation7 + $0x18] sm:$0xff]  ;;  %v417_v45 = vld [vmem:[#allocation7 + $0x50] sm:$0xff]  ;;  %v428_v49 = vld [vmem:[#allocation7 + $0xa8] sm:$0xff]  ;;  %v3415_v53 = vperm.slane %v3412_v44, 0 }
  0x27   :  { %501 = vmatpush.msrb.mxu1 %v413_v32  ;;  %406 = vst.msk [vmem:[#allocation3 + $0x22] sm:$0x3] %vm376_vm3, %v3260_v0  ;;  %v409_v46 = vld [vmem:[#allocation7 + $0x10] sm:$0xff]  ;;  %546 = vmatpush.msrb.mxu2 %v429_v40  ;;  %v416_v50 = vld [vmem:[#allocation7 + $0x48] sm:$0xff]  ;;  %v427_v56 = vld [vmem:[#allocation7 + $0xa0] sm:$0xff] }
  0x28   :  { %461 = vmatpush.msrb.mxu0 %v420_v33  ;;  %v408_v51 = vld [vmem:[#allocation7 + $0x8] sm:$0xff]  ;;  %v415_v57 = vld [vmem:[#allocation7 + $0x40] sm:$0xff]  ;;  %v426_v60 = vld [vmem:[#allocation7 + $0x98] sm:$0xff] }
  0x29   :  { %v169_v13 = vld [vmem:[#allocation2 + $0x2] sm:$0xff]  ;;  %502 = vmatpush.msrb.mxu1 %v412_v34  ;;  %547 = vmatpush.msrb.mxu2 %v428_v49  ;;  %v407_v58 = vld [vmem:[#allocation7] sm:$0xff] }
  0x2a   :  { %v165_v14 = vld [vmem:[#allocation2] sm:$0xff]  ;;  %2780 = vmatmul.msk.f32.vlgmr.msra.gmra.mxu0 %vm150_vm2, %v169_v13  ;;  %v170_v17 = vld [vmem:[#allocation2 + $0xa] sm:$0xff]  ;;  %v423_v10 = vld [vmem:[#allocation7 + $0x80] sm:$0xff] }
  0x2b   :  { %v255_v15 = vld [vmem:[#allocation2 + $0x4] sm:$0xff]  ;;  %2784 = vmatmul.msk.f32.vlgmr.msra.gmra.mxu1 %vm150_vm2, %v165_v14  ;;  %v256_v19 = vld [vmem:[#allocation2 + $0xc] sm:$0xff]  ;;  %462 = vmatpush.msrb.mxu0 %v419_v37  ;;  %v366_v14 = vperm.slane %v3412_v44, 1 }
  0x2c   :  { %v304_v16 = vld [vmem:[#allocation2 + $0x6] sm:$0xff]  ;;  %2788 = vmatmul.msk.f32.vlgmr.msra.gmra.mxu2 %vm150_vm2, %v255_v15  ;;  %v305_v20 = vld [vmem:[#allocation2 + $0xe] sm:$0xff]  ;;  %v306_v24 = vld [vmem:[#allocation2 + $0x16] sm:$0xff]  ;;  %503 = vmatpush.msrb.mxu1 %v411_v38 }
  0x2d   :  { %2792 = vmatmul.msk.f32.vlgmr.msra.gmra.mxu3 %vm150_vm2, %v304_v16  ;;  %v166_v18 = vld [vmem:[#allocation2 + $0x8] sm:$0xff]  ;;  %v171_v21 = vld [vmem:[#allocation2 + $0x12] sm:$0xff]  ;;  %v172_v25 = vld [vmem:[#allocation2 + $0x1a] sm:$0xff]  ;;  %463 = vmatpush.msrb.mxu0 %v418_v41 }
  0x2e   :  { %v167_v22 = vld [vmem:[#allocation2 + $0x10] sm:$0xff]  ;;  %v168_v26 = vld [vmem:[#allocation2 + $0x18] sm:$0xff]  ;;  %504 = vmatpush.msrb.mxu1 %v410_v43  ;;  %548 = vmatpush.msrb.mxu2 %v427_v56  ;;  %v425_v63 = vld [vmem:[#allocation7 + $0x90] sm:$0xff] }
  0x2f   :  { %v257_v23 = vld [vmem:[#allocation2 + $0x14] sm:$0xff]  ;;  %v258_v27 = vld [vmem:[#allocation2 + $0x1c] sm:$0xff]  ;;  %464 = vmatpush.msrb.mxu0 %v417_v45 }
  0x30   :  { %v307_v28 = vld [vmem:[#allocation2 + $0x1e] sm:$0xff]  ;;  %505 = vmatpush.msrb.mxu1 %v409_v46  ;;  %549 = vmatpush.msrb.mxu2 %v426_v60 }
  0x31   :  { %465 = vmatpush.msrb.mxu0 %v416_v50  ;;  %v424_v6 = vld [vmem:[#allocation7 + $0x88] sm:$0xff] }
  0x32   :  { %2781 = vmatmul.msk.f32.gmra.mxu0 %vm150_vm2, %v170_v17  ;;  %506 = vmatpush.msrb.mxu1 %v408_v51 }
  0x33   :  { %2785 = vmatmul.msk.f32.gmra.mxu1 %vm150_vm2, %v166_v18  ;;  %466 = vmatpush.msrb.mxu0 %v415_v57 }
  0x34   :  { %2789 = vmatmul.msk.f32.gmra.mxu2 %vm150_vm2, %v256_v19  ;;  %507 = vmatpush.msrb.mxu1 %v407_v58  ;;  %v371_v19 = vperm.slane %v3412_v44, 2 }
  0x35   :  { %2793 = vmatmul.msk.f32.gmra.mxu3 %vm150_vm2, %v305_v20  ;;  %550 = vmatpush.msrb.mxu2 %v425_v63 }
  0x37   :  { %551 = vmatpush.msrb.mxu2 %v424_v6 }
  0x39   :  { %552 = vmatpush.msrb.mxu2 %v423_v10  ;;  %v600_v10 = vld [vmem:[#allocation9 + $0x8] sm:$0xff] }
  0x3a   :  { %2782 = vmatmul.msk.f32.gmra.mxu0 %vm150_vm2, %v171_v21 }
  0x3b   :  { %2786 = vmatmul.msk.f32.gmra.mxu1 %vm150_vm2, %v167_v22  ;;  %680 = vmatpush.msra.mxu0 %v600_v10 }
  0x3c   :  { %2790 = vmatmul.msk.f32.gmra.mxu2 %vm150_vm2, %v257_v23 }
  0x3d   :  { %2794 = vmatmul.msk.f32.gmra.mxu3 %vm150_vm2, %v306_v24 }
  0x42   :  { %2783 = vmatmul.msk.f32.gmra.mxu0 %vm150_vm2, %v172_v25 }
  0x43   :  { %2787 = vmatmul.msk.f32.gmra.mxu1 %vm150_vm2, %v168_v26 }
  0x44   :  { %2791 = vmatmul.msk.f32.gmra.mxu2 %vm150_vm2, %v258_v27 }
  0x45   :  { %2795 = vmatmul.msk.f32.gmra.mxu3 %vm150_vm2, %v307_v28 }
  0xa7   :  { %v202_v35 = vpop.f32.mrf.mxu0 }
  0xa8   :  { %v243_v36 = vpop.f32.mrf.mxu1 }
  0xa9   :  { %v244_v42 = vadd.f32 %v243_v36, %v202_v35 }
  0xaf   :  { %v288_v47 = vpop.f32.mrf.mxu2  ;;  %v205_v54 = vpop.f32.mrf.mxu0 }
  0xb0   :  { %v337_v48 = vpop.f32.mrf.mxu3  ;;  %v300_v52 = vadd.f32 %v288_v47, %v244_v42  ;;  %v246_v55 = vpop.f32.mrf.mxu1 }
  0xb1   :  { %v247_v62 = vadd.f32 %v246_v55, %v205_v54 }
  0xb2   :  { %v349_v59 = vadd.f32 %v337_v48, %v300_v52 }
  0xb4   :  { %v354_v61 = vadd.f32 %v3415_v53, %v349_v59 }
  0xb6   :  { %v358_v1 = vmul.f32 0.01, %v354_v61 }
  0xb7   :  { %v291_v2 = vpop.f32.mrf.mxu2  ;;  %v208_v8 = vpop.f32.mrf.mxu0 }
  0xb8   :  { %v340_v3 = vpop.f32.mrf.mxu3  ;;  %v301_v7 = vadd.f32 %v291_v2, %v247_v62  ;;  %v249_v9 = vpop.f32.mrf.mxu1  ;;  %v362_v13 = vmax.f32 %v354_v61, %v358_v1 }
  0xb9   :  { %v250_v17 = vadd.f32 %v249_v9, %v208_v8  ;;  %v602_v9 = vld [vmem:[#allocation9 + $0x18] sm:$0xff] }
  0xba   :  { %v350_v15 = vadd.f32 %v340_v3, %v301_v7  ;;  %v367_v18 = vmul.f32 %v366_v14, %v362_v13  ;;  %639 = vmatpush.msrb.mxu3 %v602_v9  ;;  %v604_v13 = vld [vmem:[#allocation9 + $0x28] sm:$0xff] }
  0xbb   :  { %725 = vmatpush.msra.mxu1 %v604_v13 }
  0xbc   :  { %v355_v16 = vadd.f32 %v3415_v53, %v350_v15  ;;  %v372_v27 = vadd.f32 %v371_v19, %v367_v18  ;;  %v599_v15 = vld [vmem:[#allocation9] sm:$0xff] }
  0xbd   :  { %681 = vmatpush.msra.mxu0 %v599_v15  ;;  %v763_v15 = vld [vmem:[#allocation10] sm:$0xff] }
  0xbe   :  { %v359_v20 = vmul.f32 0.01, %v355_v16  ;;  %v383_v33 = vrot.slane %v372_v27, 2 }
  0xbf   :  { %v294_v21 = vpop.f32.mrf.mxu2  ;;  %v211_v25 = vpop.f32.mrf.mxu0 }
  0xc0   :  { %v343_v22 = vpop.f32.mrf.mxu3  ;;  %v363_v23 = vmax.f32 %v355_v16, %v359_v20  ;;  %v302_v24 = vadd.f32 %v294_v21, %v250_v17  ;;  %v252_v26 = vpop.f32.mrf.mxu1  ;;  %v603_v17 = vld [vmem:[#allocation9 + $0x20] sm:$0xff]  ;;  %v570_v21 = vperm.slane %v3412_v44, 3 }
  0xc1   :  { %v253_v32 = vadd.f32 %v252_v26, %v211_v25  ;;  %726 = vmatpush.msra.mxu1 %v603_v17 }
  0xc2   :  { %v368_v28 = vmul.f32 %v366_v14, %v363_v23  ;;  %v351_v29 = vadd.f32 %v343_v22, %v302_v24 }
  0xc4   :  { %v373_v30 = vadd.f32 %v371_v19, %v368_v28  ;;  %v356_v31 = vadd.f32 %v3415_v53, %v351_v29 }
  0xc6   :  { %v384_v34 = vrot.slane %v373_v30, 2  ;;  %v360_v35 = vmul.f32 0.01, %v356_v31 }
  0xc7   :  { %v297_v36 = vpop.f32.mrf.mxu2 }
  0xc8   :  { %v346_v37 = vpop.f32.mrf.mxu3  ;;  %v385_v38 = vsel %vm382_vm4, %v383_v33, %v384_v34  ;;  %v364_v39 = vmax.f32 %v356_v31, %v360_v35  ;;  %v303_v40 = vadd.f32 %v297_v36, %v253_v32 }
  0xc9   :  { %v394_v41 = vmax.f32 %v372_v27, %v385_v38  ;;  %v583_v27 = vperm.slane %v3412_v44, 4 }
  0xca   :  { %v369_v42 = vmul.f32 %v366_v14, %v364_v39  ;;  %v352_v43 = vadd.f32 %v346_v37, %v303_v40 }
  0xcb   :  { %399 = vst.msk [vmem:[#allocation3 + $0x2] sm:$0xff] %vm398_vm5, %v394_v41 }
  0xcc   :  { %v374_v45 = vadd.f32 %v371_v19, %v369_v42  ;;  %v357_v46 = vadd.f32 %v3415_v53, %v352_v43 }
  0xce   :  { %v386_v47 = vrot.slane %v374_v45, 2  ;;  %v361_v48 = vmul.f32 0.01, %v357_v46 }
  0xd0   :  { %v387_v49 = vsel %vm382_vm4, %v384_v34, %v386_v47  ;;  %v365_v50 = vmax.f32 %v357_v46, %v361_v48 }
  0xd1   :  { %v395_v51 = vmax.f32 %v373_v30, %v387_v49  ;;  %v588_v30 = vperm.slane %v3412_v44, 5 }
  0xd2   :  { %v370_v52 = vmul.f32 %v366_v14, %v365_v50  ;;  %v435_v54 = vld [vmem:[#allocation3 + $0x2] sm:$0xff] }
  0xd3   :  { %v431_v55 = vld [vmem:[#allocation3] sm:$0xff]  ;;  %400 = vst.msk [vmem:[#allocation3 + $0xa] sm:$0xff] %vm398_vm5, %v395_v51  ;;  %2796 = vmatmul.msk.f32.vlgmr.msrb.gmra.mxu0 %vm398_vm5, %v435_v54 }
  0xd4   :  { %2800 = vmatmul.msk.f32.vlgmr.msrb.gmra.mxu1 %vm398_vm5, %v431_v55  ;;  %v375_v56 = vadd.f32 %v371_v19, %v370_v52  ;;  %v601_v14 = vld [vmem:[#allocation9 + $0x10] sm:$0xff]  ;;  %v764_v52 = vld [vmem:[#allocation10 + $0x8] sm:$0xff] }
  0xd5   :  { %640 = vmatpush.msrb.mxu3 %v601_v14  ;;  %792 = vmatpush.msra.mxu2 %v764_v52 }
  0xd6   :  { %v388_v57 = vrot.slane %v375_v56, 2  ;;  %405 = vst.msk [vmem:[#allocation3 + $0x1a] sm:$0xc0] %vm404_vm6, %v375_v56 }
  0xd7   :  { %793 = vmatpush.msra.mxu2 %v763_v15 }
  0xd8   :  { %v389_v53 = vsel %vm382_vm4, %v386_v47, %v388_v57  ;;  %v397_v58 = vmax.f32 %v375_v56, %v388_v57 }
  0xd9   :  { %v396_v59 = vmax.f32 %v374_v45, %v389_v53 }
  0xda   :  { %403 = vst.msk [vmem:[#allocation3 + $0x1a] sm:$0x3f] %vm402_vm7, %v397_v58  ;;  %v436_v60 = vld [vmem:[#allocation3 + $0xa] sm:$0xff] }
  0xdb   :  { %v432_v61 = vld [vmem:[#allocation3 + $0x8] sm:$0xff]  ;;  %401 = vst.msk [vmem:[#allocation3 + $0x12] sm:$0xff] %vm398_vm5, %v396_v59  ;;  %2797 = vmatmul.msk.f32.gmra.mxu0 %vm398_vm5, %v436_v60 }
  0xdc   :  { %v521_v62 = vld [vmem:[#allocation3 + $0x4] sm:$0xff]  ;;  %2801 = vmatmul.msk.f32.gmra.mxu1 %vm398_vm5, %v432_v61 }
  0xdd   :  { %2804 = vmatmul.msk.f32.vlgmr.msrb.gmra.mxu2 %vm398_vm5, %v521_v62 }
  0xe1   :  { %v438_v3 = vld [vmem:[#allocation3 + $0x1a] sm:$0xff] }
  0xe2   :  { %v437_v63 = vld [vmem:[#allocation3 + $0x12] sm:$0xff]  ;;  %v524_v8 = vld [vmem:[#allocation3 + $0x1c] sm:$0xff] }
  0xe3   :  { %v433_v1 = vld [vmem:[#allocation3 + $0x10] sm:$0xff]  ;;  %2798 = vmatmul.msk.f32.gmra.mxu0 %vm398_vm5, %v437_v63  ;;  %v434_v6 = vld [vmem:[#allocation3 + $0x18] sm:$0xff] }
  0xe4   :  { %v522_v2 = vld [vmem:[#allocation3 + $0xc] sm:$0xff]  ;;  %2802 = vmatmul.msk.f32.gmra.mxu1 %vm398_vm5, %v433_v1  ;;  %v523_v7 = vld [vmem:[#allocation3 + $0x14] sm:$0xff] }
  0xe5   :  { %2805 = vmatmul.msk.f32.gmra.mxu2 %vm398_vm5, %v522_v2 }
  0xeb   :  { %2799 = vmatmul.msk.f32.gmra.mxu0 %vm398_vm5, %v438_v3 }
  0xec   :  { %2803 = vmatmul.msk.f32.gmra.mxu1 %vm398_vm5, %v434_v6 }
  0xed   :  { %2806 = vmatmul.msk.f32.gmra.mxu2 %vm398_vm5, %v523_v7 }
  0xf5   :  { %2807 = vmatmul.msk.f32.gmra.mxu2 %vm398_vm5, %v524_v8 }
 0x150   :  { %v468_v16 = vpop.f32.mrf.mxu0 }
 0x151   :  { %v509_v18 = vpop.f32.mrf.mxu1 }
 0x152   :  { %v510_v19 = vadd.f32 %v509_v18, %v468_v16 }
 0x158   :  { %v471_v20 = vpop.f32.mrf.mxu0 }
 0x159   :  { %v512_v22 = vpop.f32.mrf.mxu1 }
 0x15a   :  { %v513_v28 = vadd.f32 %v512_v22, %v471_v20  ;;  %v3461_v20 = vld [vmem:[#allocation15 + $0x8] sm:$0xff] }
 0x160   :  { %v554_v23 = vpop.f32.mrf.mxu2  ;;  %v474_v34 = vpop.f32.mrf.mxu0 }
 0x161   :  { %v566_v24 = vadd.f32 %v554_v23, %v510_v19  ;;  %v515_v35 = vpop.f32.mrf.mxu1  ;;  %v744_v19 = vperm.slane %v3412_v44, 6 }
 0x162   :  { %v516_v39 = vadd.f32 %v515_v35, %v474_v34 }
 0x163   :  { %v571_v25 = vadd.f32 %v570_v21, %v566_v24  ;;  %v749_v24 = vperm.slane %v3412_v44, 7 }
 0x165   :  { %v575_v26 = vmul.f32 0.01, %v571_v25 }
 0x167   :  { %v579_v29 = vmax.f32 %v571_v25, %v575_v26  ;;  %v754_v26 = vperm.slane %v3461_v20, 0 }
 0x168   :  { %v557_v31 = vpop.f32.mrf.mxu2  ;;  %v477_v47 = vpop.f32.mrf.mxu0 }
 0x169   :  { %v584_v32 = vmul.f32 %v583_v27, %v579_v29  ;;  %v567_v33 = vadd.f32 %v557_v31, %v513_v28  ;;  %v518_v48 = vpop.f32.mrf.mxu1  ;;  %v815_v28 = vld [vmem:[%s4080_s5] sm:$0xff] }
 0x16a   :  { %v519_v54 = vadd.f32 %v518_v48, %v477_v47 }
 0x16b   :  { %v589_v36 = vadd.f32 %v588_v30, %v584_v32  ;;  %v572_v37 = vadd.f32 %v570_v21, %v567_v33 }
 0x16d   :  { %594 = vst.msk [vmem:[#allocation4 + $0x2] sm:$0xff] %vm150_vm2, %v589_v36  ;;  %v576_v38 = vmul.f32 0.01, %v572_v37 }
 0x16f   :  { %v580_v40 = vmax.f32 %v572_v37, %v576_v38 }
 0x170   :  { %v560_v41 = vpop.f32.mrf.mxu2 }
 0x171   :  { %v585_v42 = vmul.f32 %v583_v27, %v580_v40  ;;  %v568_v43 = vadd.f32 %v560_v41, %v516_v39 }
 0x173   :  { %v590_v45 = vadd.f32 %v588_v30, %v585_v42  ;;  %v573_v46 = vadd.f32 %v570_v21, %v568_v43 }
 0x174   :  { %v609_v49 = vld [vmem:[#allocation4 + $0x2] sm:$0xff] }
 0x175   :  { %v605_v50 = vld [vmem:[#allocation4] sm:$0xff]  ;;  %595 = vst.msk [vmem:[#allocation4 + $0xa] sm:$0xff] %vm150_vm2, %v590_v45  ;;  %v577_v51 = vmul.f32 0.01, %v573_v46  ;;  %2808 = vmatmul.msk.f32.vlgmr.msrb.gmra.mxu3 %vm150_vm2, %v609_v49 }
 0x176   :  { %2812 = vmatmul.msk.f32.vlgmr.msra.gmra.mxu0 %vm150_vm2, %v605_v50 }
 0x177   :  { %v581_v55 = vmax.f32 %v573_v46, %v577_v51 }
 0x178   :  { %v563_v56 = vpop.f32.mrf.mxu2 }
 0x179   :  { %v586_v57 = vmul.f32 %v583_v27, %v581_v55  ;;  %v569_v53 = vadd.f32 %v563_v56, %v519_v54 }
 0x17b   :  { %v591_v58 = vadd.f32 %v588_v30, %v586_v57  ;;  %v574_v59 = vadd.f32 %v570_v21, %v569_v53 }
 0x17c   :  { %v610_v60 = vld [vmem:[#allocation4 + $0xa] sm:$0xff] }
 0x17d   :  { %v606_v61 = vld [vmem:[#allocation4 + $0x8] sm:$0xff]  ;;  %596 = vst.msk [vmem:[#allocation4 + $0x12] sm:$0xff] %vm150_vm2, %v591_v58  ;;  %v578_v63 = vmul.f32 0.01, %v574_v59  ;;  %2809 = vmatmul.msk.f32.gmra.mxu3 %vm150_vm2, %v610_v60 }
 0x17e   :  { %v695_v62 = vld [vmem:[#allocation4 + $0x4] sm:$0xff]  ;;  %2813 = vmatmul.msk.f32.gmra.mxu0 %vm150_vm2, %v606_v61 }
 0x17f   :  { %2816 = vmatmul.msk.f32.vlgmr.msra.gmra.mxu1 %vm150_vm2, %v695_v62  ;;  %v582_v1 = vmax.f32 %v574_v59, %v578_v63 }
 0x181   :  { %v587_v2 = vmul.f32 %v583_v27, %v582_v1  ;;  %v816_v27 = vld [vmem:[%s4080_s5 + $0x8] sm:$0xff] }
 0x182   :  { %844 = vmatpush.msra.mxu3 %v816_v27 }
 0x183   :  { %v592_v3 = vadd.f32 %v588_v30, %v587_v2 }
 0x184   :  { %v611_v6 = vld [vmem:[#allocation4 + $0x12] sm:$0xff]  ;;  %845 = vmatpush.msra.mxu3 %v815_v28 }
 0x185   :  { %v607_v7 = vld [vmem:[#allocation4 + $0x10] sm:$0xff]  ;;  %597 = vst.msk [vmem:[#allocation4 + $0x1a] sm:$0xff] %vm150_vm2, %v592_v3  ;;  %2810 = vmatmul.msk.f32.gmra.mxu3 %vm150_vm2, %v611_v6 }
 0x186   :  { %v696_v8 = vld [vmem:[#allocation4 + $0xc] sm:$0xff]  ;;  %2814 = vmatmul.msk.f32.gmra.mxu0 %vm150_vm2, %v607_v7 }
 0x187   :  { %2817 = vmatmul.msk.f32.gmra.mxu1 %vm150_vm2, %v696_v8 }
 0x18c   :  { %v612_v9 = vld [vmem:[#allocation4 + $0x1a] sm:$0xff] }
 0x18d   :  { %v608_v10 = vld [vmem:[#allocation4 + $0x18] sm:$0xff]  ;;  %2811 = vmatmul.msk.f32.gmra.mxu3 %vm150_vm2, %v612_v9 }
 0x18e   :  { %v697_v13 = vld [vmem:[#allocation4 + $0x14] sm:$0xff]  ;;  %2815 = vmatmul.msk.f32.gmra.mxu0 %vm150_vm2, %v608_v10  ;;  %v698_v14 = vld [vmem:[#allocation4 + $0x1c] sm:$0xff]  ;;  %v817_v10 = vperm.slane %v3461_v20, 2 }
 0x18f   :  { %2818 = vmatmul.msk.f32.gmra.mxu1 %vm150_vm2, %v697_v13 }
 0x197   :  { %2819 = vmatmul.msk.f32.gmra.mxu1 %vm150_vm2, %v698_v14 }
 0x1f3   :  { %v683_v16 = vpop.f32.mrf.mxu0 }
 0x1f8   :  { %v642_v17 = vpop.f32.mrf.mxu3 }
 0x1f9   :  { %v684_v18 = vadd.f32 %v683_v16, %v642_v17 }
 0x1fb   :  { %v686_v22 = vpop.f32.mrf.mxu0 }
 0x1fc   :  { %v728_v21 = vpop.f32.mrf.mxu1 }
 0x1fd   :  { %v740_v23 = vadd.f32 %v728_v21, %v684_v18 }
 0x1ff   :  { %v745_v25 = vadd.f32 %v744_v19, %v740_v23 }
 0x200   :  { %v645_v30 = vpop.f32.mrf.mxu3 }
 0x201   :  { %v750_v29 = vmul.f32 %v749_v24, %v745_v25  ;;  %v687_v31 = vadd.f32 %v686_v22, %v645_v30 }
 0x203   :  { %v755_v32 = vadd.f32 %v754_v26, %v750_v29  ;;  %v689_v35 = vpop.f32.mrf.mxu0 }
 0x204   :  { %v731_v33 = vpop.f32.mrf.mxu1 }
 0x205   :  { %v759_v44 = vadd.f32 %v755_v32, %v3369_v4  ;;  %v741_v34 = vadd.f32 %v731_v33, %v687_v31 }
 0x207   :  { %v746_v36 = vadd.f32 %v744_v19, %v741_v34  ;;  %2820 = vmatmul.msk.f32.vlgmr.msra.gmra.mxu2 %vm150_vm2, %v759_v44 }
 0x208   :  { %v648_v38 = vpop.f32.mrf.mxu3 }
 0x209   :  { %v751_v37 = vmul.f32 %v749_v24, %v746_v36  ;;  %v690_v39 = vadd.f32 %v689_v35, %v648_v38 }
 0x20b   :  { %v756_v40 = vadd.f32 %v754_v26, %v751_v37  ;;  %v692_v46 = vpop.f32.mrf.mxu0 }
 0x20c   :  { %v734_v41 = vpop.f32.mrf.mxu1 }
 0x20d   :  { %v742_v42 = vadd.f32 %v734_v41, %v690_v39  ;;  %v760_v43 = vadd.f32 %v756_v40, %v3374_v5  ;;  %v765_v5 = vperm.slane %v3461_v20, 1 }
 0x20f   :  { %v747_v45 = vadd.f32 %v744_v19, %v742_v42  ;;  %2821 = vmatmul.msk.f32.gmra.mxu2 %vm150_vm2, %v760_v43 }
 0x210   :  { %v651_v48 = vpop.f32.mrf.mxu3 }
 0x211   :  { %v752_v47 = vmul.f32 %v749_v24, %v747_v45  ;;  %v693_v4 = vadd.f32 %v692_v46, %v651_v48 }
 0x213   :  { %v757_v49 = vadd.f32 %v754_v26, %v752_v47 }
 0x214   :  { %v737_v50 = vpop.f32.mrf.mxu1 }
 0x215   :  { %v743_v51 = vadd.f32 %v737_v50, %v693_v4  ;;  %v761_v52 = vadd.f32 %v757_v49, %v3383_v11 }
 0x217   :  { %v748_v54 = vadd.f32 %v744_v19, %v743_v51  ;;  %2822 = vmatmul.msk.f32.gmra.mxu2 %vm150_vm2, %v761_v52 }
 0x219   :  { %v753_v55 = vmul.f32 %v749_v24, %v748_v54 }
 0x21b   :  { %v758_v56 = vadd.f32 %v754_v26, %v753_v55 }
 0x21d   :  { %v762_v57 = vadd.f32 %v758_v56, %v3388_v12 }
 0x21f   :  { %2823 = vmatmul.msk.f32.gmra.mxu2 %vm150_vm2, %v762_v57 }
 0x28a   :  { %v795_v53 = vpop.f32.mrf.mxu2 }
 0x28b   :  { %v796_v58 = vadd.f32 %v795_v53, %v765_v5 }
 0x28d   :  { %v807_v59 = vmul.f32 0.01, %v796_v58 }
 0x28f   :  { %v811_v60 = vmax.f32 %v796_v58, %v807_v59 }
 0x291   :  { %2824 = vmatmul.msk.f32.vlgmr.msra.gmra.mxu3 %vm150_vm2, %v811_v60 }
 0x292   :  { %v798_v61 = vpop.f32.mrf.mxu2 }
 0x293   :  { %v799_v62 = vadd.f32 %v798_v61, %v765_v5  ;;  %v2833_v61 = vld [vmem:[%s4080_s5 + $0x18] sm:$0xff] }
 0x294   :  { %1025 = vmatpush.msrb.mxu0 %v2833_v61 }
 0x295   :  { %v808_v11 = vmul.f32 0.01, %v799_v62 }
 0x297   :  { %v812_v63 = vmax.f32 %v799_v62, %v808_v11  ;;  %v2832_v62 = vld [vmem:[%s4080_s5 + $0x10] sm:$0xff] }
 0x298   :  { %1026 = vmatpush.msrb.mxu0 %v2832_v62 }
 0x299   :  { %2825 = vmatmul.msk.f32.gmra.mxu3 %vm150_vm2, %v812_v63 }
 0x29a   :  { %v801_v1 = vpop.f32.mrf.mxu2 }
 0x29b   :  { %v802_v2 = vadd.f32 %v801_v1, %v765_v5 }
 0x29d   :  { %v809_v3 = vmul.f32 0.01, %v802_v2 }
 0x29f   :  { %v813_v12 = vmax.f32 %v802_v2, %v809_v3 }
 0x2a1   :  { %2826 = vmatmul.msk.f32.gmra.mxu3 %vm150_vm2, %v813_v12 }
 0x2a2   :  { %v804_v6 = vpop.f32.mrf.mxu2 }
 0x2a3   :  { %v805_v7 = vadd.f32 %v804_v6, %v765_v5 }
 0x2a5   :  { %v810_v8 = vmul.f32 0.01, %v805_v7 }
 0x2a7   :  { %v814_v9 = vmax.f32 %v805_v7, %v810_v8 }
 0x2a9   :  { %2827 = vmatmul.msk.f32.gmra.mxu3 %vm150_vm2, %v814_v9 }
 0x314   :  { %v847_v13 = vpop.f32.mrf.mxu3 }
 0x315   :  { %v848_v14 = vadd.f32 %v847_v13, %v817_v10 }
 0x317   :  { %v859_v15 = vmul.f32 0.01, %v848_v14  ;;  %v2828_v31 = vmul.f32 -1.442695, %v848_v14 }
 0x319   :  { %v863_v16 = vmax.f32 %v848_v14, %v859_v15 }
 0x31b   :  { %947 = vrot.lane.b32.xlu0 %v863_v16, %s3261_s27 }
 0x31c   :  { %v850_v17 = vpop.f32.mrf.mxu3 }
 0x31d   :  { %v851_v18 = vadd.f32 %v850_v17, %v817_v10 }
 0x31f   :  { %v860_v19 = vmul.f32 0.01, %v851_v18  ;;  %v2829_v44 = vmul.f32 -1.442695, %v851_v18 }
 0x321   :  { %v864_v21 = vmax.f32 %v851_v18, %v860_v19 }
 0x323   :  { %949 = vrot.lane.b32.xlu1 %v864_v21, %s3261_s27  ;;  %967 = vrot.lane.b32.xlu0 %v811_v60, %s3261_s27 }
 0x324   :  { %v853_v22 = vpop.f32.mrf.mxu3 }
 0x325   :  { %v854_v23 = vadd.f32 %v853_v22, %v817_v10 }
 0x327   :  { %v861_v24 = vmul.f32 0.01, %v854_v23  ;;  %v2830_v30 = vmul.f32 -1.442695, %v854_v23 }
 0x329   :  { %v865_v25 = vmax.f32 %v854_v23, %v861_v24  ;;  %2914 = vpow2.f32 %v2830_v30 }
 0x32a   :  { %2916 = vpow2.f32 %v2828_v31 }
 0x32b   :  { %951 = vrot.lane.b32.xlu2 %v865_v25, %s3261_s27  ;;  %969 = vrot.lane.b32.xlu1 %v812_v63, %s3261_s27 }
 0x32c   :  { %v856_v26 = vpop.f32.mrf.mxu3 }
 0x32d   :  { %v857_v27 = vadd.f32 %v856_v26, %v817_v10 }
 0x32f   :  { %v862_v28 = vmul.f32 0.01, %v857_v27  ;;  %v2915_v32 = vpop.eup %2914  ;;  %v2831_v37 = vmul.f32 -1.442695, %v857_v27 }
 0x330   :  { %v881_v33 = vadd.f32 1.0, %v2915_v32  ;;  %v2917_v34 = vpop.eup %2916 }
 0x331   :  { %v866_v29 = vmax.f32 %v857_v27, %v862_v28  ;;  %v879_v35 = vadd.f32 1.0, %v2917_v34 }
 0x332   :  { %2918 = vrcp.f32 %v881_v33  ;;  %v924_v50 = vand.u32 2147483648, %v881_v33  ;;  %vm918_vm9 = vweird.f32 %v881_v33  ;;  %v922_v51 = vand.u32 2147483647, %v881_v33 }
 0x333   :  { %971 = vrot.lane.b32.xlu2 %v813_v12, %s3261_s27  ;;  %973 = vrot.lane.b32.xlu1 %v814_v9, %s3261_s27  ;;  %2920 = vpow2.f32 %v2829_v44  ;;  %vm888_vm13 = vweird.f32 %v879_v35  ;;  %v894_v60 = vand.u32 2147483648, %v879_v35  ;;  %v892_v63 = vand.u32 2147483647, %v879_v35 }
 0x334   :  { %953 = vrot.lane.b32.xlu0 %v866_v29, %s3261_s27  ;;  %2922 = vrcp.f32 %v879_v35  ;;  %v925_v57 = vor.u32 1.1754944e-38, %v924_v50  ;;  %vm923_vm11 = vcmp.eq.f32.partialorder %v922_v51, 8.507059e+37 }
 0x335   :  { %2924 = vpow2.f32 %v2831_v37  ;;  %v895_v9 = vor.u32 1.1754944e-38, %v894_v60  ;;  %vm893_vm15 = vcmp.eq.f32.partialorder %v892_v63, 8.507059e+37 }
 0x338   :  { %v2919_v36 = vpop.eup %2918 }
 0x339   :  { %v2921_v38 = vpop.eup %2920  ;;  %v914_v39 = vmul.f32 %v2919_v36, %v881_v33  ;;  %vm919_vm8 = vweird.f32 %v2919_v36 }
 0x33a   :  { %v3493_v40 = vadd.f32 1.0, %v2921_v38  ;;  %v2923_v41 = vpop.eup %2922  ;;  %vm920_vm10 = vmor %vm918_vm9, %vm919_vm8 }
 0x33b   :  { %v915_v42 = vsub.f32 1.0, %v914_v39  ;;  %v884_v43 = vmul.f32 %v2923_v41, %v879_v35  ;;  %v2925_v45 = vpop.eup %2924  ;;  %vm889_vm12 = vweird.f32 %v2923_v41 }
 0x33c   :  { %2926 = vrcp.f32 %v3493_v40  ;;  %v3496_v47 = vadd.f32 1.0, %v2925_v45  ;;  %vm890_vm14 = vmor %vm888_vm13, %vm889_vm12  ;;  %v909_v16 = vand.u32 2147483648, %v3493_v40  ;;  %vm903_vm3 = vweird.f32 %v3493_v40 }
 0x33d   :  { %v916_v46 = vmul.f32 %v2919_v36, %v915_v42  ;;  %v885_v48 = vsub.f32 1.0, %v884_v43  ;;  %v907_v17 = vand.u32 2147483647, %v3493_v40 }
 0x33e   :  { %2928 = vrcp.f32 %v3496_v47  ;;  %v910_v26 = vor.u32 1.1754944e-38, %v909_v16  ;;  %v939_v30 = vand.u32 2147483648, %v3496_v47  ;;  %vm933_vm7 = vweird.f32 %v3496_v47 }
 0x33f   :  { %v917_v4 = vadd.f32 %v2919_v36, %v916_v46  ;;  %v886_v54 = vmul.f32 %v2923_v41, %v885_v48  ;;  %vm908_vm5 = vcmp.eq.f32.partialorder %v907_v17, 8.507059e+37  ;;  %v937_v32 = vand.u32 2147483647, %v3496_v47 }
 0x341   :  { %v921_v55 = vsel %vm920_vm10, %v2919_v36, %v917_v4  ;;  %v887_v53 = vadd.f32 %v2923_v41, %v886_v54  ;;  %v940_v36 = vor.u32 1.1754944e-38, %v939_v30  ;;  %vm938_vm9 = vcmp.eq.f32.partialorder %v937_v32, 8.507059e+37 }
 0x342   :  { %v2927_v49 = vpop.eup %2926  ;;  %v926_v5 = vsel %vm923_vm11, %v925_v57, %v921_v55 }
 0x343   :  { %v899_v56 = vmul.f32 %v2927_v49, %v3493_v40  ;;  %v965_v11 = vsub.f32 1.0, %v926_v5  ;;  %v891_v2 = vsel %vm890_vm14, %v2923_v41, %v887_v53  ;;  %vm904_vm1 = vweird.f32 %v2927_v49 }
 0x344   :  { %v2929_v59 = vpop.eup %2928  ;;  %v896_v13 = vsel %vm893_vm15, %v895_v9, %v891_v2  ;;  %vm905_vm4 = vmor %vm903_vm3, %vm904_vm1 }
 0x345   :  { %v900_v58 = vsub.f32 1.0, %v899_v56  ;;  %v929_v8 = vmul.f32 %v2929_v59, %v3496_v47  ;;  %v963_v18 = vsub.f32 1.0, %v896_v13  ;;  %vm934_vm6 = vweird.f32 %v2929_v59 }
 0x346   :  { %vm935_vm8 = vmor %vm933_vm7, %vm934_vm6 }
 0x347   :  { %v901_v7 = vmul.f32 %v2927_v49, %v900_v58  ;;  %v930_v15 = vsub.f32 1.0, %v929_v8 }
 0x349   :  { %v902_v14 = vadd.f32 %v2927_v49, %v901_v7  ;;  %v931_v25 = vmul.f32 %v2929_v59, %v930_v15 }
 0x34b   :  { %v906_v23 = vsel %vm905_vm4, %v2927_v49, %v902_v14  ;;  %v932_v29 = vadd.f32 %v2929_v59, %v931_v25  ;;  %v990_v49 = vperm.slane %v3461_v20, 3 }
 0x34c   :  { %v911_v28 = vsel %vm908_vm5, %v910_v26, %v906_v23 }
 0x34d   :  { %v964_v31 = vsub.f32 1.0, %v911_v28  ;;  %v936_v35 = vsel %vm935_vm8, %v2929_v59, %v932_v29 }
 0x34e   :  { %v941_v38 = vsel %vm938_vm9, %v940_v36, %v936_v35 }
 0x34f   :  { %v966_v39 = vsub.f32 1.0, %v941_v38 }
 0x385   :  { %v952_v52 = vpop.permute.xlu2 %951 }
 0x386   :  { %v961_v12 = vmul.f32 %v952_v52, %v926_v5 }
 0x38d   :  { %v972_v1 = vpop.permute.xlu2 %971  ;;  %v948_v3 = vpop.permute.xlu0 %947 }
 0x38e   :  { %v981_v6 = vmul.f32 %v972_v1, %v965_v11  ;;  %v959_v22 = vmul.f32 %v948_v3, %v896_v13 }
 0x390   :  { %v3507_v10 = vadd.f32 %v981_v6, %v961_v12 }
 0x392   :  { %999 = vrot.lane.b32.xlu1 %v3507_v10, %s3262_s1 }
 0x395   :  { %v950_v19 = vpop.permute.xlu1 %949  ;;  %v968_v21 = vpop.permute.xlu0 %967 }
 0x396   :  { %v979_v24 = vmul.f32 %v968_v21, %v963_v18  ;;  %v960_v44 = vmul.f32 %v950_v19, %v911_v28 }
 0x398   :  { %v3514_v27 = vadd.f32 %v979_v24, %v959_v22 }
 0x39a   :  { %995 = vrot.lane.b32.xlu2 %v3514_v27, %s3262_s1 }
 0x39d   :  { %v970_v33 = vpop.permute.xlu1 %969 }
 0x39e   :  { %v980_v34 = vmul.f32 %v970_v33, %v964_v31 }
 0x3a0   :  { %v3521_v37 = vadd.f32 %v980_v34, %v960_v44 }
 0x3a2   :  { %997 = vrot.lane.b32.xlu0 %v3521_v37, %s3262_s1 }
 0x3a5   :  { %v974_v40 = vpop.permute.xlu1 %973 }
 0x3a6   :  { %v982_v41 = vmul.f32 %v974_v40, %v966_v39  ;;  %v954_v42 = vpop.permute.xlu0 %953 }
 0x3a7   :  { %v962_v43 = vmul.f32 %v954_v42, %v941_v38 }
 0x3a9   :  { %v3525_v45 = vadd.f32 %v982_v41, %v962_v43 }
 0x3ab   :  { %1001 = vrot.lane.b32.xlu2 %v3525_v45, %s3262_s1 }
 0x3f4   :  { %v996_v46 = vpop.permute.xlu2 %995 }
 0x3f5   :  { %2834 = vmatmul.msk.f32.vlgmr.msrb.gmra.mxu0 %vm150_vm2, %v996_v46 }
 0x404   :  { %v1000_v48 = vpop.permute.xlu1 %999 }
 0x405   :  { %v1002_v4 = vpop.permute.xlu2 %1001 }
 0x414   :  { %v998_v47 = vpop.permute.xlu0 %997 }
 0x415   :  { %2835 = vmatmul.msk.f32.gmra.mxu0 %vm150_vm2, %v998_v47 }
 0x41d   :  { %2836 = vmatmul.msk.f32.gmra.mxu0 %vm150_vm2, %v1000_v48 }
 0x425   :  { %2837 = vmatmul.msk.f32.gmra.mxu0 %vm150_vm2, %v1002_v4 }
 0x472   :  { %v1028_v50 = vpop.f32.mrf.mxu0 }
 0x473   :  { %v1029_v51 = vadd.f32 %v1028_v50, %v990_v49 }
 0x475   :  { %v1040_v52 = vmul.f32 0.01, %v1029_v51  ;;  %v2838_v1 = vmul.f32 -1.442695, %v1029_v51 }
 0x477   :  { %v1044_v54 = vmax.f32 %v1029_v51, %v1040_v52  ;;  %2930 = vpow2.f32 %v2838_v1 }
 0x479   :  { %1128 = vrot.lane.b32.xlu0 %v1044_v54, %s3261_s27 }
 0x47d   :  { %v2931_v2 = vpop.eup %2930 }
 0x47e   :  { %v1060_v3 = vadd.f32 1.0, %v2931_v2 }
 0x480   :  { %2932 = vrcp.f32 %v1060_v3  ;;  %v1075_v18 = vand.u32 2147483648, %v1060_v3  ;;  %vm1069_vm11 = vweird.f32 %v1060_v3  ;;  %v1073_v19 = vand.u32 2147483647, %v1060_v3 }
 0x482   :  { %v1076_v24 = vor.u32 1.1754944e-38, %v1075_v18  ;;  %vm1074_vm13 = vcmp.eq.f32.partialorder %v1073_v19, 8.507059e+37 }
 0x486   :  { %v2933_v6 = vpop.eup %2932 }
 0x487   :  { %v1065_v8 = vmul.f32 %v2933_v6, %v1060_v3  ;;  %vm1070_vm10 = vweird.f32 %v2933_v6 }
 0x488   :  { %vm1071_vm12 = vmor %vm1069_vm11, %vm1070_vm10 }
 0x489   :  { %v1066_v13 = vsub.f32 1.0, %v1065_v8 }
 0x48b   :  { %v1067_v15 = vmul.f32 %v2933_v6, %v1066_v13 }
 0x48d   :  { %v1068_v16 = vadd.f32 %v2933_v6, %v1067_v15 }
 0x48f   :  { %v1072_v22 = vsel %vm1071_vm12, %v2933_v6, %v1068_v16 }
 0x490   :  { %v1077_v26 = vsel %vm1074_vm13, %v1076_v24, %v1072_v22 }
 0x491   :  { %v1144_v30 = vsub.f32 1.0, %v1077_v26 }
 0x492   :  { %v1031_v55 = vpop.f32.mrf.mxu0 }
 0x493   :  { %v1032_v56 = vadd.f32 %v1031_v55, %v990_v49  ;;  %v1148_v33 = vmul.f32 %v1144_v30, %v3514_v27 }
 0x495   :  { %v1041_v57 = vmul.f32 0.01, %v1032_v56  ;;  %v2839_v14 = vmul.f32 -1.442695, %v1032_v56 }
 0x497   :  { %v1045_v5 = vmax.f32 %v1032_v56, %v1041_v57 }
 0x499   :  { %1130 = vrot.lane.b32.xlu1 %v1045_v5, %s3261_s27  ;;  %v2843_v5 = vld [vmem:[%s4080_s5 + $0x28] sm:$0xff] }
 0x49a   :  { %v1034_v53 = vpop.f32.mrf.mxu0  ;;  %1194 = vmatpush.msrb.mxu1 %v2843_v5 }
 0x49b   :  { %v1035_v58 = vadd.f32 %v1034_v53, %v990_v49 }
 0x49d   :  { %v1042_v59 = vmul.f32 0.01, %v1035_v58  ;;  %v2840_v12 = vmul.f32 -1.442695, %v1035_v58 }
 0x49f   :  { %v1046_v60 = vmax.f32 %v1035_v58, %v1042_v59  ;;  %2934 = vpow2.f32 %v2840_v12 }
 0x4a1   :  { %1132 = vrot.lane.b32.xlu2 %v1046_v60, %s3261_s27 }
 0x4a2   :  { %v1037_v61 = vpop.f32.mrf.mxu0 }
 0x4a3   :  { %v1038_v62 = vadd.f32 %v1037_v61, %v990_v49 }
 0x4a5   :  { %v1043_v11 = vmul.f32 0.01, %v1038_v62  ;;  %v2935_v7 = vpop.eup %2934  ;;  %v2841_v29 = vmul.f32 -1.442695, %v1038_v62 }
 0x4a6   :  { %v1062_v9 = vadd.f32 1.0, %v2935_v7 }
 0x4a7   :  { %v1047_v63 = vmax.f32 %v1038_v62, %v1043_v11 }
 0x4a8   :  { %2936 = vrcp.f32 %v1062_v9  ;;  %v1105_v38 = vand.u32 2147483648, %v1062_v9  ;;  %vm1099_vm15 = vweird.f32 %v1062_v9  ;;  %v1103_v39 = vand.u32 2147483647, %v1062_v9 }
 0x4a9   :  { %1134 = vrot.lane.b32.xlu0 %v1047_v63, %s3261_s27  ;;  %2938 = vpow2.f32 %v2839_v14 }
 0x4aa   :  { %v1106_v43 = vor.u32 1.1754944e-38, %v1105_v38  ;;  %vm1104_vm3 = vcmp.eq.f32.partialorder %v1103_v39, 8.507059e+37 }
 0x4ae   :  { %v2937_v17 = vpop.eup %2936 }
 0x4af   :  { %v2939_v21 = vpop.eup %2938  ;;  %v1095_v23 = vmul.f32 %v2937_v17, %v1062_v9  ;;  %vm1100_vm14 = vweird.f32 %v2937_v17 }
 0x4b0   :  { %v1061_v25 = vadd.f32 1.0, %v2939_v21  ;;  %vm1101_vm1 = vmor %vm1099_vm15, %vm1100_vm14 }
 0x4b1   :  { %v1096_v28 = vsub.f32 1.0, %v1095_v23 }
 0x4b2   :  { %2940 = vrcp.f32 %v1061_v25  ;;  %v1090_v56 = vand.u32 2147483648, %v1061_v25  ;;  %vm1084_vm5 = vweird.f32 %v1061_v25  ;;  %v1088_v57 = vand.u32 2147483647, %v1061_v25 }
 0x4b3   :  { %v1097_v31 = vmul.f32 %v2937_v17, %v1096_v28  ;;  %2942 = vpow2.f32 %v2841_v29 }
 0x4b4   :  { %v1091_v59 = vor.u32 1.1754944e-38, %v1090_v56  ;;  %vm1089_vm7 = vcmp.eq.f32.partialorder %v1088_v57, 8.507059e+37 }
 0x4b5   :  { %v1098_v35 = vadd.f32 %v2937_v17, %v1097_v31 }
 0x4b7   :  { %v1102_v41 = vsel %vm1101_vm1, %v2937_v17, %v1098_v35 }
 0x4b8   :  { %v2941_v36 = vpop.eup %2940  ;;  %v1107_v27 = vsel %vm1104_vm3, %v1106_v43, %v1102_v41 }
 0x4b9   :  { %v2943_v40 = vpop.eup %2942  ;;  %v1080_v42 = vmul.f32 %v2941_v36, %v1061_v25  ;;  %v1146_v48 = vsub.f32 1.0, %v1107_v27  ;;  %vm1085_vm4 = vweird.f32 %v2941_v36 }
 0x4ba   :  { %v1063_v46 = vadd.f32 1.0, %v2943_v40  ;;  %vm1086_vm6 = vmor %vm1084_vm5, %vm1085_vm4 }
 0x4bb   :  { %v1081_v47 = vsub.f32 1.0, %v1080_v42  ;;  %v1150_v50 = vmul.f32 %v1146_v48, %v3507_v10  ;;  %v2842_v10 = vld [vmem:[%s4080_s5 + $0x20] sm:$0xff] }
 0x4bc   :  { %2944 = vrcp.f32 %v1063_v46  ;;  %1195 = vmatpush.msrb.mxu1 %v2842_v10  ;;  %v1120_v6 = vand.u32 2147483648, %v1063_v46  ;;  %vm1114_vm9 = vweird.f32 %v1063_v46  ;;  %v1118_v7 = vand.u32 2147483647, %v1063_v46 }
 0x4bd   :  { %v1082_v4 = vmul.f32 %v2941_v36, %v1081_v47 }
 0x4be   :  { %v1121_v9 = vor.u32 1.1754944e-38, %v1120_v6  ;;  %vm1119_vm11 = vcmp.eq.f32.partialorder %v1118_v7, 8.507059e+37 }
 0x4bf   :  { %v1083_v54 = vadd.f32 %v2941_v36, %v1082_v4 }
 0x4c1   :  { %v1087_v53 = vsel %vm1086_vm6, %v2941_v36, %v1083_v54 }
 0x4c2   :  { %v2945_v55 = vpop.eup %2944  ;;  %v1092_v60 = vsel %vm1089_vm7, %v1091_v59, %v1087_v53 }
 0x4c3   :  { %v1110_v58 = vmul.f32 %v2945_v55, %v1063_v46  ;;  %v1145_v62 = vsub.f32 1.0, %v1092_v60  ;;  %vm1115_vm8 = vweird.f32 %v2945_v55 }
 0x4c4   :  { %vm1116_vm10 = vmor %vm1114_vm9, %vm1115_vm8 }
 0x4c5   :  { %v1111_v61 = vsub.f32 1.0, %v1110_v58  ;;  %v1149_v1 = vmul.f32 %v1145_v62, %v3521_v37 }
 0x4c7   :  { %v1112_v11 = vmul.f32 %v2945_v55, %v1111_v61 }
 0x4c9   :  { %v1113_v12 = vadd.f32 %v2945_v55, %v1112_v11 }
 0x4cb   :  { %v1117_v8 = vsel %vm1116_vm10, %v2945_v55, %v1113_v12 }
 0x4cc   :  { %v1122_v13 = vsel %vm1119_vm11, %v1121_v9, %v1117_v8 }
 0x4cd   :  { %v1147_v14 = vsub.f32 1.0, %v1122_v13 }
 0x4cf   :  { %v1151_v37 = vmul.f32 %v1147_v14, %v3525_v45  ;;  %v1159_v45 = vperm.slane %v3461_v20, 4 }
 0x4eb   :  { %v1129_v32 = vpop.permute.xlu0 %1128 }
 0x4ec   :  { %v1140_v44 = vmul.f32 %v1129_v32, %v1077_v26 }
 0x4ee   :  { %v3539_v34 = vadd.f32 %v1148_v33, %v1140_v44 }
 0x4f0   :  { %1164 = vrot.lane.b32.xlu1 %v3539_v34, %s3262_s1 }
 0x4fb   :  { %v1133_v49 = vpop.permute.xlu2 %1132 }
 0x4fc   :  { %v1142_v51 = vmul.f32 %v1133_v49, %v1107_v27 }
 0x4fe   :  { %v3544_v52 = vadd.f32 %v1150_v50, %v1142_v51 }
 0x500   :  { %1168 = vrot.lane.b32.xlu0 %v3544_v52, %s3262_s1 }
 0x50b   :  { %v1131_v63 = vpop.permute.xlu1 %1130 }
 0x50c   :  { %v1141_v2 = vmul.f32 %v1131_v63, %v1092_v60 }
 0x50e   :  { %v3555_v3 = vadd.f32 %v1149_v1, %v1141_v2 }
 0x510   :  { %1166 = vrot.lane.b32.xlu2 %v3555_v3, %s3262_s1 }
 0x51b   :  { %v1135_v15 = vpop.permute.xlu0 %1134 }
 0x51c   :  { %v1143_v16 = vmul.f32 %v1135_v15, %v1122_v13 }
 0x51e   :  { %v3560_v17 = vadd.f32 %v1151_v37, %v1143_v16 }
 0x520   :  { %1170 = vrot.lane.b32.xlu1 %v3560_v17, %s3262_s1 }
 0x562   :  { %v1165_v18 = vpop.permute.xlu1 %1164 }
 0x563   :  { %2844 = vmatmul.msk.f32.vlgmr.msrb.gmra.mxu1 %vm150_vm2, %v1165_v18  ;;  %v2853_v18 = vld [vmem:[%s4080_s5 + $0x38] sm:$0xff] }
 0x564   :  { %1363 = vmatpush.msrb.mxu2 %v2853_v18 }
 0x56a   :  { %v1167_v19 = vpop.permute.xlu2 %1166 }
 0x56b   :  { %2845 = vmatmul.msk.f32.gmra.mxu1 %vm150_vm2, %v1167_v19  ;;  %v2852_v19 = vld [vmem:[%s4080_s5 + $0x30] sm:$0xff]  ;;  %s3263_s5 = smov 96  }
 0x56c   :  { %1364 = vmatpush.msrb.mxu2 %v2852_v19 }
 0x572   :  { %v1169_v21 = vpop.permute.xlu0 %1168 }
 0x573   :  { %2846 = vmatmul.msk.f32.gmra.mxu1 %vm150_vm2, %v1169_v21 }
 0x592   :  { %v1171_v22 = vpop.permute.xlu1 %1170 }
 0x593   :  { %2847 = vmatmul.msk.f32.gmra.mxu1 %vm150_vm2, %v1171_v22 }
 0x5e0   :  { %v1197_v23 = vpop.f32.mrf.mxu1 }
 0x5e1   :  { %v1198_v24 = vadd.f32 %v1197_v23, %v1159_v45 }
 0x5e3   :  { %v1209_v25 = vmul.f32 0.01, %v1198_v24  ;;  %v2848_v36 = vmul.f32 -1.442695, %v1198_v24 }
 0x5e5   :  { %v1213_v26 = vmax.f32 %v1198_v24, %v1209_v25  ;;  %2946 = vpow2.f32 %v2848_v36 }
 0x5e7   :  { %1297 = vrot.lane.b32.xlu2 %v1213_v26, %s3261_s27 }
 0x5e8   :  { %v1200_v28 = vpop.f32.mrf.mxu1 }
 0x5e9   :  { %v1201_v29 = vadd.f32 %v1200_v28, %v1159_v45 }
 0x5eb   :  { %v1210_v30 = vmul.f32 0.01, %v1201_v29  ;;  %v2947_v42 = vpop.eup %2946  ;;  %v2849_v48 = vmul.f32 -1.442695, %v1201_v29 }
 0x5ec   :  { %v1229_v43 = vadd.f32 1.0, %v2947_v42 }
 0x5ed   :  { %v1214_v31 = vmax.f32 %v1201_v29, %v1210_v30 }
 0x5ee   :  { %2948 = vrcp.f32 %v1229_v43  ;;  %v1244_v50 = vand.u32 2147483648, %v1229_v43  ;;  %vm1238_vm13 = vweird.f32 %v1229_v43  ;;  %v1242_v54 = vand.u32 2147483647, %v1229_v43 }
 0x5ef   :  { %1299 = vrot.lane.b32.xlu0 %v1214_v31, %s3261_s27  ;;  %2950 = vpow2.f32 %v2849_v48 }
 0x5f0   :  { %v1203_v32 = vpop.f32.mrf.mxu1  ;;  %v1245_v57 = vor.u32 1.1754944e-38, %v1244_v50  ;;  %vm1243_vm15 = vcmp.eq.f32.partialorder %v1242_v54, 8.507059e+37 }
 0x5f1   :  { %v1204_v33 = vadd.f32 %v1203_v32, %v1159_v45 }
 0x5f3   :  { %v1211_v44 = vmul.f32 0.01, %v1204_v33  ;;  %v2850_v51 = vmul.f32 -1.442695, %v1204_v33 }
 0x5f4   :  { %v2949_v46 = vpop.eup %2948 }
 0x5f5   :  { %v1215_v35 = vmax.f32 %v1204_v33, %v1211_v44  ;;  %v1234_v27 = vmul.f32 %v2949_v46, %v1229_v43  ;;  %vm1239_vm12 = vweird.f32 %v2949_v46  ;;  %v2951_v55 = vpop.eup %2950  ;;  %2952 = vpow2.f32 %v2850_v51 }
 0x5f6   :  { %vm1240_vm14 = vmor %vm1238_vm13, %vm1239_vm12  ;;  %v1230_v5 = vadd.f32 1.0, %v2951_v55 }
 0x5f7   :  { %1301 = vrot.lane.b32.xlu1 %v1215_v35, %s3261_s27  ;;  %v1235_v47 = vsub.f32 1.0, %v1234_v27 }
 0x5f8   :  { %2954 = vrcp.f32 %v1230_v5  ;;  %v1259_v37 = vand.u32 2147483648, %v1230_v5  ;;  %vm1253_vm3 = vweird.f32 %v1230_v5  ;;  %v1257_v16 = vand.u32 2147483647, %v1230_v5 }
 0x5f9   :  { %v1236_v4 = vmul.f32 %v2949_v46, %v1235_v47 }
 0x5fa   :  { %v1260_v23 = vor.u32 1.1754944e-38, %v1259_v37  ;;  %vm1258_vm5 = vcmp.eq.f32.partialorder %v1257_v16, 8.507059e+37 }
 0x5fb   :  { %v1237_v49 = vadd.f32 %v2949_v46, %v1236_v4  ;;  %v2953_v59 = vpop.eup %2952 }
 0x5fc   :  { %v1231_v11 = vadd.f32 1.0, %v2953_v59 }
 0x5fd   :  { %v1241_v56 = vsel %vm1240_vm14, %v2949_v46, %v1237_v49 }
 0x5fe   :  { %v1246_v10 = vsel %vm1243_vm15, %v1245_v57, %v1241_v56  ;;  %v2955_v1 = vpop.eup %2954  ;;  %v1274_v28 = vand.u32 2147483648, %v1231_v11  ;;  %vm1268_vm7 = vweird.f32 %v1231_v11  ;;  %v1272_v30 = vand.u32 2147483647, %v1231_v11 }
 0x5ff   :  { %v1313_v58 = vsub.f32 1.0, %v1246_v10  ;;  %v1249_v12 = vmul.f32 %v2955_v1, %v1230_v5  ;;  %vm1254_vm1 = vweird.f32 %v2955_v1 }
 0x600   :  { %vm1255_vm4 = vmor %vm1253_vm3, %vm1254_vm1  ;;  %v1275_v44 = vor.u32 1.1754944e-38, %v1274_v28  ;;  %vm1273_vm9 = vcmp.eq.f32.partialorder %v1272_v30, 8.507059e+37 }
 0x601   :  { %v1317_v61 = vmul.f32 %v1313_v58, %v3539_v34  ;;  %v1250_v7 = vsub.f32 1.0, %v1249_v12 }
 0x603   :  { %v1251_v9 = vmul.f32 %v2955_v1, %v1250_v7 }
 0x605   :  { %v1252_v14 = vadd.f32 %v2955_v1, %v1251_v9 }
 0x607   :  { %v1256_v21 = vsel %vm1255_vm4, %v2955_v1, %v1252_v14 }
 0x608   :  { %v1261_v24 = vsel %vm1258_vm5, %v1260_v23, %v1256_v21 }
 0x609   :  { %v1314_v29 = vsub.f32 1.0, %v1261_v24 }
 0x60b   :  { %v1318_v35 = vmul.f32 %v1314_v29, %v3555_v3 }
 0x610   :  { %v1206_v38 = vpop.f32.mrf.mxu1 }
 0x611   :  { %v1207_v39 = vadd.f32 %v1206_v38, %v1159_v45 }
 0x613   :  { %v1212_v40 = vmul.f32 0.01, %v1207_v39  ;;  %v2851_v53 = vmul.f32 -1.442695, %v1207_v39 }
 0x615   :  { %v1216_v41 = vmax.f32 %v1207_v39, %v1212_v40  ;;  %2956 = vpow2.f32 %v2851_v53 }
 0x616   :  { %2958 = vrcp.f32 %v1231_v11 }
 0x617   :  { %1303 = vrot.lane.b32.xlu2 %v1216_v41, %s3261_s27 }
 0x61b   :  { %v2957_v2 = vpop.eup %2956 }
 0x61c   :  { %v1232_v6 = vadd.f32 1.0, %v2957_v2  ;;  %v2959_v8 = vpop.eup %2958 }
 0x61d   :  { %v1264_v13 = vmul.f32 %v2959_v8, %v1231_v11  ;;  %vm1269_vm6 = vweird.f32 %v2959_v8 }
 0x61e   :  { %2960 = vrcp.f32 %v1232_v6  ;;  %vm1270_vm8 = vmor %vm1268_vm7, %vm1269_vm6  ;;  %v1289_v41 = vand.u32 2147483648, %v1232_v6  ;;  %vm1283_vm11 = vweird.f32 %v1232_v6  ;;  %v1287_v43 = vand.u32 2147483647, %v1232_v6 }
 0x61f   :  { %v1265_v34 = vsub.f32 1.0, %v1264_v13 }
 0x620   :  { %v1290_v47 = vor.u32 1.1754944e-38, %v1289_v41  ;;  %vm1288_vm13 = vcmp.eq.f32.partialorder %v1287_v43, 8.507059e+37 }
 0x621   :  { %v1266_v22 = vmul.f32 %v2959_v8, %v1265_v34 }
 0x623   :  { %v1267_v25 = vadd.f32 %v2959_v8, %v1266_v22 }
 0x624   :  { %v2961_v15 = vpop.eup %2960 }
 0x625   :  { %v1279_v45 = vmul.f32 %v2961_v15, %v1232_v6  ;;  %v1271_v31 = vsel %vm1270_vm8, %v2959_v8, %v1267_v25  ;;  %vm1284_vm10 = vweird.f32 %v2961_v15 }
 0x626   :  { %v1276_v38 = vsel %vm1273_vm9, %v1275_v44, %v1271_v31  ;;  %vm1285_vm12 = vmor %vm1283_vm11, %vm1284_vm10 }
 0x627   :  { %v1280_v26 = vsub.f32 1.0, %v1279_v45  ;;  %v1315_v42 = vsub.f32 1.0, %v1276_v38 }
 0x629   :  { %v1281_v32 = vmul.f32 %v2961_v15, %v1280_v26  ;;  %v1319_v3 = vmul.f32 %v1315_v42, %v3544_v52 }
 0x62b   :  { %v1282_v40 = vadd.f32 %v2961_v15, %v1281_v32 }
 0x62d   :  { %v1286_v46 = vsel %vm1285_vm12, %v2961_v15, %v1282_v40 }
 0x62e   :  { %v1291_v4 = vsel %vm1288_vm13, %v1290_v47, %v1286_v46 }
 0x62f   :  { %v1316_v50 = vsub.f32 1.0, %v1291_v4 }
 0x631   :  { %v1320_v54 = vmul.f32 %v1316_v50, %v3560_v17  ;;  %v1328_v17 = vperm.slane %v3461_v20, 5 }
 0x641   :  { %v1298_v60 = vpop.permute.xlu2 %1297 }
 0x642   :  { %v1309_v62 = vmul.f32 %v1298_v60, %v1246_v10 }
 0x644   :  { %v3574_v63 = vadd.f32 %v1317_v61, %v1309_v62 }
 0x646   :  { %1333 = vrot.lane.b32.xlu0 %v3574_v63, %s3262_s1 }
 0x661   :  { %v1300_v33 = vpop.permute.xlu0 %1299 }
 0x662   :  { %v1310_v36 = vmul.f32 %v1300_v33, %v1261_v24 }
 0x664   :  { %v3585_v39 = vadd.f32 %v1318_v35, %v1310_v36 }
 0x666   :  { %1335 = vrot.lane.b32.xlu1 %v3585_v39, %s3262_s1 }
 0x669   :  { %v1302_v27 = vpop.permute.xlu1 %1301 }
 0x66a   :  { %v1311_v48 = vmul.f32 %v1302_v27, %v1276_v38 }
 0x66c   :  { %v3590_v49 = vadd.f32 %v1319_v3, %v1311_v48 }
 0x66e   :  { %1337 = vrot.lane.b32.xlu2 %v3590_v49, %s3262_s1 }
 0x671   :  { %v1304_v51 = vpop.permute.xlu2 %1303 }
 0x672   :  { %v1312_v55 = vmul.f32 %v1304_v51, %v1291_v4 }
 0x674   :  { %v3595_v56 = vadd.f32 %v1320_v54, %v1312_v55 }
 0x676   :  { %1339 = vrot.lane.b32.xlu0 %v3595_v56, %s3262_s1 }
 0x6b8   :  { %v1334_v57 = vpop.permute.xlu0 %1333 }
 0x6b9   :  { %2854 = vmatmul.msk.f32.vlgmr.msrb.gmra.mxu2 %vm150_vm2, %v1334_v57 }
 0x6c8   :  { %v1338_v5 = vpop.permute.xlu2 %1337 }
 0x6d8   :  { %v1336_v52 = vpop.permute.xlu1 %1335 }
 0x6d9   :  { %2855 = vmatmul.msk.f32.gmra.mxu2 %vm150_vm2, %v1336_v52 }
 0x6e1   :  { %2856 = vmatmul.msk.f32.gmra.mxu2 %vm150_vm2, %v1338_v5 }
 0x6e8   :  { %v1340_v10 = vpop.permute.xlu0 %1339 }
 0x6e9   :  { %2857 = vmatmul.msk.f32.gmra.mxu2 %vm150_vm2, %v1340_v10 }
 0x73c   :  { %v1366_v53 = vpop.f32.mrf.mxu2 }
 0x73d   :  { %v1367_v58 = vadd.f32 %v1366_v53, %v1328_v17 }
 0x73f   :  { %v1378_v59 = vmul.f32 0.01, %v1367_v58  ;;  %v2858_v14 = vmul.f32 -1.442695, %v1367_v58 }
 0x741   :  { %v1382_v60 = vmax.f32 %v1367_v58, %v1378_v59  ;;  %2962 = vpow2.f32 %v2858_v14  ;;  %v1495_v59 = vld [vmem:[#allocation12 + $0x8] sm:$0xff] }
 0x742   :  { %1531 = vmatpush.msrb.mxu3 %v1495_v59 }
 0x743   :  { %1466 = vrot.lane.b32.xlu1 %v1382_v60, %s3261_s27  ;;  %v1494_v60 = vld [vmem:[#allocation12] sm:$0xff] }
 0x744   :  { %1532 = vmatpush.msrb.mxu3 %v1494_v60 }
 0x747   :  { %v2963_v15 = vpop.eup %2962 }
 0x748   :  { %v1398_v37 = vadd.f32 1.0, %v2963_v15 }
 0x74a   :  { %v1413_v28 = vand.u32 2147483648, %v1398_v37  ;;  %vm1407_vm15 = vweird.f32 %v1398_v37  ;;  %v1411_v30 = vand.u32 2147483647, %v1398_v37 }
 0x74c   :  { %v1414_v33 = vor.u32 1.1754944e-38, %v1413_v28  ;;  %vm1412_vm3 = vcmp.eq.f32.partialorder %v1411_v30, 8.507059e+37  ;;  %v3624_v30 = vld [vmem:[#allocation13 + $0x8] sm:$0xff] }
 0x75c   :  { %v1369_v61 = vpop.f32.mrf.mxu2 }
 0x75d   :  { %v1370_v62 = vadd.f32 %v1369_v61, %v1328_v17 }
 0x75f   :  { %v1379_v11 = vmul.f32 0.01, %v1370_v62  ;;  %v2859_v34 = vmul.f32 -1.442695, %v1370_v62 }
 0x761   :  { %v1383_v1 = vmax.f32 %v1370_v62, %v1379_v11  ;;  %2964 = vpow2.f32 %v2859_v34 }
 0x762   :  { %2966 = vrcp.f32 %v1398_v37 }
 0x763   :  { %1468 = vrot.lane.b32.xlu2 %v1383_v1, %s3261_s27 }
 0x764   :  { %v1372_v2 = vpop.f32.mrf.mxu2 }
 0x765   :  { %v1373_v12 = vadd.f32 %v1372_v2, %v1328_v17 }
 0x767   :  { %v1380_v6 = vmul.f32 0.01, %v1373_v12  ;;  %v2965_v16 = vpop.eup %2964  ;;  %v2860_v29 = vmul.f32 -1.442695, %v1373_v12 }
 0x768   :  { %v1399_v18 = vadd.f32 1.0, %v2965_v16  ;;  %v2967_v19 = vpop.eup %2966 }
 0x769   :  { %v1384_v7 = vmax.f32 %v1373_v12, %v1380_v6  ;;  %v1403_v21 = vmul.f32 %v2967_v19, %v1398_v37  ;;  %vm1408_vm14 = vweird.f32 %v2967_v19 }
 0x76a   :  { %2968 = vrcp.f32 %v1399_v18  ;;  %vm1409_vm1 = vmor %vm1407_vm15, %vm1408_vm14  ;;  %v1428_v36 = vand.u32 2147483648, %v1399_v18  ;;  %vm1422_vm5 = vweird.f32 %v1399_v18  ;;  %v1426_v41 = vand.u32 2147483647, %v1399_v18 }
 0x76b   :  { %1470 = vrot.lane.b32.xlu0 %v1384_v7, %s3261_s27  ;;  %v1404_v22 = vsub.f32 1.0, %v1403_v21  ;;  %2970 = vpow2.f32 %v2860_v29  ;;  %v3620_v29 = vld [vmem:[#allocation13 + $0x10] sm:$0xff] }
 0x76c   :  { %v1375_v8 = vpop.f32.mrf.mxu2  ;;  %v1429_v27 = vor.u32 1.1754944e-38, %v1428_v36  ;;  %vm1427_vm7 = vcmp.eq.f32.partialorder %v1426_v41, 8.507059e+37 }
 0x76d   :  { %v1376_v20 = vadd.f32 %v1375_v8, %v1328_v17  ;;  %v1405_v23 = vmul.f32 %v2967_v19, %v1404_v22 }
 0x76f   :  { %v1381_v9 = vmul.f32 0.01, %v1376_v20  ;;  %v1406_v25 = vadd.f32 %v2967_v19, %v1405_v23  ;;  %v2861_v38 = vmul.f32 -1.442695, %v1376_v20 }
 0x770   :  { %v2969_v45 = vpop.eup %2968 }
 0x771   :  { %v1385_v13 = vmax.f32 %v1376_v20, %v1381_v9  ;;  %v1418_v24 = vmul.f32 %v2969_v45, %v1399_v18  ;;  %v1410_v31 = vsel %vm1409_vm1, %v2967_v19, %v1406_v25  ;;  %vm1423_vm4 = vweird.f32 %v2969_v45  ;;  %v2971_v42 = vpop.eup %2970 }
 0x772   :  { %v1415_v44 = vsel %vm1412_vm3, %v1414_v33, %v1410_v31  ;;  %vm1424_vm6 = vmor %vm1422_vm5, %vm1423_vm4  ;;  %2972 = vpow2.f32 %v2861_v38  ;;  %v1400_v48 = vadd.f32 1.0, %v2971_v42  ;;  %v3074_v33 = vld [vmem:[#allocation15 + $0x8] sm:$0xff]  ;;  %vm1552_vm1 = vcmask 1041408  }
 0x773   :  { %1472 = vrot.lane.b32.xlu1 %v1385_v13, %s3261_s27  ;;  %v1419_v26 = vsub.f32 1.0, %v1418_v24  ;;  %v1482_v40 = vsub.f32 1.0, %v1415_v44 }
 0x774   :  { %2974 = vrcp.f32 %v1400_v48  ;;  %vm1437_vm9 = vweird.f32 %v1400_v48  ;;  %v1441_v2 = vand.u32 2147483647, %v1400_v48 }
 0x775   :  { %v1420_v32 = vmul.f32 %v2969_v45, %v1419_v26  ;;  %v1486_v47 = vmul.f32 %v1482_v40, %v3574_v63 }
 0x776   :  { %vm1442_vm11 = vcmp.eq.f32.partialorder %v1441_v2, 8.507059e+37 }
 0x777   :  { %v1421_v35 = vadd.f32 %v2969_v45, %v1420_v32 }
 0x778   :  { %v2973_v54 = vpop.eup %2972 }
 0x779   :  { %v1425_v43 = vsel %vm1424_vm6, %v2969_v45, %v1421_v35  ;;  %v1401_v5 = vadd.f32 1.0, %v2973_v54  ;;  %v2913_v35 = vld [vmem:[#allocation15 + $0x10] ss:$0 sm:$0xff] }
 0x77a   :  { %v1430_v4 = vsel %vm1427_vm7, %v1429_v27, %v1425_v43  ;;  %v2975_v17 = vpop.eup %2974  ;;  %vm1636_vm7 = vcmask 257154  }
 0x77b   :  { %v1483_v51 = vsub.f32 1.0, %v1430_v4  ;;  %2976 = vrcp.f32 %v1401_v5  ;;  %v1433_v63 = vmul.f32 %v2975_v17, %v1400_v48  ;;  %vm1438_vm8 = vweird.f32 %v2975_v17 }
 0x77c   :  { %vm1439_vm10 = vmor %vm1437_vm9, %vm1438_vm8  ;;  %v1458_v9 = vand.u32 2147483648, %v1401_v5  ;;  %vm1452_vm13 = vweird.f32 %v1401_v5  ;;  %v1456_v14 = vand.u32 2147483647, %v1401_v5  ;;  %vm1566_vm8 = vcmask 261120  }
 0x77d   :  { %v1487_v57 = vmul.f32 %v1483_v51, %v3585_v39  ;;  %v1434_v53 = vsub.f32 1.0, %v1433_v63  ;;  %v1443_v39 = vand.u32 2147483648, %v1400_v48 }
 0x77e   :  { %v1459_v37 = vor.u32 1.1754944e-38, %v1458_v9  ;;  %vm1457_vm15 = vcmp.eq.f32.partialorder %v1456_v14, 8.507059e+37 }
 0x77f   :  { %v1435_v61 = vmul.f32 %v2975_v17, %v1434_v53  ;;  %v1444_v7 = vor.u32 1.1754944e-38, %v1443_v39 }
 0x781   :  { %v2977_v58 = vpop.eup %2976  ;;  %v1436_v11 = vadd.f32 %v2975_v17, %v1435_v61 }
 0x782   :  { %v1448_v62 = vmul.f32 %v2977_v58, %v1401_v5  ;;  %vm1453_vm12 = vweird.f32 %v2977_v58 }
 0x783   :  { %v1440_v12 = vsel %vm1439_vm10, %v2975_v17, %v1436_v11  ;;  %vm1454_vm14 = vmor %vm1452_vm13, %vm1453_vm12 }
 0x784   :  { %v1449_v1 = vsub.f32 1.0, %v1448_v62  ;;  %v1445_v8 = vsel %vm1442_vm11, %v1444_v7, %v1440_v12 }
 0x785   :  { %v1484_v13 = vsub.f32 1.0, %v1445_v8 }
 0x786   :  { %v1450_v6 = vmul.f32 %v2977_v58, %v1449_v1 }
 0x787   :  { %v1488_v16 = vmul.f32 %v1484_v13, %v3590_v49  ;;  %v3618_v49 = vld [vmem:[#allocation13 + $0x18] sm:$0xff]  ;;  %v3266_v13 = vmov 1.0  }
 0x788   :  { %v1451_v20 = vadd.f32 %v2977_v58, %v1450_v6  ;;  %1582 = vmatpush.msra.mxu0 %v3618_v49  ;;  %1661 = vmatpush.msra.mxu1 %v3618_v49  ;;  %v1555_v14 = vsel %vm150_vm2, 0.0, %v3266_v13 }
 0x789   :  { %1737 = vmatpush.msra.mxu2 %v3618_v49  ;;  %1814 = vmatpush.msra.mxu3 %v3618_v49 }
 0x78a   :  { %v1455_v34 = vsel %vm1454_vm14, %v2977_v58, %v1451_v20  ;;  %1583 = vmatpush.msra.mxu0 %v3620_v29  ;;  %1662 = vmatpush.msra.mxu1 %v3620_v29 }
 0x78b   :  { %v1460_v19 = vsel %vm1457_vm15, %v1459_v37, %v1455_v34  ;;  %1738 = vmatpush.msra.mxu2 %v3620_v29  ;;  %1815 = vmatpush.msra.mxu3 %v3620_v29  ;;  %v1557_v34 = vrot.slane %v1555_v14, 6 }
 0x78c   :  { %v1485_v22 = vsub.f32 1.0, %v1460_v19  ;;  %1584 = vmatpush.msra.mxu0 %v3624_v30  ;;  %1663 = vmatpush.msra.mxu1 %v3624_v30 }
 0x78d   :  { %1739 = vmatpush.msra.mxu2 %v3624_v30  ;;  %1816 = vmatpush.msra.mxu3 %v3624_v30 }
 0x78e   :  { %v1489_v23 = vmul.f32 %v1485_v22, %v3595_v56  ;;  %v3630_v56 = vld [vmem:[#allocation13] sm:$0xff] }
 0x78f   :  { %1585 = vmatpush.msra.mxu0 %v3630_v56  ;;  %1664 = vmatpush.msra.mxu1 %v3630_v56 }
 0x790   :  { %1586 = vmatmul.f32.vlgmr.msra.gmra.mxu0 %v3260_v0  ;;  %1740 = vmatpush.msra.mxu2 %v3630_v56 }
 0x791   :  { %1817 = vmatpush.msra.mxu3 %v3630_v56  ;;  %1890 = vmatpush.msrb.mxu0 %v3618_v49 }
 0x792   :  { %1968 = vmatpush.msrb.mxu1 %v3618_v49  ;;  %2044 = vmatpush.msrb.mxu2 %v3618_v49 }
 0x793   :  { %1891 = vmatpush.msrb.mxu0 %v3620_v29 }
 0x794   :  { %1969 = vmatpush.msrb.mxu1 %v3620_v29  ;;  %2045 = vmatpush.msrb.mxu2 %v3620_v29 }
 0x795   :  { %1892 = vmatpush.msrb.mxu0 %v3624_v30 }
 0x796   :  { %1970 = vmatpush.msrb.mxu1 %v3624_v30  ;;  %2046 = vmatpush.msrb.mxu2 %v3624_v30 }
 0x797   :  { %1893 = vmatpush.msrb.mxu0 %v3630_v56 }
 0x798   :  { %1971 = vmatpush.msrb.mxu1 %v3630_v56  ;;  %2047 = vmatpush.msrb.mxu2 %v3630_v56 }
 0x799   :  { %2195 = vmatpush.msra.mxu0 %v3618_v49 }
 0x79b   :  { %2196 = vmatpush.msra.mxu0 %v3620_v29 }
 0x79d   :  { %2197 = vmatpush.msra.mxu0 %v3624_v30 }
 0x79f   :  { %2198 = vmatpush.msra.mxu0 %v3630_v56 }
 0x7b5   :  { %v1467_v46 = vpop.permute.xlu1 %1466 }
 0x7b6   :  { %v1478_v3 = vmul.f32 %v1467_v46, %v1415_v44  ;;  %v1550_v44 = vperm.slane %v3074_v33, 7  ;;  %v3674_v46 = vperm.slane %v3074_v33, 6 }
 0x7b8   :  { %v1490_v50 = vadd.f32 %v1486_v47, %v1478_v3  ;;  %v3666_v36 = vsel %vm1552_vm1, %v1550_v44, %v2913_v35 }
 0x7ba   :  { %1501 = vrot.lane.b32.xlu2 %v1490_v50, %s3262_s1 }
 0x7bd   :  { %v1469_v55 = vpop.permute.xlu2 %1468 }
 0x7be   :  { %v1479_v52 = vmul.f32 %v1469_v55, %v1430_v4 }
 0x7c0   :  { %v1491_v10 = vadd.f32 %v1487_v57, %v1479_v52 }
 0x7c2   :  { %1503 = vrot.lane.b32.xlu0 %v1491_v10, %s3262_s1 }
 0x7dd   :  { %v1471_v15 = vpop.permute.xlu0 %1470 }
 0x7de   :  { %v1480_v18 = vmul.f32 %v1471_v15, %v1445_v8  ;;  %v1554_v15 = vsel %vm150_vm2, 1.0, %v3260_v0 }
 0x7df   :  { %v3703_v37 = vsel %vm1552_vm1, %v1554_v15, %v1557_v34 }
 0x7e0   :  { %v1492_v21 = vadd.f32 %v1488_v16, %v1480_v18 }
 0x7e2   :  { %1505 = vrot.lane.b32.xlu1 %v1492_v21, %s3262_s1 }
 0x7e5   :  { %v1473_v45 = vpop.permute.xlu1 %1472 }
 0x7e6   :  { %v1481_v24 = vmul.f32 %v1473_v45, %v1460_v19 }
 0x7e8   :  { %v1493_v25 = vadd.f32 %v1489_v23, %v1481_v24 }
 0x7ea   :  { %1507 = vrot.lane.b32.xlu2 %v1493_v25, %s3262_s1 }
 0x80d   :  { %v1587_v38 = vpop.f32.mrf.mxu0 }
 0x80e   :  { %v1588_v40 = vadd.f32 %v1587_v38, %v3666_v36 }
 0x810   :  { %1611 = vrot.lane.b32.xlu1 %v1588_v40, %s3263_s5 }
 0x814   :  { %v1502_v26 = vpop.permute.xlu2 %1501 }
 0x815   :  { %2862 = vmatmul.msk.f32.vlgmr.msrb.gmra.mxu3 %vm150_vm2, %v1502_v26 }
 0x816   :  { %2121 = vmatpush.msrb.mxu3 %v3618_v49 }
 0x818   :  { %2122 = vmatpush.msrb.mxu3 %v3620_v29 }
 0x81a   :  { %2123 = vmatpush.msrb.mxu3 %v3624_v30 }
 0x81c   :  { %2124 = vmatpush.msrb.mxu3 %v3630_v56 }
 0x834   :  { %v1504_v28 = vpop.permute.xlu0 %1503 }
 0x835   :  { %2863 = vmatmul.msk.f32.gmra.mxu3 %vm150_vm2, %v1504_v28 }
 0x844   :  { %v1508_v32 = vpop.permute.xlu2 %1507 }
 0x854   :  { %v1506_v31 = vpop.permute.xlu1 %1505 }
 0x855   :  { %2864 = vmatmul.msk.f32.gmra.mxu3 %vm150_vm2, %v1506_v31 }
 0x85d   :  { %2865 = vmatmul.msk.f32.gmra.mxu3 %vm150_vm2, %v1508_v32 }
 0x882   :  { %v1612_v59 = vpop.permute.xlu1 %1611 }
 0x898   :  { %v1534_v41 = vpop.f32.mrf.mxu3 }
 0x899   :  { %v3684_v48 = vadd.f32 %v1534_v41, %v3674_v46 }
 0x89b   :  { %v1639_v45 = vrot.slane %v3684_v48, 2 }
 0x8b8   :  { %v3670_v42 = vpop.f32.mrf.mxu3 }
 0x8d8   :  { %v3672_v43 = vpop.f32.mrf.mxu3 }
 0x8e0   :  { %v1543_v27 = vpop.f32.mrf.mxu3 }
 0x8e1   :  { %v3677_v47 = vadd.f32 %v1543_v27, %v3674_v46 }
 0x8e3   :  { %v1561_v3 = vrot.slane %v3677_v47, 4  ;;  %v1641_v1 = vrot.slane %v3677_v47, 2 }
 0x8e5   :  { %1562 = vrot.lane.b32.xlu0 %v1561_v3, %s3264_s19 }
 0x957   :  { %v1563_v4 = vpop.permute.xlu0 %1562 }
 0x958   :  { %v1565_v50 = vsel %vm1552_vm1, %v3684_v48, %v1563_v4 }
 0x959   :  { %v1590_v51 = vadd.f32 %v1588_v40, %v1565_v50 }
 0x95b   :  { %v2866_v54 = vmul.f32 -1.442695, %v1590_v51 }
 0x95d   :  { %2978 = vpow2.f32 %v2866_v54 }
 0x963   :  { %v2979_v55 = vpop.eup %2978 }
 0x964   :  { %v1594_v57 = vadd.f32 1.0, %v2979_v55 }
 0x966   :  { %2980 = vrcp.f32 %v1594_v57  ;;  %v1606_v17 = vand.u32 2147483648, %v1594_v57  ;;  %v1604_v53 = vand.u32 2147483647, %v1594_v57  ;;  %vm1600_vm4 = vweird.f32 %v1594_v57 }
 0x968   :  { %v1607_v60 = vor.u32 1.1754944e-38, %v1606_v17  ;;  %vm1605_vm6 = vcmp.eq.f32.partialorder %v1604_v53, 8.507059e+37 }
 0x96c   :  { %v2981_v52 = vpop.eup %2980 }
 0x96d   :  { %v1596_v5 = vmul.f32 %v2981_v52, %v1594_v57  ;;  %vm1601_vm3 = vweird.f32 %v2981_v52 }
 0x96e   :  { %vm1602_vm5 = vmor %vm1600_vm4, %vm1601_vm3 }
 0x96f   :  { %v1597_v10 = vsub.f32 1.0, %v1596_v5 }
 0x971   :  { %v1598_v63 = vmul.f32 %v2981_v52, %v1597_v10 }
 0x973   :  { %v1599_v58 = vadd.f32 %v2981_v52, %v1598_v63 }
 0x975   :  { %v1603_v61 = vsel %vm1602_vm5, %v2981_v52, %v1599_v58 }
 0x976   :  { %v1608_v62 = vsel %vm1605_vm6, %v1607_v60, %v1603_v61 }
 0x977   :  { %v1614_v11 = vmul.f32 %v1612_v59, %v1608_v62  ;;  %v1621_v6 = vsub.f32 1.0, %v1608_v62  ;;  %v1627_v8 = vmul.f32 0.0, %v1608_v62 }
 0x979   :  { %1616 = vrot.lane.b32.xlu2 %v1614_v11, %s3265_s6  ;;  %v1716_v11 = vrot.slane %v3684_v48, 4 }
 0x981   :  { %1642 = vrot.lane.b32.xlu2 %v1641_v1, %s3264_s19 }
 0x9d3   :  { %v1617_v39 = vpop.permute.xlu2 %1616 }
 0x9d4   :  { %v1619_v2 = vadd.f32 %v1617_v39, %v1565_v50 }
 0x9d6   :  { %2982 = vtanh.f32 %v1619_v2 }
 0x9db   :  { %v1643_v22 = vpop.permute.xlu2 %1642 }
 0x9dc   :  { %v2983_v12 = vpop.eup %2982  ;;  %v1645_v23 = vsel %vm1552_vm1, %v1639_v45, %v1643_v22  ;;  %v1794_v22 = vrot.slane %v3677_v47, 6 }
 0x9dd   :  { %1623 = vrot.lane.b32.xlu0 %v2983_v12, %s3262_s1 }
 0xa4f   :  { %v1624_v7 = vpop.permute.xlu0 %1623 }
 0xa50   :  { %v1626_v20 = vmul.f32 %v1624_v7, %v1621_v6 }
 0xa52   :  { %v1628_v9 = vadd.f32 %v1627_v8, %v1626_v20 }
 0xa54   :  { %1630 = vrot.lane.b32.xlu1 %v1628_v9, %s3262_s1  ;;  %1637 = vst.msk [vmem:[%s4084_s9 + $0x1c] sm:$0xc] %vm1636_vm7, %v1628_v9 }
 0xac6   :  { %v1631_v16 = vpop.permute.xlu1 %1630 }
 0xac7   :  { %v1633_v18 = vsel %vm150_vm2, %v1631_v16, %v1628_v9  ;;  %1635 = vst.msk [vmem:[%s4084_s9] sm:$0x3] %vm148_vm0, %v1631_v16 }
 0xac8   :  { %v1634_v19 = vmul.f32 %v1633_v18, %v3703_v37 }
 0xaca   :  { %2867 = vmatmul.msk.f32.vlgmr.msra.gmra.mxu1 %vm1566_vm8, %v1634_v19 }
 0xacb   :  { %2270 = vmatpush.msra.mxu1 %v3618_v49 }
 0xacd   :  { %2271 = vmatpush.msra.mxu1 %v3620_v29 }
 0xacf   :  { %2272 = vmatpush.msra.mxu1 %v3624_v30 }
 0xad1   :  { %2273 = vmatpush.msra.mxu1 %v3630_v56 }
 0xb47   :  { %v1666_v0 = vpop.f32.mrf.mxu1 }
 0xb48   :  { %v1667_v21 = vadd.f32 %v1666_v0, %v3666_v36 }
 0xb4a   :  { %1690 = vrot.lane.b32.xlu0 %v1667_v21, %s3263_s5  ;;  %v1669_v24 = vadd.f32 %v1667_v21, %v1645_v23 }
 0xb4c   :  { %v2868_v25 = vmul.f32 -1.442695, %v1669_v24 }
 0xb4e   :  { %2984 = vpow2.f32 %v2868_v25 }
 0xb54   :  { %v2985_v26 = vpop.eup %2984 }
 0xb55   :  { %v1673_v28 = vadd.f32 1.0, %v2985_v26 }
 0xb57   :  { %2986 = vrcp.f32 %v1673_v28  ;;  %v1685_v38 = vand.u32 2147483648, %v1673_v28  ;;  %vm1679_vm10 = vweird.f32 %v1673_v28  ;;  %v1683_v40 = vand.u32 2147483647, %v1673_v28 }
 0xb59   :  { %v1686_v27 = vor.u32 1.1754944e-38, %v1685_v38  ;;  %vm1684_vm12 = vcmp.eq.f32.partialorder %v1683_v40, 8.507059e+37 }
 0xb5d   :  { %v2987_v31 = vpop.eup %2986 }
 0xb5e   :  { %v1675_v32 = vmul.f32 %v2987_v31, %v1673_v28  ;;  %vm1680_vm9 = vweird.f32 %v2987_v31 }
 0xb5f   :  { %vm1681_vm11 = vmor %vm1679_vm10, %vm1680_vm9 }
 0xb60   :  { %v1676_v33 = vsub.f32 1.0, %v1675_v32 }
 0xb62   :  { %v1677_v44 = vmul.f32 %v2987_v31, %v1676_v33 }
 0xb64   :  { %v1678_v35 = vadd.f32 %v2987_v31, %v1677_v44 }
 0xb66   :  { %v1682_v41 = vsel %vm1681_vm11, %v2987_v31, %v1678_v35 }
 0xb67   :  { %v1687_v50 = vsel %vm1684_vm12, %v1686_v27, %v1682_v41 }
 0xb68   :  { %v1700_v52 = vsub.f32 1.0, %v1687_v50  ;;  %v1706_v10 = vmul.f32 %v1687_v50, %v1628_v9 }
 0xbbc   :  { %v1691_v4 = vpop.permute.xlu0 %1690 }
 0xbbd   :  { %v1693_v51 = vmul.f32 %v1691_v4, %v1687_v50  ;;  %v1792_v4 = vrot.slane %v3684_v48, 6 }
 0xbbf   :  { %1695 = vrot.lane.b32.xlu1 %v1693_v51, %s3265_s6 }
 0xbc7   :  { %1718 = vrot.lane.b32.xlu1 %v3677_v47, %s3264_s19 }
 0xc31   :  { %v1696_v54 = vpop.permute.xlu1 %1695 }
 0xc32   :  { %v1698_v55 = vadd.f32 %v1696_v54, %v1645_v23 }
 0xc34   :  { %2988 = vtanh.f32 %v1698_v55 }
 0xc39   :  { %v1719_v62 = vpop.permute.xlu1 %1718 }
 0xc3a   :  { %v2989_v57 = vpop.eup %2988  ;;  %v1721_v39 = vsel %vm1552_vm1, %v1716_v11, %v1719_v62 }
 0xc3b   :  { %1702 = vrot.lane.b32.xlu2 %v2989_v57, %s3262_s1 }
 0xc95   :  { %v1703_v5 = vpop.permute.xlu2 %1702 }
 0xc96   :  { %v1705_v17 = vmul.f32 %v1703_v5, %v1700_v52 }
 0xc98   :  { %v1707_v63 = vadd.f32 %v1706_v10, %v1705_v17 }
 0xc9a   :  { %1709 = vrot.lane.b32.xlu0 %v1707_v63, %s3262_s1  ;;  %1715 = vst.msk [vmem:[%s4084_s9 + $0x1a] sm:$0xc] %vm1636_vm7, %v1707_v63 }
 0xd0c   :  { %v1710_v53 = vpop.permute.xlu0 %1709 }
 0xd0d   :  { %v1712_v58 = vsel %vm150_vm2, %v1710_v53, %v1707_v63  ;;  %1714 = vst.msk [vmem:[%s4084_s9 + $0x2] sm:$0x3] %vm148_vm0, %v1710_v53 }
 0xd0e   :  { %v1713_v59 = vmul.f32 %v1712_v58, %v3703_v37 }
 0xd10   :  { %2869 = vmatmul.msk.f32.vlgmr.msra.gmra.mxu2 %vm1566_vm8, %v1713_v59 }
 0xd11   :  { %2345 = vmatpush.msra.mxu2 %v3618_v49 }
 0xd13   :  { %2346 = vmatpush.msra.mxu2 %v3620_v29 }
 0xd15   :  { %2347 = vmatpush.msra.mxu2 %v3624_v30 }
 0xd17   :  { %2348 = vmatpush.msra.mxu2 %v3630_v56 }
 0xd93   :  { %v1742_v60 = vpop.f32.mrf.mxu2 }
 0xd94   :  { %v1743_v61 = vadd.f32 %v1742_v60, %v3666_v36 }
 0xd96   :  { %1766 = vrot.lane.b32.xlu2 %v1743_v61, %s3263_s5  ;;  %v1745_v2 = vadd.f32 %v1743_v61, %v1721_v39 }
 0xd98   :  { %v2870_v12 = vmul.f32 -1.442695, %v1745_v2  ;;  %v3779_v2 = vadd.f32 %v3672_v43, %v3674_v46 }
 0xd9a   :  { %2990 = vpow2.f32 %v2870_v12  ;;  %v1870_v12 = vrot.slane %v3779_v2, 4 }
 0xda0   :  { %v2991_v6 = vpop.eup %2990 }
 0xda1   :  { %v1749_v7 = vadd.f32 1.0, %v2991_v6 }
 0xda3   :  { %2992 = vrcp.f32 %v1749_v7  ;;  %v1761_v34 = vand.u32 2147483648, %v1749_v7  ;;  %vm1755_vm14 = vweird.f32 %v1749_v7  ;;  %v1759_v15 = vand.u32 2147483647, %v1749_v7 }
 0xda5   :  { %v1762_v18 = vor.u32 1.1754944e-38, %v1761_v34  ;;  %vm1760_vm3 = vcmp.eq.f32.partialorder %v1759_v15, 8.507059e+37 }
 0xda9   :  { %v2993_v8 = vpop.eup %2992 }
 0xdaa   :  { %v1751_v20 = vmul.f32 %v2993_v8, %v1749_v7  ;;  %vm1756_vm13 = vweird.f32 %v2993_v8 }
 0xdab   :  { %vm1757_vm15 = vmor %vm1755_vm14, %vm1756_vm13 }
 0xdac   :  { %v1752_v9 = vsub.f32 1.0, %v1751_v20 }
 0xdae   :  { %v1753_v13 = vmul.f32 %v2993_v8, %v1752_v9 }
 0xdb0   :  { %v1754_v14 = vadd.f32 %v2993_v8, %v1753_v13 }
 0xdb2   :  { %v1758_v16 = vsel %vm1757_vm15, %v2993_v8, %v1754_v14 }
 0xdb3   :  { %v1763_v0 = vsel %vm1760_vm3, %v1762_v18, %v1758_v16 }
 0xdb4   :  { %v1776_v26 = vsub.f32 1.0, %v1763_v0  ;;  %v1782_v31 = vmul.f32 %v1763_v0, %v1707_v63 }
 0xdf0   :  { %v1767_v19 = vpop.permute.xlu2 %1766 }
 0xdf1   :  { %v1769_v21 = vmul.f32 %v1767_v19, %v1763_v0 }
 0xdf3   :  { %1771 = vrot.lane.b32.xlu0 %v1769_v21, %s3265_s6  ;;  %v3806_v21 = vadd.f32 %v3670_v42, %v3674_v46 }
 0xdfb   :  { %1795 = vrot.lane.b32.xlu0 %v1794_v22, %s3264_s19 }
 0xe65   :  { %v1772_v23 = vpop.permute.xlu0 %1771 }
 0xe66   :  { %v1774_v24 = vadd.f32 %v1772_v23, %v1721_v39 }
 0xe68   :  { %2994 = vtanh.f32 %v1774_v24 }
 0xe6d   :  { %v1796_v27 = vpop.permute.xlu0 %1795 }
 0xe6e   :  { %v2995_v25 = vpop.eup %2994  ;;  %v1798_v50 = vsel %vm1552_vm1, %v1792_v4, %v1796_v27 }
 0xe6f   :  { %1778 = vrot.lane.b32.xlu1 %v2995_v25, %s3262_s1 }
 0xee1   :  { %v1779_v28 = vpop.permute.xlu1 %1778 }
 0xee2   :  { %v1781_v32 = vmul.f32 %v1779_v28, %v1776_v26 }
 0xee4   :  { %v1783_v33 = vadd.f32 %v1782_v31, %v1781_v32 }
 0xee6   :  { %1785 = vrot.lane.b32.xlu2 %v1783_v33, %s3262_s1  ;;  %1791 = vst.msk [vmem:[%s4084_s9 + $0x18] sm:$0xc] %vm1636_vm7, %v1783_v33 }
 0xf40   :  { %v1786_v44 = vpop.permute.xlu2 %1785 }
 0xf41   :  { %v1788_v35 = vsel %vm150_vm2, %v1786_v44, %v1783_v33  ;;  %1790 = vst.msk [vmem:[%s4084_s9 + $0x4] sm:$0x3] %vm148_vm0, %v1786_v44 }
 0xf42   :  { %v1789_v38 = vmul.f32 %v1788_v35, %v3703_v37 }
 0xf44   :  { %2871 = vmatmul.msk.f32.vlgmr.msra.gmra.mxu3 %vm1566_vm8, %v1789_v38 }
 0xf45   :  { %2420 = vmatpush.msra.mxu3 %v3618_v49 }
 0xf47   :  { %2421 = vmatpush.msra.mxu3 %v3620_v29 }
 0xf49   :  { %2422 = vmatpush.msra.mxu3 %v3624_v30 }
 0xf4b   :  { %2423 = vmatpush.msra.mxu3 %v3630_v56 }
 0xfc7   :  { %v1819_v40 = vpop.f32.mrf.mxu3 }
 0xfc8   :  { %v1820_v41 = vadd.f32 %v1819_v40, %v3666_v36 }
 0xfca   :  { %1843 = vrot.lane.b32.xlu1 %v1820_v41, %s3263_s5  ;;  %v1822_v51 = vadd.f32 %v1820_v41, %v1798_v50 }
 0xfcc   :  { %v2872_v54 = vmul.f32 -1.442695, %v1822_v51  ;;  %v1948_v51 = vrot.slane %v3779_v2, 2 }
 0xfce   :  { %2996 = vpow2.f32 %v2872_v54 }
 0xfd4   :  { %v2997_v55 = vpop.eup %2996 }
 0xfd5   :  { %v1826_v57 = vadd.f32 1.0, %v2997_v55 }
 0xfd7   :  { %2998 = vrcp.f32 %v1826_v57  ;;  %v1838_v53 = vand.u32 2147483648, %v1826_v57  ;;  %vm1832_vm5 = vweird.f32 %v1826_v57  ;;  %v1836_v58 = vand.u32 2147483647, %v1826_v57 }
 0xfd9   :  { %v1839_v60 = vor.u32 1.1754944e-38, %v1838_v53  ;;  %vm1837_vm9 = vcmp.eq.f32.partialorder %v1836_v58, 8.507059e+37 }
 0xfdd   :  { %v2999_v52 = vpop.eup %2998 }
 0xfde   :  { %v1828_v5 = vmul.f32 %v2999_v52, %v1826_v57  ;;  %vm1833_vm4 = vweird.f32 %v2999_v52 }
 0xfdf   :  { %vm1834_vm6 = vmor %vm1832_vm5, %vm1833_vm4 }
 0xfe0   :  { %v1829_v10 = vsub.f32 1.0, %v1828_v5 }
 0xfe2   :  { %v1830_v17 = vmul.f32 %v2999_v52, %v1829_v10 }
 0xfe4   :  { %v1831_v63 = vadd.f32 %v2999_v52, %v1830_v17 }
 0xfe6   :  { %v1835_v59 = vsel %vm1834_vm6, %v2999_v52, %v1831_v63 }
 0xfe7   :  { %v1840_v62 = vsel %vm1837_vm9, %v1839_v60, %v1835_v59 }
 0xfe8   :  { %v1853_v20 = vsub.f32 1.0, %v1840_v62  ;;  %v1859_v13 = vmul.f32 %v1840_v62, %v1783_v33 }
0x103c   :  { %v1844_v61 = vpop.permute.xlu1 %1843 }
0x103d   :  { %v1846_v39 = vmul.f32 %v1844_v61, %v1840_v62 }
0x103f   :  { %1848 = vrot.lane.b32.xlu2 %v1846_v39, %s3265_s6  ;;  %v1946_v39 = vrot.slane %v3806_v21, 2 }
0x1047   :  { %1871 = vrot.lane.b32.xlu2 %v1870_v12, %s3264_s19 }
0x1099   :  { %v1849_v6 = vpop.permute.xlu2 %1848 }
0x109a   :  { %v1851_v7 = vadd.f32 %v1849_v6, %v1798_v50 }
0x109c   :  { %3000 = vtanh.f32 %v1851_v7 }
0x10a1   :  { %v1872_v0 = vpop.permute.xlu2 %1871 }
0x10a2   :  { %v3001_v8 = vpop.eup %3000  ;;  %v1874_v23 = vsel %vm1552_vm1, %v3806_v21, %v1872_v0 }
0x10a3   :  { %1855 = vrot.lane.b32.xlu0 %v3001_v8, %s3262_s1 }
0x1115   :  { %v1856_v9 = vpop.permute.xlu0 %1855 }
0x1116   :  { %v1858_v14 = vmul.f32 %v1856_v9, %v1853_v20 }
0x1118   :  { %v1860_v34 = vadd.f32 %v1859_v13, %v1858_v14 }
0x111a   :  { %1862 = vrot.lane.b32.xlu1 %v1860_v34, %s3262_s1  ;;  %1868 = vst.msk [vmem:[%s4084_s9 + $0x16] sm:$0xc] %vm1636_vm7, %v1860_v34 }
0x118c   :  { %v1863_v43 = vpop.permute.xlu1 %1862 }
0x118d   :  { %v1865_v15 = vsel %vm150_vm2, %v1863_v43, %v1860_v34  ;;  %1867 = vst.msk [vmem:[%s4084_s9 + $0x6] sm:$0x3] %vm148_vm0, %v1863_v43 }
0x118e   :  { %v1866_v16 = vmul.f32 %v1865_v15, %v3703_v37 }
0x1190   :  { %2873 = vmatmul.msk.f32.vlgmr.msrb.gmra.mxu0 %vm1566_vm8, %v1866_v16 }
0x1191   :  { %2494 = vmatpush.msrb.mxu0 %v3618_v49 }
0x1193   :  { %2495 = vmatpush.msrb.mxu0 %v3620_v29 }
0x1195   :  { %2496 = vmatpush.msrb.mxu0 %v3624_v30 }
0x1197   :  { %2497 = vmatpush.msrb.mxu0 %v3630_v56 }
0x120d   :  { %v1895_v18 = vpop.f32.mrf.mxu0 }
0x120e   :  { %v1896_v19 = vadd.f32 %v1895_v18, %v3666_v36 }
0x1210   :  { %1919 = vrot.lane.b32.xlu0 %v1896_v19, %s3263_s5  ;;  %v1898_v24 = vadd.f32 %v1896_v19, %v1874_v23 }
0x1212   :  { %v2874_v25 = vmul.f32 -1.442695, %v1898_v24 }
0x1214   :  { %3002 = vpow2.f32 %v2874_v25 }
0x121a   :  { %v3003_v26 = vpop.eup %3002 }
0x121b   :  { %v1902_v28 = vadd.f32 1.0, %v3003_v26 }
0x121d   :  { %3004 = vrcp.f32 %v1902_v28  ;;  %v1914_v38 = vand.u32 2147483648, %v1902_v28  ;;  %vm1908_vm11 = vweird.f32 %v1902_v28  ;;  %v1912_v40 = vand.u32 2147483647, %v1902_v28 }
0x121f   :  { %v1915_v46 = vor.u32 1.1754944e-38, %v1914_v38  ;;  %vm1913_vm13 = vcmp.eq.f32.partialorder %v1912_v40, 8.507059e+37 }
0x1223   :  { %v3005_v31 = vpop.eup %3004 }
0x1224   :  { %v1904_v32 = vmul.f32 %v3005_v31, %v1902_v28  ;;  %vm1909_vm10 = vweird.f32 %v3005_v31 }
0x1225   :  { %vm1910_vm12 = vmor %vm1908_vm11, %vm1909_vm10 }
0x1226   :  { %v1905_v33 = vsub.f32 1.0, %v1904_v32 }
0x1228   :  { %v1906_v44 = vmul.f32 %v3005_v31, %v1905_v33 }
0x122a   :  { %v1907_v35 = vadd.f32 %v3005_v31, %v1906_v44 }
0x122c   :  { %v1911_v42 = vsel %vm1910_vm12, %v3005_v31, %v1907_v35 }
0x122d   :  { %v1916_v27 = vsel %vm1913_vm13, %v1915_v46, %v1911_v42 }
0x122e   :  { %v1929_v52 = vsub.f32 1.0, %v1916_v27  ;;  %v1935_v10 = vmul.f32 %v1916_v27, %v1860_v34 }
0x1282   :  { %v1920_v41 = vpop.permute.xlu0 %1919 }
0x1283   :  { %v1922_v50 = vmul.f32 %v1920_v41, %v1916_v27 }
0x1285   :  { %1924 = vrot.lane.b32.xlu1 %v1922_v50, %s3265_s6 }
0x128d   :  { %1949 = vrot.lane.b32.xlu1 %v1948_v51, %s3264_s19 }
0x12f7   :  { %v1925_v54 = vpop.permute.xlu1 %1924 }
0x12f8   :  { %v1927_v55 = vadd.f32 %v1925_v54, %v1874_v23  ;;  %v2023_v54 = vrot.slane %v3806_v21, 4 }
0x12fa   :  { %3006 = vtanh.f32 %v1927_v55 }
0x12ff   :  { %v1950_v62 = vpop.permute.xlu1 %1949 }
0x1300   :  { %v3007_v57 = vpop.eup %3006  ;;  %v1952_v6 = vsel %vm1552_vm1, %v1946_v39, %v1950_v62 }
0x1301   :  { %1931 = vrot.lane.b32.xlu2 %v3007_v57, %s3262_s1 }
0x135b   :  { %v1932_v5 = vpop.permute.xlu2 %1931 }
0x135c   :  { %v1934_v17 = vmul.f32 %v1932_v5, %v1929_v52 }
0x135e   :  { %v1936_v63 = vadd.f32 %v1935_v10, %v1934_v17 }
0x1360   :  { %1938 = vrot.lane.b32.xlu0 %v1936_v63, %s3262_s1  ;;  %1944 = vst.msk [vmem:[%s4084_s9 + $0x14] sm:$0xc] %vm1636_vm7, %v1936_v63 }
0x13d2   :  { %v1939_v53 = vpop.permute.xlu0 %1938 }
0x13d3   :  { %v1941_v58 = vsel %vm150_vm2, %v1939_v53, %v1936_v63  ;;  %1943 = vst.msk [vmem:[%s4084_s9 + $0x8] sm:$0x3] %vm148_vm0, %v1939_v53 }
0x13d4   :  { %v1942_v59 = vmul.f32 %v1941_v58, %v3703_v37 }
0x13d6   :  { %2875 = vmatmul.msk.f32.vlgmr.msrb.gmra.mxu1 %vm1566_vm8, %v1942_v59 }
0x13d7   :  { %2569 = vmatpush.msrb.mxu1 %v3618_v49 }
0x13d9   :  { %2570 = vmatpush.msrb.mxu1 %v3620_v29 }
0x13db   :  { %2571 = vmatpush.msrb.mxu1 %v3624_v30 }
0x13dd   :  { %2572 = vmatpush.msrb.mxu1 %v3630_v56 }
0x1453   :  { %v1973_v60 = vpop.f32.mrf.mxu1 }
0x1454   :  { %v1974_v61 = vadd.f32 %v1973_v60, %v3666_v36 }
0x1456   :  { %1997 = vrot.lane.b32.xlu2 %v1974_v61, %s3263_s5  ;;  %v1976_v7 = vadd.f32 %v1974_v61, %v1952_v6 }
0x1458   :  { %v2876_v8 = vmul.f32 -1.442695, %v1976_v7 }
0x145a   :  { %3008 = vpow2.f32 %v2876_v8 }
0x1460   :  { %v3009_v20 = vpop.eup %3008 }
0x1461   :  { %v1980_v9 = vadd.f32 1.0, %v3009_v20 }
0x1463   :  { %3010 = vrcp.f32 %v1980_v9  ;;  %v1992_v16 = vand.u32 2147483648, %v1980_v9  ;;  %vm1986_vm15 = vweird.f32 %v1980_v9  ;;  %v1990_v18 = vand.u32 2147483647, %v1980_v9 }
0x1465   :  { %v1993_v0 = vor.u32 1.1754944e-38, %v1992_v16  ;;  %vm1991_vm4 = vcmp.eq.f32.partialorder %v1990_v18, 8.507059e+37 }
0x1469   :  { %v3011_v13 = vpop.eup %3010 }
0x146a   :  { %v1982_v14 = vmul.f32 %v3011_v13, %v1980_v9  ;;  %vm1987_vm14 = vweird.f32 %v3011_v13  ;;  %v2101_v9 = vrot.slane %v3779_v2, 6 }
0x146b   :  { %vm1988_vm3 = vmor %vm1986_vm15, %vm1987_vm14 }
0x146c   :  { %v1983_v34 = vsub.f32 1.0, %v1982_v14 }
0x146e   :  { %v1984_v43 = vmul.f32 %v3011_v13, %v1983_v34 }
0x1470   :  { %v1985_v15 = vadd.f32 %v3011_v13, %v1984_v43 }
0x1472   :  { %v1989_v19 = vsel %vm1988_vm3, %v3011_v13, %v1985_v15 }
0x1473   :  { %v1994_v24 = vsel %vm1991_vm4, %v1993_v0, %v1989_v19 }
0x1474   :  { %v2007_v32 = vsub.f32 1.0, %v1994_v24  ;;  %v2013_v44 = vmul.f32 %v1994_v24, %v1936_v63 }
0x14b0   :  { %v1998_v23 = vpop.permute.xlu2 %1997 }
0x14b1   :  { %v2000_v25 = vmul.f32 %v1998_v23, %v1994_v24 }
0x14b3   :  { %2002 = vrot.lane.b32.xlu0 %v2000_v25, %s3265_s6 }
0x14bb   :  { %2025 = vrot.lane.b32.xlu0 %v3779_v2, %s3264_s19 }
0x1525   :  { %v2003_v26 = vpop.permute.xlu0 %2002 }
0x1526   :  { %v2005_v28 = vadd.f32 %v2003_v26, %v1952_v6 }
0x1528   :  { %3012 = vtanh.f32 %v2005_v28 }
0x152d   :  { %v2026_v50 = vpop.permute.xlu0 %2025 }
0x152e   :  { %v3013_v31 = vpop.eup %3012  ;;  %v2028_v55 = vsel %vm1552_vm1, %v2023_v54, %v2026_v50 }
0x152f   :  { %2009 = vrot.lane.b32.xlu1 %v3013_v31, %s3262_s1  ;;  %v2099_v31 = vrot.slane %v3806_v21, 6 }
0x15a1   :  { %v2010_v33 = vpop.permute.xlu1 %2009 }
0x15a2   :  { %v2012_v35 = vmul.f32 %v2010_v33, %v2007_v32 }
0x15a4   :  { %v2014_v38 = vadd.f32 %v2013_v44, %v2012_v35 }
0x15a6   :  { %2016 = vrot.lane.b32.xlu2 %v2014_v38, %s3262_s1  ;;  %2022 = vst.msk [vmem:[%s4084_s9 + $0x12] sm:$0xc] %vm1636_vm7, %v2014_v38 }
0x1600   :  { %v2017_v40 = vpop.permute.xlu2 %2016 }
0x1601   :  { %v2019_v42 = vsel %vm150_vm2, %v2017_v40, %v2014_v38  ;;  %2021 = vst.msk [vmem:[%s4084_s9 + $0xa] sm:$0x3] %vm148_vm0, %v2017_v40 }
0x1602   :  { %v2020_v46 = vmul.f32 %v2019_v42, %v3703_v37 }
0x1604   :  { %2877 = vmatmul.msk.f32.vlgmr.msrb.gmra.mxu2 %vm1566_vm8, %v2020_v46 }
0x1605   :  { %2644 = vmatpush.msrb.mxu2 %v3618_v49 }
0x1607   :  { %2645 = vmatpush.msrb.mxu2 %v3620_v29 }
0x1609   :  { %2646 = vmatpush.msrb.mxu2 %v3624_v30 }
0x160b   :  { %2647 = vmatpush.msrb.mxu2 %v3630_v56 }
0x1687   :  { %v2049_v41 = vpop.f32.mrf.mxu2 }
0x1688   :  { %v2050_v27 = vadd.f32 %v2049_v41, %v3666_v36 }
0x168a   :  { %2073 = vrot.lane.b32.xlu1 %v2050_v27, %s3263_s5  ;;  %v2052_v57 = vadd.f32 %v2050_v27, %v2028_v55 }
0x168c   :  { %v2878_v52 = vmul.f32 -1.442695, %v2052_v57 }
0x168e   :  { %3014 = vpow2.f32 %v2878_v52 }
0x1694   :  { %v3015_v5 = vpop.eup %3014 }
0x1695   :  { %v2056_v10 = vadd.f32 1.0, %v3015_v5 }
0x1697   :  { %3016 = vrcp.f32 %v2056_v10  ;;  %v2068_v60 = vand.u32 2147483648, %v2056_v10  ;;  %vm2062_vm6 = vweird.f32 %v2056_v10  ;;  %v2066_v61 = vand.u32 2147483647, %v2056_v10 }
0x1699   :  { %v2069_v6 = vor.u32 1.1754944e-38, %v2068_v60  ;;  %vm2067_vm10 = vcmp.eq.f32.partialorder %v2066_v61, 8.507059e+37 }
0x169d   :  { %v3017_v17 = vpop.eup %3016 }
0x169e   :  { %v2058_v63 = vmul.f32 %v3017_v17, %v2056_v10  ;;  %vm2063_vm5 = vweird.f32 %v3017_v17 }
0x169f   :  { %vm2064_vm9 = vmor %vm2062_vm6, %vm2063_vm5 }
0x16a0   :  { %v2059_v53 = vsub.f32 1.0, %v2058_v63 }
0x16a2   :  { %v2060_v58 = vmul.f32 %v3017_v17, %v2059_v53 }
0x16a4   :  { %v2061_v59 = vadd.f32 %v3017_v17, %v2060_v58 }
0x16a6   :  { %v2065_v62 = vsel %vm2064_vm9, %v3017_v17, %v2061_v59 }
0x16a7   :  { %v2070_v8 = vsel %vm2067_vm10, %v2069_v6, %v2065_v62 }
0x16a8   :  { %v2083_v43 = vsub.f32 1.0, %v2070_v8  ;;  %v2089_v16 = vmul.f32 %v2070_v8, %v2014_v38 }
0x16fc   :  { %v2074_v7 = vpop.permute.xlu1 %2073 }
0x16fd   :  { %v2076_v20 = vmul.f32 %v2074_v7, %v2070_v8 }
0x16ff   :  { %2078 = vrot.lane.b32.xlu2 %v2076_v20, %s3265_s6 }
0x1707   :  { %2102 = vrot.lane.b32.xlu2 %v2101_v9, %s3264_s19 }
0x1759   :  { %v2079_v13 = vpop.permute.xlu2 %2078 }
0x175a   :  { %v2081_v14 = vadd.f32 %v2079_v13, %v2028_v55 }
0x175c   :  { %3018 = vtanh.f32 %v2081_v14 }
0x1761   :  { %v2103_v28 = vpop.permute.xlu2 %2102 }
0x1762   :  { %v3019_v34 = vpop.eup %3018  ;;  %v2105_v32 = vsel %vm1552_vm1, %v2099_v31, %v2103_v28 }
0x1763   :  { %2085 = vrot.lane.b32.xlu0 %v3019_v34, %s3262_s1 }
0x17d5   :  { %v2086_v15 = vpop.permute.xlu0 %2085 }
0x17d6   :  { %v2088_v18 = vmul.f32 %v2086_v15, %v2083_v43 }
0x17d8   :  { %v2090_v19 = vadd.f32 %v2089_v16, %v2088_v18 }
0x17da   :  { %2092 = vrot.lane.b32.xlu1 %v2090_v19, %s3262_s1  ;;  %2098 = vst.msk [vmem:[%s4084_s9 + $0x10] sm:$0xc] %vm1636_vm7, %v2090_v19 }
0x184c   :  { %v2093_v0 = vpop.permute.xlu1 %2092 }
0x184d   :  { %v2095_v23 = vsel %vm150_vm2, %v2093_v0, %v2090_v19  ;;  %2097 = vst.msk [vmem:[%s4084_s9 + $0xc] sm:$0x3] %vm148_vm0, %v2093_v0 }
0x184e   :  { %v2096_v24 = vmul.f32 %v2095_v23, %v3703_v37 }
0x1850   :  { %2879 = vmatmul.msk.f32.vlgmr.msrb.gmra.mxu3 %vm1566_vm8, %v2096_v24 }
0x1851   :  { %2719 = vmatpush.msrb.mxu3 %v3618_v49 }
0x1853   :  { %2720 = vmatpush.msrb.mxu3 %v3620_v29 }
0x1855   :  { %2721 = vmatpush.msrb.mxu3 %v3624_v30 }
0x1857   :  { %2722 = vmatpush.msrb.mxu3 %v3630_v56 }
0x18d3   :  { %v2126_v25 = vpop.f32.mrf.mxu3 }
0x18d4   :  { %v2127_v26 = vadd.f32 %v2126_v25, %v3666_v36 }
0x18d6   :  { %2150 = vrot.lane.b32.xlu0 %v2127_v26, %s3263_s5  ;;  %v2129_v33 = vadd.f32 %v2127_v26, %v2105_v32 }
0x18d8   :  { %v2880_v49 = vmul.f32 -1.442695, %v2129_v33 }
0x18da   :  { %3020 = vpow2.f32 %v2880_v49 }
0x18e0   :  { %v3021_v29 = vpop.eup %3020 }
0x18e1   :  { %v2133_v44 = vadd.f32 1.0, %v3021_v29 }
0x18e3   :  { %3022 = vrcp.f32 %v2133_v44  ;;  %v2145_v42 = vand.u32 2147483648, %v2133_v44  ;;  %vm2139_vm12 = vweird.f32 %v2133_v44  ;;  %v2143_v46 = vand.u32 2147483647, %v2133_v44 }
0x18e5   :  { %v2146_v27 = vor.u32 1.1754944e-38, %v2145_v42  ;;  %vm2144_vm14 = vcmp.eq.f32.partialorder %v2143_v46, 8.507059e+37 }
0x18e9   :  { %v3023_v30 = vpop.eup %3022 }
0x18ea   :  { %v2135_v56 = vmul.f32 %v3023_v30, %v2133_v44  ;;  %vm2140_vm11 = vweird.f32 %v3023_v30 }
0x18eb   :  { %vm2141_vm13 = vmor %vm2139_vm12, %vm2140_vm11 }
0x18ec   :  { %v2136_v35 = vsub.f32 1.0, %v2135_v56 }
0x18ee   :  { %v2137_v38 = vmul.f32 %v3023_v30, %v2136_v35 }
0x18f0   :  { %v2138_v40 = vadd.f32 %v3023_v30, %v2137_v38 }
0x18f2   :  { %v2142_v41 = vsel %vm2141_vm13, %v3023_v30, %v2138_v40 }
0x18f3   :  { %v2147_v55 = vsel %vm2144_vm14, %v2146_v27, %v2142_v41 }
0x18f4   :  { %v2160_v17 = vsub.f32 1.0, %v2147_v55  ;;  %v2166_v53 = vmul.f32 %v2147_v55, %v2090_v19 }
0x1948   :  { %v2151_v50 = vpop.permute.xlu0 %2150 }
0x1949   :  { %v2153_v57 = vmul.f32 %v2151_v50, %v2147_v55 }
0x194b   :  { %2155 = vrot.lane.b32.xlu1 %v2153_v57, %s3265_s6 }
0x1953   :  { %2176 = vrot.lane.b32.xlu1 %v2023_v54, %s3264_s19 }
0x19bd   :  { %v2156_v52 = vpop.permute.xlu1 %2155 }
0x19be   :  { %v2158_v5 = vadd.f32 %v2156_v52, %v2105_v32 }
0x19c0   :  { %3024 = vtanh.f32 %v2158_v5 }
0x19c5   :  { %v2177_v7 = vpop.permute.xlu1 %2176 }
0x19c6   :  { %v3025_v10 = vpop.eup %3024  ;;  %v2179_v8 = vsel %vm1552_vm1, %v3779_v2, %v2177_v7 }
0x19c7   :  { %2162 = vrot.lane.b32.xlu2 %v3025_v10, %s3262_s1 }
0x1a21   :  { %v2163_v63 = vpop.permute.xlu2 %2162 }
0x1a22   :  { %v2165_v58 = vmul.f32 %v2163_v63, %v2160_v17 }
0x1a24   :  { %v2167_v59 = vadd.f32 %v2166_v53, %v2165_v58 }
0x1a26   :  { %2169 = vrot.lane.b32.xlu0 %v2167_v59, %s3262_s1  ;;  %2175 = vst.msk [vmem:[%s4084_s9 + $0xe] sm:$0xc] %vm1636_vm7, %v2167_v59 }
0x1a98   :  { %v2170_v60 = vpop.permute.xlu0 %2169 }
0x1a99   :  { %v2172_v54 = vsel %vm150_vm2, %v2170_v60, %v2167_v59  ;;  %2174 = vst.msk [vmem:[%s4084_s9 + $0xe] sm:$0x3] %vm148_vm0, %v2170_v60 }
0x1a9a   :  { %v2173_v61 = vmul.f32 %v2172_v54, %v3703_v37 }
0x1a9c   :  { %2881 = vmatmul.msk.f32.vlgmr.msra.gmra.mxu0 %vm1566_vm8, %v2173_v61 }
0x1b19   :  { %v2200_v62 = vpop.f32.mrf.mxu0 }
0x1b1a   :  { %v2201_v6 = vadd.f32 %v2200_v62, %v3666_v36 }
0x1b1c   :  { %2224 = vrot.lane.b32.xlu2 %v2201_v6, %s3263_s5  ;;  %v2203_v20 = vadd.f32 %v2201_v6, %v2179_v8 }
0x1b1e   :  { %v2882_v13 = vmul.f32 -1.442695, %v2203_v20 }
0x1b20   :  { %3026 = vpow2.f32 %v2882_v13 }
0x1b26   :  { %v3027_v14 = vpop.eup %3026 }
0x1b27   :  { %v2207_v34 = vadd.f32 1.0, %v3027_v14 }
0x1b29   :  { %3028 = vrcp.f32 %v2207_v34  ;;  %v2219_v0 = vand.u32 2147483648, %v2207_v34  ;;  %vm2213_vm3 = vweird.f32 %v2207_v34  ;;  %v2217_v23 = vand.u32 2147483647, %v2207_v34 }
0x1b2b   :  { %v2220_v25 = vor.u32 1.1754944e-38, %v2219_v0  ;;  %vm2218_vm5 = vcmp.eq.f32.partialorder %v2217_v23, 8.507059e+37 }
0x1b2f   :  { %v3029_v43 = vpop.eup %3028 }
0x1b30   :  { %v2209_v15 = vmul.f32 %v3029_v43, %v2207_v34  ;;  %vm2214_vm15 = vweird.f32 %v3029_v43 }
0x1b31   :  { %vm2215_vm4 = vmor %vm2213_vm3, %vm2214_vm15 }
0x1b32   :  { %v2210_v16 = vsub.f32 1.0, %v2209_v15 }
0x1b34   :  { %v2211_v18 = vmul.f32 %v3029_v43, %v2210_v16 }
0x1b36   :  { %v2212_v19 = vadd.f32 %v3029_v43, %v2211_v18 }
0x1b38   :  { %v2216_v24 = vsel %vm2215_vm4, %v3029_v43, %v2212_v19 }
0x1b39   :  { %v2221_v28 = vsel %vm2218_vm5, %v2220_v25, %v2216_v24 }
0x1b3a   :  { %v2234_v44 = vsub.f32 1.0, %v2221_v28  ;;  %v2240_v56 = vmul.f32 %v2221_v28, %v2167_v59 }
0x1b76   :  { %v2225_v26 = vpop.permute.xlu2 %2224 }
0x1b77   :  { %v2227_v32 = vmul.f32 %v2225_v26, %v2221_v28 }
0x1b79   :  { %2229 = vrot.lane.b32.xlu0 %v2227_v32, %s3265_s6 }
0x1b81   :  { %2251 = vrot.lane.b32.xlu0 %v1946_v39, %s3264_s19 }
0x1beb   :  { %v2230_v33 = vpop.permute.xlu0 %2229 }
0x1bec   :  { %v2232_v49 = vadd.f32 %v2230_v33, %v2179_v8 }
0x1bee   :  { %3030 = vtanh.f32 %v2232_v49 }
0x1bf3   :  { %v2252_v27 = vpop.permute.xlu0 %2251 }
0x1bf4   :  { %v3031_v29 = vpop.eup %3030  ;;  %v2254_v50 = vsel %vm1552_vm1, %v1948_v51, %v2252_v27 }
0x1bf5   :  { %2236 = vrot.lane.b32.xlu1 %v3031_v29, %s3262_s1 }
0x1c67   :  { %v2237_v30 = vpop.permute.xlu1 %2236 }
0x1c68   :  { %v2239_v35 = vmul.f32 %v2237_v30, %v2234_v44 }
0x1c6a   :  { %v2241_v38 = vadd.f32 %v2240_v56, %v2239_v35 }
0x1c6c   :  { %2249 = vst.msk [vmem:[%s4084_s9 + $0xc] sm:$0xc] %vm1636_vm7, %v2241_v38  ;;  %2243 = vrot.lane.b32.xlu2 %v2241_v38, %s3262_s1 }
0x1cc6   :  { %v2244_v40 = vpop.permute.xlu2 %2243 }
0x1cc7   :  { %v2246_v39 = vsel %vm150_vm2, %v2244_v40, %v2241_v38  ;;  %2248 = vst.msk [vmem:[%s4084_s9 + $0x10] sm:$0x3] %vm148_vm0, %v2244_v40 }
0x1cc8   :  { %v2247_v42 = vmul.f32 %v2246_v39, %v3703_v37 }
0x1cca   :  { %2883 = vmatmul.msk.f32.vlgmr.msra.gmra.mxu1 %vm1566_vm8, %v2247_v42 }
0x1d47   :  { %v2275_v46 = vpop.f32.mrf.mxu1 }
0x1d48   :  { %v2276_v41 = vadd.f32 %v2275_v46, %v3666_v36 }
0x1d4a   :  { %2299 = vrot.lane.b32.xlu1 %v2276_v41, %s3263_s5  ;;  %v2278_v55 = vadd.f32 %v2276_v41, %v2254_v50 }
0x1d4c   :  { %v2884_v57 = vmul.f32 -1.442695, %v2278_v55 }
0x1d4e   :  { %3032 = vpow2.f32 %v2884_v57 }
0x1d54   :  { %v3033_v52 = vpop.eup %3032 }
0x1d55   :  { %v2282_v5 = vadd.f32 1.0, %v3033_v52 }
0x1d57   :  { %3034 = vrcp.f32 %v2282_v5  ;;  %v2294_v59 = vand.u32 2147483648, %v2282_v5  ;;  %vm2288_vm9 = vweird.f32 %v2282_v5  ;;  %v2292_v60 = vand.u32 2147483647, %v2282_v5 }
0x1d59   :  { %v2295_v61 = vor.u32 1.1754944e-38, %v2294_v59  ;;  %vm2293_vm11 = vcmp.eq.f32.partialorder %v2292_v60, 8.507059e+37 }
0x1d5d   :  { %v3035_v10 = vpop.eup %3034 }
0x1d5e   :  { %v2284_v17 = vmul.f32 %v3035_v10, %v2282_v5  ;;  %vm2289_vm6 = vweird.f32 %v3035_v10 }
0x1d5f   :  { %vm2290_vm10 = vmor %vm2288_vm9, %vm2289_vm6 }
0x1d60   :  { %v2285_v63 = vsub.f32 1.0, %v2284_v17 }
0x1d62   :  { %v2286_v53 = vmul.f32 %v3035_v10, %v2285_v63 }
0x1d64   :  { %v2287_v58 = vadd.f32 %v3035_v10, %v2286_v53 }
0x1d66   :  { %v2291_v54 = vsel %vm2290_vm10, %v3035_v10, %v2287_v58 }
0x1d67   :  { %v2296_v62 = vsel %vm2293_vm11, %v2295_v61, %v2291_v54 }
0x1d68   :  { %v2309_v13 = vsub.f32 1.0, %v2296_v62  ;;  %v2315_v34 = vmul.f32 %v2296_v62, %v2241_v38 }
0x1dbc   :  { %v2300_v51 = vpop.permute.xlu1 %2299 }
0x1dbd   :  { %v2302_v6 = vmul.f32 %v2300_v51, %v2296_v62 }
0x1dbf   :  { %2304 = vrot.lane.b32.xlu2 %v2302_v6, %s3265_s6 }
0x1dc7   :  { %2326 = vrot.lane.b32.xlu2 %v3806_v21, %s3264_s19 }
0x1e19   :  { %v2305_v7 = vpop.permute.xlu2 %2304 }
0x1e1a   :  { %v2307_v8 = vadd.f32 %v2305_v7, %v2254_v50 }
0x1e1c   :  { %3036 = vtanh.f32 %v2307_v8 }
0x1e21   :  { %v2327_v24 = vpop.permute.xlu2 %2326 }
0x1e22   :  { %v3037_v20 = vpop.eup %3036  ;;  %v2329_v25 = vsel %vm1552_vm1, %v1870_v12, %v2327_v24 }
0x1e23   :  { %2311 = vrot.lane.b32.xlu0 %v3037_v20, %s3262_s1 }
0x1e95   :  { %v2312_v14 = vpop.permute.xlu0 %2311 }
0x1e96   :  { %v2314_v43 = vmul.f32 %v2312_v14, %v2309_v13 }
0x1e98   :  { %v2316_v15 = vadd.f32 %v2315_v34, %v2314_v43 }
0x1e9a   :  { %2324 = vst.msk [vmem:[%s4084_s9 + $0xa] sm:$0xc] %vm1636_vm7, %v2316_v15  ;;  %2318 = vrot.lane.b32.xlu1 %v2316_v15, %s3262_s1 }
0x1f0c   :  { %v2319_v16 = vpop.permute.xlu1 %2318 }
0x1f0d   :  { %v2321_v18 = vsel %vm150_vm2, %v2319_v16, %v2316_v15  ;;  %2323 = vst.msk [vmem:[%s4084_s9 + $0x12] sm:$0x3] %vm148_vm0, %v2319_v16 }
0x1f0e   :  { %v2322_v19 = vmul.f32 %v2321_v18, %v3703_v37 }
0x1f10   :  { %2885 = vmatmul.msk.f32.vlgmr.msra.gmra.mxu2 %vm1566_vm8, %v2322_v19 }
0x1f93   :  { %v2350_v0 = vpop.f32.mrf.mxu2 }
0x1f94   :  { %v2351_v23 = vadd.f32 %v2350_v0, %v3666_v36 }
0x1f96   :  { %2374 = vrot.lane.b32.xlu0 %v2351_v23, %s3263_s5  ;;  %v2353_v26 = vadd.f32 %v2351_v23, %v2329_v25 }
0x1f98   :  { %v2886_v28 = vmul.f32 -1.442695, %v2353_v26 }
0x1f9a   :  { %3038 = vpow2.f32 %v2886_v28 }
0x1fa0   :  { %v3039_v32 = vpop.eup %3038 }
0x1fa1   :  { %v2357_v33 = vadd.f32 1.0, %v3039_v32 }
0x1fa3   :  { %3040 = vrcp.f32 %v2357_v33  ;;  %v2369_v35 = vand.u32 2147483648, %v2357_v33  ;;  %vm2363_vm13 = vweird.f32 %v2357_v33  ;;  %v2367_v38 = vand.u32 2147483647, %v2357_v33 }
0x1fa5   :  { %v2370_v39 = vor.u32 1.1754944e-38, %v2369_v35  ;;  %vm2368_vm15 = vcmp.eq.f32.partialorder %v2367_v38, 8.507059e+37 }
0x1fa9   :  { %v3041_v49 = vpop.eup %3040 }
0x1faa   :  { %v2359_v29 = vmul.f32 %v3041_v49, %v2357_v33  ;;  %vm2364_vm12 = vweird.f32 %v3041_v49 }
0x1fab   :  { %vm2365_vm14 = vmor %vm2363_vm13, %vm2364_vm12 }
0x1fac   :  { %v2360_v44 = vsub.f32 1.0, %v2359_v29 }
0x1fae   :  { %v2361_v30 = vmul.f32 %v3041_v49, %v2360_v44 }
0x1fb0   :  { %v2362_v56 = vadd.f32 %v3041_v49, %v2361_v30 }
0x1fb2   :  { %v2366_v40 = vsel %vm2365_vm14, %v3041_v49, %v2362_v56 }
0x1fb3   :  { %v2371_v42 = vsel %vm2368_vm15, %v2370_v39, %v2366_v40 }
0x1fb4   :  { %v2384_v55 = vsub.f32 1.0, %v2371_v42  ;;  %v2390_v52 = vmul.f32 %v2371_v42, %v2316_v15 }
0x2008   :  { %v2375_v12 = vpop.permute.xlu0 %2374 }
0x2009   :  { %v2377_v46 = vmul.f32 %v2375_v12, %v2371_v42 }
0x200b   :  { %2379 = vrot.lane.b32.xlu1 %v2377_v46, %s3265_s6 }
0x2013   :  { %2401 = vrot.lane.b32.xlu1 %v2099_v31, %s3264_s19 }
0x207d   :  { %v2380_v41 = vpop.permute.xlu1 %2379 }
0x207e   :  { %v2382_v27 = vadd.f32 %v2380_v41, %v2329_v25 }
0x2080   :  { %3042 = vtanh.f32 %v2382_v27 }
0x2085   :  { %v2402_v58 = vpop.permute.xlu1 %2401 }
0x2086   :  { %v3043_v50 = vpop.eup %3042  ;;  %v2404_v59 = vsel %vm1552_vm1, %v2101_v9, %v2402_v58 }
0x2087   :  { %2386 = vrot.lane.b32.xlu2 %v3043_v50, %s3262_s1 }
0x20e1   :  { %v2387_v57 = vpop.permute.xlu2 %2386 }
0x20e2   :  { %v2389_v5 = vmul.f32 %v2387_v57, %v2384_v55 }
0x20e4   :  { %v2391_v10 = vadd.f32 %v2390_v52, %v2389_v5 }
0x20e6   :  { %2399 = vst.msk [vmem:[%s4084_s9 + $0x8] sm:$0xc] %vm1636_vm7, %v2391_v10  ;;  %2393 = vrot.lane.b32.xlu0 %v2391_v10, %s3262_s1 }
0x2158   :  { %v2394_v21 = vpop.permute.xlu0 %2393 }
0x2159   :  { %v2396_v31 = vsel %vm150_vm2, %v2394_v21, %v2391_v10  ;;  %2398 = vst.msk [vmem:[%s4084_s9 + $0x14] sm:$0x3] %vm148_vm0, %v2394_v21 }
0x215a   :  { %v2397_v17 = vmul.f32 %v2396_v31, %v3703_v37 }
0x215c   :  { %2887 = vmatmul.msk.f32.vlgmr.msra.gmra.mxu3 %vm1566_vm8, %v2397_v17 }
0x21df   :  { %v2425_v63 = vpop.f32.mrf.mxu3 }
0x21e0   :  { %v2426_v53 = vadd.f32 %v2425_v63, %v3666_v36 }
0x21e2   :  { %2449 = vrot.lane.b32.xlu2 %v2426_v53, %s3263_s5  ;;  %v2428_v60 = vadd.f32 %v2426_v53, %v2404_v59 }
0x21e4   :  { %v2888_v54 = vmul.f32 -1.442695, %v2428_v60 }
0x21e6   :  { %3044 = vpow2.f32 %v2888_v54 }
0x21ec   :  { %v3045_v61 = vpop.eup %3044 }
0x21ed   :  { %v2432_v51 = vadd.f32 1.0, %v3045_v61 }
0x21ef   :  { %3046 = vrcp.f32 %v2432_v51  ;;  %v2444_v13 = vand.u32 2147483648, %v2432_v51  ;;  %vm2438_vm4 = vweird.f32 %v2432_v51  ;;  %v2442_v14 = vand.u32 2147483647, %v2432_v51 }
0x21f1   :  { %v2445_v2 = vor.u32 1.1754944e-38, %v2444_v13  ;;  %vm2443_vm6 = vcmp.eq.f32.partialorder %v2442_v14, 8.507059e+37 }
0x21f5   :  { %v3047_v62 = vpop.eup %3046 }
0x21f6   :  { %v2434_v6 = vmul.f32 %v3047_v62, %v2432_v51  ;;  %vm2439_vm3 = vweird.f32 %v3047_v62 }
0x21f7   :  { %vm2440_vm5 = vmor %vm2438_vm4, %vm2439_vm3 }
0x21f8   :  { %v2435_v7 = vsub.f32 1.0, %v2434_v6 }
0x21fa   :  { %v2436_v8 = vmul.f32 %v3047_v62, %v2435_v7 }
0x21fc   :  { %v2437_v20 = vadd.f32 %v3047_v62, %v2436_v8 }
0x21fe   :  { %v2441_v34 = vsel %vm2440_vm5, %v3047_v62, %v2437_v20 }
0x21ff   :  { %v2446_v43 = vsel %vm2443_vm6, %v2445_v2, %v2441_v34 }
0x2200   :  { %v2459_v0 = vsub.f32 1.0, %v2446_v43  ;;  %v2465_v24 = vmul.f32 %v2446_v43, %v2391_v10 }
0x223c   :  { %v2450_v9 = vpop.permute.xlu2 %2449 }
0x223d   :  { %v2452_v15 = vmul.f32 %v2450_v9, %v2446_v43 }
0x223f   :  { %2454 = vrot.lane.b32.xlu0 %v2452_v15, %s3265_s6 }
0x2247   :  { %2475 = vrot.lane.b32.xlu0 %v1716_v11, %s3264_s19 }
0x22b1   :  { %v2455_v16 = vpop.permute.xlu0 %2454 }
0x22b2   :  { %v2457_v18 = vadd.f32 %v2455_v16, %v2404_v59 }
0x22b4   :  { %3048 = vtanh.f32 %v2457_v18 }
0x22b9   :  { %v2476_v29 = vpop.permute.xlu0 %2475 }
0x22ba   :  { %v3049_v19 = vpop.eup %3048  ;;  %v2478_v44 = vsel %vm1552_vm1, %v3677_v47, %v2476_v29 }
0x22bb   :  { %2461 = vrot.lane.b32.xlu1 %v3049_v19, %s3262_s1 }
0x232d   :  { %v2462_v23 = vpop.permute.xlu1 %2461 }
0x232e   :  { %v2464_v25 = vmul.f32 %v2462_v23, %v2459_v0 }
0x2330   :  { %v2466_v26 = vadd.f32 %v2465_v24, %v2464_v25 }
0x2332   :  { %2474 = vst.msk [vmem:[%s4084_s9 + $0x6] sm:$0xc] %vm1636_vm7, %v2466_v26  ;;  %2468 = vrot.lane.b32.xlu2 %v2466_v26, %s3262_s1 }
0x238c   :  { %v2469_v28 = vpop.permute.xlu2 %2468 }
0x238d   :  { %v2471_v11 = vsel %vm150_vm2, %v2469_v28, %v2466_v26  ;;  %2473 = vst.msk [vmem:[%s4084_s9 + $0x16] sm:$0x3] %vm148_vm0, %v2469_v28 }
0x238e   :  { %v2472_v32 = vmul.f32 %v2471_v11, %v3703_v37 }
0x2390   :  { %2889 = vmatmul.msk.f32.vlgmr.msrb.gmra.mxu0 %vm1566_vm8, %v2472_v32 }
0x240d   :  { %v2499_v33 = vpop.f32.mrf.mxu0 }
0x240e   :  { %v2500_v49 = vadd.f32 %v2499_v33, %v3666_v36 }
0x2410   :  { %2523 = vrot.lane.b32.xlu1 %v2500_v49, %s3263_s5  ;;  %v2502_v30 = vadd.f32 %v2500_v49, %v2478_v44 }
0x2412   :  { %v2890_v56 = vmul.f32 -1.442695, %v2502_v30 }
0x2414   :  { %3050 = vpow2.f32 %v2890_v56 }
0x241a   :  { %v3051_v35 = vpop.eup %3050 }
0x241b   :  { %v2506_v38 = vadd.f32 1.0, %v3051_v35 }
0x241d   :  { %3052 = vrcp.f32 %v2506_v38  ;;  %v2518_v41 = vand.u32 2147483648, %v2506_v38  ;;  %vm2512_vm10 = vweird.f32 %v2506_v38  ;;  %v2516_v27 = vand.u32 2147483647, %v2506_v38 }
0x241f   :  { %v2519_v55 = vor.u32 1.1754944e-38, %v2518_v41  ;;  %vm2517_vm12 = vcmp.eq.f32.partialorder %v2516_v27, 8.507059e+37 }
0x2423   :  { %v3053_v40 = vpop.eup %3052 }
0x2424   :  { %v2508_v39 = vmul.f32 %v3053_v40, %v2506_v38  ;;  %vm2513_vm9 = vweird.f32 %v3053_v40 }
0x2425   :  { %vm2514_vm11 = vmor %vm2512_vm10, %vm2513_vm9 }
0x2426   :  { %v2509_v12 = vsub.f32 1.0, %v2508_v39 }
0x2428   :  { %v2510_v42 = vmul.f32 %v3053_v40, %v2509_v12 }
0x242a   :  { %v2511_v46 = vadd.f32 %v3053_v40, %v2510_v42 }
0x242c   :  { %v2515_v50 = vsel %vm2514_vm11, %v3053_v40, %v2511_v46 }
0x242d   :  { %v2520_v52 = vsel %vm2517_vm12, %v2519_v55, %v2515_v50 }
0x242e   :  { %v2533_v17 = vsub.f32 1.0, %v2520_v52  ;;  %v2539_v53 = vmul.f32 %v2520_v52, %v2466_v26 }
0x2482   :  { %v2524_v57 = vpop.permute.xlu1 %2523 }
0x2483   :  { %v2526_v5 = vmul.f32 %v2524_v57, %v2520_v52 }
0x2485   :  { %2528 = vrot.lane.b32.xlu2 %v2526_v5, %s3265_s6 }
0x248d   :  { %2550 = vrot.lane.b32.xlu2 %v1639_v45, %s3264_s19 }
0x24df   :  { %v2529_v10 = vpop.permute.xlu2 %2528 }
0x24e0   :  { %v2531_v21 = vadd.f32 %v2529_v10, %v2478_v44 }
0x24e2   :  { %3054 = vtanh.f32 %v2531_v21 }
0x24e7   :  { %v2551_v62 = vpop.permute.xlu2 %2550 }
0x24e8   :  { %v3055_v31 = vpop.eup %3054  ;;  %v2553_v6 = vsel %vm1552_vm1, %v1641_v1, %v2551_v62 }
0x24e9   :  { %2535 = vrot.lane.b32.xlu0 %v3055_v31, %s3262_s1 }
0x255b   :  { %v2536_v63 = vpop.permute.xlu0 %2535 }
0x255c   :  { %v2538_v58 = vmul.f32 %v2536_v63, %v2533_v17 }
0x255e   :  { %v2540_v59 = vadd.f32 %v2539_v53, %v2538_v58 }
0x2560   :  { %2548 = vst.msk [vmem:[%s4084_s9 + $0x4] sm:$0xc] %vm1636_vm7, %v2540_v59  ;;  %2542 = vrot.lane.b32.xlu1 %v2540_v59, %s3262_s1 }
0x25d2   :  { %v2543_v60 = vpop.permute.xlu1 %2542 }
0x25d3   :  { %v2545_v45 = vsel %vm150_vm2, %v2543_v60, %v2540_v59  ;;  %2547 = vst.msk [vmem:[%s4084_s9 + $0x18] sm:$0x3] %vm148_vm0, %v2543_v60 }
0x25d4   :  { %v2546_v54 = vmul.f32 %v2545_v45, %v3703_v37 }
0x25d6   :  { %2891 = vmatmul.msk.f32.vlgmr.msrb.gmra.mxu1 %vm1566_vm8, %v2546_v54 }
0x2653   :  { %v2574_v61 = vpop.f32.mrf.mxu1 }
0x2654   :  { %v2575_v51 = vadd.f32 %v2574_v61, %v3666_v36 }
0x2656   :  { %2598 = vrot.lane.b32.xlu0 %v2575_v51, %s3263_s5  ;;  %v2577_v7 = vadd.f32 %v2575_v51, %v2553_v6 }
0x2658   :  { %v2892_v8 = vmul.f32 -1.442695, %v2577_v7 }
0x265a   :  { %3056 = vpow2.f32 %v2892_v8 }
0x2660   :  { %v3057_v20 = vpop.eup %3056 }
0x2661   :  { %v2581_v13 = vadd.f32 1.0, %v3057_v20 }
0x2663   :  { %3058 = vrcp.f32 %v2581_v13  ;;  %v2593_v15 = vand.u32 2147483648, %v2581_v13  ;;  %vm2587_vm14 = vweird.f32 %v2581_v13  ;;  %v2591_v16 = vand.u32 2147483647, %v2581_v13 }
0x2665   :  { %v2594_v19 = vor.u32 1.1754944e-38, %v2593_v15  ;;  %vm2592_vm3 = vcmp.eq.f32.partialorder %v2591_v16, 8.507059e+37 }
0x2669   :  { %v3059_v14 = vpop.eup %3058 }
0x266a   :  { %v2583_v34 = vmul.f32 %v3059_v14, %v2581_v13  ;;  %vm2588_vm13 = vweird.f32 %v3059_v14 }
0x266b   :  { %vm2589_vm15 = vmor %vm2587_vm14, %vm2588_vm13 }
0x266c   :  { %v2584_v2 = vsub.f32 1.0, %v2583_v34 }
0x266e   :  { %v2585_v9 = vmul.f32 %v3059_v14, %v2584_v2 }
0x2670   :  { %v2586_v43 = vadd.f32 %v3059_v14, %v2585_v9 }
0x2672   :  { %v2590_v18 = vsel %vm2589_vm15, %v3059_v14, %v2586_v43 }
0x2673   :  { %v2595_v0 = vsel %vm2592_vm3, %v2594_v19, %v2590_v18 }
0x2674   :  { %v2608_v28 = vsub.f32 1.0, %v2595_v0  ;;  %v2614_v32 = vmul.f32 %v2595_v0, %v2540_v59 }
0x26c8   :  { %v2599_v1 = vpop.permute.xlu0 %2598 }
0x26c9   :  { %v2601_v23 = vmul.f32 %v2599_v1, %v2595_v0 }
0x26cb   :  { %2603 = vrot.lane.b32.xlu1 %v2601_v23, %s3265_s6 }
0x26d3   :  { %2625 = vrot.lane.b32.xlu1 %v3684_v48, %s3264_s19 }
0x273d   :  { %v2604_v24 = vpop.permute.xlu1 %2603 }
0x273e   :  { %v2606_v25 = vadd.f32 %v2604_v24, %v2553_v6 }
0x2740   :  { %3060 = vtanh.f32 %v2606_v25 }
0x2745   :  { %v2626_v38 = vpop.permute.xlu1 %2625 }
0x2746   :  { %v3061_v26 = vpop.eup %3060  ;;  %v2628_v40 = vsel %vm1552_vm1, %v1561_v3, %v2626_v38 }
0x2747   :  { %2610 = vrot.lane.b32.xlu2 %v3061_v26, %s3262_s1 }
0x27a1   :  { %v2611_v11 = vpop.permute.xlu2 %2610 }
0x27a2   :  { %v2613_v33 = vmul.f32 %v2611_v11, %v2608_v28 }
0x27a4   :  { %v2615_v49 = vadd.f32 %v2614_v32, %v2613_v33 }
0x27a6   :  { %2623 = vst.msk [vmem:[%s4084_s9 + $0x2] sm:$0xc] %vm1636_vm7, %v2615_v49  ;;  %2617 = vrot.lane.b32.xlu0 %v2615_v49, %s3262_s1 }
0x2818   :  { %v2618_v29 = vpop.permute.xlu0 %2617 }
0x2819   :  { %v2620_v44 = vsel %vm150_vm2, %v2618_v29, %v2615_v49  ;;  %2622 = vst.msk [vmem:[%s4084_s9 + $0x1a] sm:$0x3] %vm148_vm0, %v2618_v29 }
0x281a   :  { %v2621_v30 = vmul.f32 %v2620_v44, %v3703_v37 }
0x281c   :  { %2893 = vmatmul.msk.f32.vlgmr.msrb.gmra.mxu2 %vm1566_vm8, %v2621_v30 }
0x289f   :  { %v2649_v56 = vpop.f32.mrf.mxu2 }
0x28a0   :  { %v2650_v35 = vadd.f32 %v2649_v56, %v3666_v36 }
0x28a2   :  { %2673 = vrot.lane.b32.xlu2 %v2650_v35, %s3263_s5  ;;  %v2652_v39 = vadd.f32 %v2650_v35, %v2628_v40 }
0x28a4   :  { %v2894_v12 = vmul.f32 -1.442695, %v2652_v39 }
0x28a6   :  { %3062 = vpow2.f32 %v2894_v12 }
0x28ac   :  { %v3063_v42 = vpop.eup %3062 }
0x28ad   :  { %v2656_v46 = vadd.f32 1.0, %v3063_v42 }
0x28af   :  { %3064 = vrcp.f32 %v2656_v46  ;;  %v2668_v52 = vand.u32 2147483648, %v2656_v46  ;;  %vm2662_vm5 = vweird.f32 %v2656_v46  ;;  %v2666_v5 = vand.u32 2147483647, %v2656_v46 }
0x28b1   :  { %v2669_v21 = vor.u32 1.1754944e-38, %v2668_v52  ;;  %vm2667_vm9 = vcmp.eq.f32.partialorder %v2666_v5, 8.507059e+37 }
0x28b5   :  { %v3065_v41 = vpop.eup %3064 }
0x28b6   :  { %v2658_v27 = vmul.f32 %v3065_v41, %v2656_v46  ;;  %vm2663_vm4 = vweird.f32 %v3065_v41 }
0x28b7   :  { %vm2664_vm6 = vmor %vm2662_vm5, %vm2663_vm4 }
0x28b8   :  { %v2659_v50 = vsub.f32 1.0, %v2658_v27 }
0x28ba   :  { %v2660_v55 = vmul.f32 %v3065_v41, %v2659_v50 }
0x28bc   :  { %v2661_v57 = vadd.f32 %v3065_v41, %v2660_v55 }
0x28be   :  { %v2665_v10 = vsel %vm2664_vm6, %v3065_v41, %v2661_v57 }
0x28bf   :  { %v2670_v31 = vsel %vm2667_vm9, %v2669_v21, %v2665_v10 }
0x28c0   :  { %v2683_v59 = vsub.f32 1.0, %v2670_v31  ;;  %v2689_v45 = vmul.f32 %v2670_v31, %v2615_v49 }
0x28fc   :  { %v2674_v3 = vpop.permute.xlu2 %2673 }
0x28fd   :  { %v2676_v17 = vmul.f32 %v2674_v3, %v2670_v31 }
0x28ff   :  { %2678 = vrot.lane.b32.xlu0 %v2676_v17, %s3265_s6 }
0x2907   :  { %2700 = vrot.lane.b32.xlu0 %v1792_v4, %s3264_s19 }
0x2971   :  { %v2679_v63 = vpop.permute.xlu0 %2678 }
0x2972   :  { %v2681_v53 = vadd.f32 %v2679_v63, %v2628_v40 }
0x2974   :  { %3066 = vtanh.f32 %v2681_v53 }
0x2979   :  { %v2701_v7 = vpop.permute.xlu0 %2700 }
0x297a   :  { %v3067_v58 = vpop.eup %3066  ;;  %v2703_v8 = vsel %vm1552_vm1, %v1794_v22, %v2701_v7 }
0x297b   :  { %2685 = vrot.lane.b32.xlu1 %v3067_v58, %s3262_s1 }
0x29ed   :  { %v2686_v60 = vpop.permute.xlu1 %2685 }
0x29ee   :  { %v2688_v54 = vmul.f32 %v2686_v60, %v2683_v59 }
0x29f0   :  { %v2690_v61 = vadd.f32 %v2689_v45, %v2688_v54 }
0x29f2   :  { %2698 = vst.msk [vmem:[%s4084_s9] sm:$0xc] %vm1636_vm7, %v2690_v61  ;;  %2692 = vrot.lane.b32.xlu2 %v2690_v61, %s3262_s1 }
0x2a4c   :  { %v2693_v48 = vpop.permute.xlu2 %2692 }
0x2a4d   :  { %v2695_v4 = vsel %vm150_vm2, %v2693_v48, %v2690_v61  ;;  %2697 = vst.msk [vmem:[%s4084_s9 + $0x1c] sm:$0x3] %vm148_vm0, %v2693_v48 }
0x2a4e   :  { %v2696_v51 = vmul.f32 %v2695_v4, %v3703_v37 }
0x2a50   :  { %2895 = vmatmul.msk.f32.vlgmr.msrb.gmra.mxu3 %vm1566_vm8, %v2696_v51 }
0x2ad3   :  { %v2724_v62 = vpop.f32.mrf.mxu3 }
0x2ad4   :  { %v2725_v6 = vadd.f32 %v2724_v62, %v3666_v36 }
0x2ad6   :  { %2748 = vrot.lane.b32.xlu1 %v2725_v6, %s3263_s5  ;;  %v2727_v20 = vadd.f32 %v2725_v6, %v2703_v8 }
0x2ad8   :  { %v2896_v13 = vmul.f32 -1.442695, %v2727_v20 }
0x2ada   :  { %3068 = vpow2.f32 %v2896_v13 }
0x2ae0   :  { %v3069_v14 = vpop.eup %3068 }
0x2ae1   :  { %v2731_v34 = vadd.f32 1.0, %v3069_v14 }
0x2ae3   :  { %3070 = vrcp.f32 %v2731_v34  ;;  %v2743_v36 = vand.u32 2147483648, %v2731_v34  ;;  %vm2737_vm8 = vweird.f32 %v2731_v34  ;;  %v2741_v16 = vand.u32 2147483647, %v2731_v34 }
0x2ae5   :  { %v2744_v47 = vor.u32 1.1754944e-38, %v2743_v36  ;;  %vm2742_vm11 = vcmp.eq.f32.partialorder %v2741_v16, 8.507059e+37 }
0x2ae9   :  { %v3071_v2 = vpop.eup %3070 }
0x2aea   :  { %v2733_v37 = vmul.f32 %v3071_v2, %v2731_v34  ;;  %vm2738_vm2 = vweird.f32 %v3071_v2 }
0x2aeb   :  { %vm2739_vm10 = vmor %vm2737_vm8, %vm2738_vm2 }
0x2aec   :  { %v2734_v9 = vsub.f32 1.0, %v2733_v37 }
0x2aee   :  { %v2735_v43 = vmul.f32 %v3071_v2, %v2734_v9 }
0x2af0   :  { %v2736_v15 = vadd.f32 %v3071_v2, %v2735_v43 }
0x2af2   :  { %v2740_v18 = vsel %vm2739_vm10, %v3071_v2, %v2736_v15 }
0x2af3   :  { %v2745_v19 = vsel %vm2742_vm11, %v2744_v47, %v2740_v18 }
0x2af4   :  { %v2758_v25 = vsub.f32 1.0, %v2745_v19  ;;  %v2764_v28 = vmul.f32 %v2745_v19, %v2690_v61 }
0x2b48   :  { %v2749_v22 = vpop.permute.xlu1 %2748 }
0x2b49   :  { %v2751_v1 = vmul.f32 %v2749_v22, %v2745_v19 }
0x2b4b   :  { %2753 = vrot.lane.b32.xlu2 %v2751_v1, %s3265_s6 }
0x2ba5   :  { %v2754_v0 = vpop.permute.xlu2 %2753 }
0x2ba6   :  { %v2756_v23 = vadd.f32 %v2754_v0, %v2703_v8 }
0x2ba8   :  { %3072 = vtanh.f32 %v2756_v23 }
0x2bae   :  { %v3073_v24 = vpop.eup %3072 }
0x2baf   :  { %2760 = vrot.lane.b32.xlu0 %v3073_v24, %s3262_s1 }
0x2c21   :  { %v2761_v26 = vpop.permute.xlu0 %2760 }
0x2c22   :  { %v2763_v11 = vmul.f32 %v2761_v26, %v2758_v25 }
0x2c24   :  { %v2765_v32 = vadd.f32 %v2764_v28, %v2763_v11 }
0x2c26   :  { %2771 = vst.msk [vmem:[%s4084_s9 - $0x2] sm:$0xc] %vm1636_vm7, %v2765_v32  ;;  %2767 = vrot.lane.b32.xlu1 %v2765_v32, %s3262_s1 }
0x2c98   :  { %v2768_v33 = vpop.permute.xlu1 %2767 }
0x2c99   :  { %2770 = vst.msk [vmem:[%s4084_s9 + $0x1e] sm:$0x3] %vm148_vm0, %v2768_v33 }
0x2c9a   :  { %2776 = vsyncpa [#allocation6], 1 }
0x2c9b   :  { %2777 = vsyncpa [#allocation8], 1 }
0x2c9c   :  { %2778 = vsyncpa [#allocation11], 1 }
0x2c9d   :  { %2779 = vsyncpa [#allocation14], 1 }

</bundles_post_ra>
